<compile_context>
chip_gen: v5e
topology: v5e:2x2
jax: 0.10.0
libtpu: 0.0.40
codegen_flags: <defaults>
</compile_context>

<pallas_src>
import functools

import numpy as np
import jax
import jax.numpy as jnp
from jax import lax
from jax.experimental import pallas as pl
from jax.experimental.pallas import tpu as pltpu


_VMEM_LIMIT = 48 * 1024 * 1024  # above 16/32 MiB defaults, below physical on all gens


# ----------------------------------------------------------------------------
# helpers
# ----------------------------------------------------------------------------
def _round_up(n, m):
    return ((n + m - 1) // m) * m


def _pick_tile(n, cap):
    """Largest multiple of 128 dividing n (n is already a multiple of 128)."""
    best = 128
    t = 256
    while t <= min(n, cap):
        if n % t == 0:
            best = t
        t += 128
    return best


def _sigmoid(x):
    return 1.0 / (1.0 + jnp.exp(-x))


def _attn_chain_dtype():
    """bf16 elementwise attention chain on chips with bf16 VPU/EUP (v6e/v7x);
    f32 elsewhere (v5e and older would only add pack/unpack work)."""
    try:
        kind = jax.devices()[0].device_kind.lower()
    except Exception:
        return jnp.float32
    if ("v6" in kind) or ("v7" in kind) or ("7x" in kind):
        return jnp.bfloat16
    return jnp.float32


# ----------------------------------------------------------------------------
# Kernel 1: fused q/k/v 1x1-conv projection + channel reduction (max or mean)
#   * three 1x1 convs collapsed into one (3*C2, C) @ (C, TILE) MXU dot
#   * q optionally negated (folds the "1 - sigmoid" flip of the out1 path)
#   * v emitted in bf16; padded key columns zeroed so they never contribute
# ----------------------------------------------------------------------------
def _qkv_proj_kernel(x_ref, w_ref, b_ref, q_ref, k_ref, v_ref, *,
                     c2, use_mean, negate_q, valid_hw):
    x = x_ref[0].astype(jnp.bfloat16)                                # (C, T)
    y = jnp.dot(w_ref[...], x, preferred_element_type=jnp.float32)   # (3C2, T)
    y = y + b_ref[...]
    qp = y[0:c2, :]
    kp = y[c2:2 * c2, :]
    vp = y[2 * c2:3 * c2, :]

    red = jnp.mean if use_mean else jnp.max
    q_red = red(qp, axis=0, keepdims=True)                           # (1, T)
    k_red = red(kp, axis=0, keepdims=True)
    if negate_q:                                  # 1 - sigmoid(e) == sigmoid(-e)
        q_red = -q_red

    if valid_hw is not None:                      # zero padded key columns of v
        t = vp.shape[1]
        lane = lax.broadcasted_iota(jnp.int32, (1, t), 1)
        vp = jnp.where(pl.program_id(1) * t + lane < valid_hw, vp, 0.0)

    q_ref[...] = q_red[None]                                         # (1,1,T)
    k_ref[...] = k_red[None]
    v_ref[...] = vp.astype(jnp.bfloat16)[None]                       # (1,C2,T) bf16


def qkv_project(x, w_all, b_all, c2, *, use_mean, negate_q, tile, valid_hw):
    """x: (B, C, HWp) f32.  Returns q (B,1,HWp) f32, k (B,1,HWp) f32,
    v (B,C2,HWp) bf16."""
    B, C, HWp = x.shape
    grid = (B, HWp // tile)
    out_shape = (
        jax.ShapeDtypeStruct((B, 1, HWp), jnp.float32),
        jax.ShapeDtypeStruct((B, 1, HWp), jnp.float32),
        jax.ShapeDtypeStruct((B, c2, HWp), jnp.bfloat16),
    )
    return pl.pallas_call(
        functools.partial(_qkv_proj_kernel, c2=c2, use_mean=use_mean,
                          negate_q=negate_q, valid_hw=valid_hw),
        out_shape=out_shape,
        grid=grid,
        in_specs=[
            pl.BlockSpec((1, C, tile), lambda b, i: (b, 0, i)),
            pl.BlockSpec((3 * c2, C), lambda b, i: (0, 0)),
            pl.BlockSpec((3 * c2, 1), lambda b, i: (0, 0)),
        ],
        out_specs=(
            pl.BlockSpec((1, 1, tile), lambda b, i: (b, 0, i)),
            pl.BlockSpec((1, 1, tile), lambda b, i: (b, 0, i)),
            pl.BlockSpec((1, c2, tile), lambda b, i: (b, 0, i)),
        ),
        compiler_params=pltpu.CompilerParams(
            dimension_semantics=("parallel", "parallel"),
            vmem_limit_bytes=_VMEM_LIMIT),
    )(x, w_all, b_all)


# ----------------------------------------------------------------------------
# Kernel 2: cross attention + value bmm + fused 1x1 conv (gamma folded) + residual
#   out[b,co,i] = x[b,co,i] + sum_c Wg[co,c]*(sum_j v[b,c,j]*sigmoid(q[b,i]*k[b,j]))
#                 + bg[co]
#   (the "1 - sigmoid" path is handled by q already being negated)
#   k and v are resident per batch in VMEM; q is a small column block loaded
#   once per query tile; the B*HW*HW attention matrix never touches HBM.
# ----------------------------------------------------------------------------
def _cross_attn_kernel(q_ref, k_ref, v_ref, w_ref, b_ref, xres_ref, o_ref,
                       acc_ref, *, tj, chain_dtype):
    j = pl.program_id(2)

    @pl.when(j == 0)
    def _init():
        acc_ref[...] = jnp.zeros_like(acc_ref)

    joff = pl.multiple_of(j * tj, 128)
    q_col = q_ref[0].astype(chain_dtype)                         # (TI, 1)
    k_row = k_ref[0, :, pl.ds(joff, tj)].astype(chain_dtype)     # (1, TJ)
    attn = _sigmoid(q_col * k_row)                                # (TI, TJ) VPU+EUP
    v = v_ref[0, :, pl.ds(joff, tj)]                              # (C2, TJ) bf16
    # contract the key axis (last dim of both operands) on the MXU
    acc_ref[...] += lax.dot_general(
        v, attn.astype(jnp.bfloat16),
        dimension_numbers=(((1,), (1,)), ((), ())),
        preferred_element_type=jnp.float32)                       # (C2, TI)

    @pl.when(j == pl.num_programs(2) - 1)
    def _finalize():
        y = jnp.dot(w_ref[...], acc_ref[...].astype(jnp.bfloat16),
                    preferred_element_type=jnp.float32)           # (C, TI)
        o_ref[...] = xres_ref[...] + (y + b_ref[...])[None]


def cross_attention_block(q_col, k_row, v, w_fold, b_fold, x_res, *,
                          ti, tj, chain_dtype):
    """q_col: (B,HWp,1) f32, k_row: (B,1,HWp) f32, v: (B,C2,HWp) bf16,
    x_res: (B,C,HWp) f32."""
    B, C, HWp = x_res.shape
    C2 = v.shape[1]
    grid = (B, HWp // ti, HWp // tj)          # key axis last (reduction)
    return pl.pallas_call(
        functools.partial(_cross_attn_kernel, tj=tj, chain_dtype=chain_dtype),
        out_shape=jax.ShapeDtypeStruct((B, C, HWp), jnp.float32),
        grid=grid,
        in_specs=[
            pl.BlockSpec((1, ti, 1), lambda b, i, j: (b, i, 0)),    # q column (per i)
            pl.BlockSpec((1, 1, HWp), lambda b, i, j: (b, 0, 0)),   # k, resident per b
            pl.BlockSpec((1, C2, HWp), lambda b, i, j: (b, 0, 0)),  # v, resident per b
            pl.BlockSpec((C, C2), lambda b, i, j: (0, 0)),          # gamma*conv weight
            pl.BlockSpec((C, 1), lambda b, i, j: (0, 0)),           # gamma*conv bias
            pl.BlockSpec((1, C, ti), lambda b, i, j: (b, 0, i)),    # residual input
        ],
        out_specs=pl.BlockSpec((1, C, ti), lambda b, i, j: (b, 0, i)),
        scratch_shapes=[pltpu.VMEM((C2, ti), jnp.float32)],
        compiler_params=pltpu.CompilerParams(
            dimension_semantics=("parallel", "parallel", "arbitrary"),
            vmem_limit_bytes=_VMEM_LIMIT),
    )(q_col, k_row, v, w_fold, b_fold, x_res)


# ----------------------------------------------------------------------------
# Forward pass (Pallas) and a pure-JAX reference with identical precision policy
# ----------------------------------------------------------------------------
def cross_module_forward(x1, x2, p):
    B, C, H, W = x1.shape
    C2 = C // 2
    HW = H * W
    HWp = _round_up(HW, 128)                   # lane-dense, unmasked stores
    chain = _attn_chain_dtype()

    x1f = x1.reshape(B, C, HW)                 # pure reshape, NCHW kept end-to-end
    x2f = x2.reshape(B, C, HW)
    if HWp != HW:
        pad = ((0, 0), (0, 0), (0, HWp - HW))
        x1f = jnp.pad(x1f, pad)
        x2f = jnp.pad(x2f, pad)
    valid_hw = HW if HWp != HW else None

    t_proj = _pick_tile(HWp, cap=1024)
    ti = _pick_tile(HWp, cap=1024)
    tj = _pick_tile(HWp, cap=512)

    # three 1x1-conv projections collapsed into one weight per input
    w_all1 = jnp.concatenate([p["wq1"], p["wk1"], p["wv1"]], 0).astype(jnp.bfloat16)
    b_all1 = jnp.concatenate([p["bq1"], p["bk1"], p["bv1"]], 0).reshape(3 * C2, 1)
    w_all2 = jnp.concatenate([p["wq2"], p["wk2"], p["wv2"]], 0).astype(jnp.bfloat16)
    b_all2 = jnp.concatenate([p["bq2"], p["bk2"], p["bv2"]], 0).reshape(3 * C2, 1)

    # q1 is negated at projection time: 1 - sigmoid(q1*k2) == sigmoid((-q1)*k2)
    q1n, k1, v1 = qkv_project(x1f, w_all1, b_all1, C2, use_mean=False,
                              negate_q=True, tile=t_proj, valid_hw=valid_hw)
    q2, k2, v2 = qkv_project(x2f, w_all2, b_all2, C2, use_mean=True,
                             negate_q=False, tile=t_proj, valid_hw=valid_hw)

    # fold gamma into the trailing 1x1 convs:  x + gamma*(W@o + b)
    w2g = (p["gamma1"] * p["w_conv2"]).astype(jnp.bfloat16)
    b2g = (p["gamma1"] * p["b_conv2"]).reshape(C, 1).astype(jnp.float32)
    w1g = (p["gamma2"] * p["w_conv1"]).astype(jnp.bfloat16)
    b1g = (p["gamma2"] * p["b_conv1"]).reshape(C, 1).astype(jnp.float32)

    # (B,1,HWp) -> (B,HWp,1) is a zero-cost row-major metadata reshape
    q1n_col = q1n.reshape(B, HWp, 1)
    q2_col = q2.reshape(B, HWp, 1)

    # out1 = x1 + gamma1 * conv2( v1 @ (1 - sigmoid(q1 k2^T))^T )
    out1 = cross_attention_block(q1n_col, k2, v1, w2g, b2g, x1f,
                                 ti=ti, tj=tj, chain_dtype=chain)
    # out2 = x2 + gamma2 * conv1( v2 @ (sigmoid(q2 k1^T))^T )
    out2 = cross_attention_block(q2_col, k1, v2, w1g, b1g, x2f,
                                 ti=ti, tj=tj, chain_dtype=chain)

    if HWp != HW:
        out1 = out1[:, :, :HW]
        out2 = out2[:, :, :HW]
    return out1.reshape(B, C, H, W), out2.reshape(B, C, H, W)


def cross_module_reference(x1, x2, p, chain_dtype=jnp.float32):
    """Pure-JAX reference replicating the kernels' precision policy
    (bf16 matmul operands, f32 accumulation, sign-folded flip, chain dtype),
    used to validate the Pallas plumbing (tiling, indexing, fusion)."""
    B, C, H, W = x1.shape
    HW = H * W
    bf, f32 = jnp.bfloat16, jnp.float32
    cd = chain_dtype

    def proj(x, w, b):  # 1x1 conv on (B, C, HW)
        return (jnp.einsum("oc,bci->boi", w.astype(bf), x.astype(bf),
                           preferred_element_type=f32) + b.reshape(1, -1, 1))

    x1f = x1.reshape(B, C, HW)
    x2f = x2.reshape(B, C, HW)

    q1 = jnp.max(proj(x1f, p["wq1"], p["bq1"]), axis=1)      # (B, HW)
    k1 = jnp.max(proj(x1f, p["wk1"], p["bk1"]), axis=1)
    v1 = proj(x1f, p["wv1"], p["bv1"]).astype(bf)            # (B, C2, HW)
    q2 = jnp.mean(proj(x2f, p["wq2"], p["bq2"]), axis=1)
    k2 = jnp.mean(proj(x2f, p["wk2"], p["bk2"]), axis=1)
    v2 = proj(x2f, p["wv2"], p["bv2"]).astype(bf)

    # attention2 = 1 - sigmoid(q1 k2^T) == sigmoid((-q1) k2^T)  (exact identity)
    attn2 = _sigmoid((-q1)[:, :, None].astype(cd) * k2[:, None, :].astype(cd))
    o1 = jnp.einsum("bcj,bij->bci", v1, attn2.astype(bf),
                    preferred_element_type=f32)
    attn1 = _sigmoid(q2[:, :, None].astype(cd) * k1[:, None, :].astype(cd))
    o2 = jnp.einsum("bcj,bij->bci", v2, attn1.astype(bf),
                    preferred_element_type=f32)

    w2g = (p["gamma1"] * p["w_conv2"]).astype(bf)
    b2g = (p["gamma1"] * p["b_conv2"]).astype(f32)
    w1g = (p["gamma2"] * p["w_conv1"]).astype(bf)
    b1g = (p["gamma2"] * p["b_conv1"]).astype(f32)

    out1 = x1f + jnp.einsum("oc,bci->boi", w2g, o1.astype(bf),
                            preferred_element_type=f32) + b2g.reshape(1, -1, 1)
    out2 = x2f + jnp.einsum("oc,bci->boi", w1g, o2.astype(bf),
                            preferred_element_type=f32) + b1g.reshape(1, -1, 1)
    return out1.reshape(B, C, H, W), out2.reshape(B, C, H, W)


# ----------------------------------------------------------------------------
# Parameters (deterministic, synthetic)
# ----------------------------------------------------------------------------
def init_params(key, C):
    C2 = C // 2
    ks = iter(jax.random.split(key, 20))

    def conv_w(cout, cin):
        return jax.random.normal(next(ks), (cout, cin), jnp.float32) / np.sqrt(cin)

    def conv_b(cout):
        return 0.1 * jax.random.normal(next(ks), (cout,), jnp.float32)

    p = {}
    for name in ("q1", "k1", "v1", "q2", "k2", "v2"):
        p["w" + name] = conv_w(C2, C)
        p["b" + name] = conv_b(C2)
    p["w_conv1"] = conv_w(C, C2)
    p["b_conv1"] = conv_b(C)
    p["w_conv2"] = conv_w(C, C2)
    p["b_conv2"] = conv_b(C)
    # gamma1/gamma2 are zero-initialized in the PyTorch module; use nonzero
    # values here so the attention path is actually exercised by the test.
    p["gamma1"] = jnp.asarray(0.1, jnp.float32)
    p["gamma2"] = jnp.asarray(-0.2, jnp.float32)
    return p


if __name__ == "__main__":
    key = jax.random.PRNGKey(0)
    kx1, kx2, kp = jax.random.split(key, 3)
    B, C, H, W = 2, 4, 16, 16           # HW = 256 (already lane-dense)
    x1 = jax.random.normal(kx1, (B, C, H, W), jnp.float32)
    x2 = jax.random.normal(kx2, (B, C, H, W), jnp.float32)
    params = init_params(kp, C)

    out1, out2 = jax.jit(cross_module_forward)(x1, x2, params)
    jax.block_until_ready((out1, out2))

    assert out1.shape == (B, C, H, W) and out2.shape == (B, C, H, W)
    assert bool(jnp.all(jnp.isfinite(out1))) and bool(jnp.all(jnp.isfinite(out2)))

    chain = _attn_chain_dtype()
    ref_fn = jax.jit(lambda a, b, c: cross_module_reference(a, b, c, chain_dtype=chain))
    r1, r2 = ref_fn(x1, x2, params)
    np.testing.assert_allclose(np.asarray(out1), np.asarray(r1), rtol=2e-2, atol=2e-2)
    np.testing.assert_allclose(np.asarray(out2), np.asarray(r2), rtol=2e-2, atol=2e-2)
    print("KERNEL_OK")
</pallas_src>

<mosaic_0001>
module attributes {stable_mosaic.version = 11 : i64} {
  func.func @_qkv_proj_kernel(%arg0: i32, %arg1: i32, %arg2: memref<1x4x256xf32, #tpu.memory_space<vmem>>, %arg3: memref<6x4xbf16, #tpu.memory_space<vmem>>, %arg4: memref<6x1xf32, #tpu.memory_space<vmem>>, %arg5: memref<1x1x256xf32, #tpu.memory_space<vmem>>, %arg6: memref<1x1x256xf32, #tpu.memory_space<vmem>>, %arg7: memref<1x2x256xbf16, #tpu.memory_space<vmem>>) attributes {dimension_semantics = [#tpu.dimension_semantics<parallel>, #tpu.dimension_semantics<parallel>], iteration_bounds = array<i64: 2, 1>, scalar_prefetch = 0 : i64, scratch_operands = 0 : i64, tpu.core_type = #tpu.core_type<tc>, window_params = [{transform_indices = @transform_0, window_bounds = array<i64: 1, 4, 256>}, {pipeline_mode = #tpu.pipeline_mode<synchronous>, transform_indices = @transform_1, window_bounds = array<i64: 6, 4>}, {pipeline_mode = #tpu.pipeline_mode<synchronous>, transform_indices = @transform_2, window_bounds = array<i64: 6, 1>}, {transform_indices = @transform_3, window_bounds = array<i64: 1, 1, 256>}, {transform_indices = @transform_4, window_bounds = array<i64: 1, 1, 256>}, {transform_indices = @transform_5, window_bounds = array<i64: 1, 2, 256>}]} {
    %c0 = arith.constant 0 : index
    %c0_0 = arith.constant 0 : index
    %c0_1 = arith.constant 0 : index
    %0 = vector.load %arg2[%c0, %c0_0, %c0_1] : memref<1x4x256xf32, #tpu.memory_space<vmem>>, vector<1x4x256xf32>
    %1 = vector.shape_cast %0 : vector<1x4x256xf32> to vector<4x256xf32>
    %2 = arith.truncf %1 : vector<4x256xf32> to vector<4x256xbf16>
    %c0_2 = arith.constant 0 : index
    %c0_3 = arith.constant 0 : index
    %3 = vector.load %arg3[%c0_2, %c0_3] : memref<6x4xbf16, #tpu.memory_space<vmem>>, vector<6x4xbf16>
    %cst = arith.constant dense<0.000000e+00> : vector<6x256xf32>
    %4 = tpu.matmul %3, %2, %cst {dimension_numbers = #tpu.dot_dimension_numbers<[1], [0], [0], [1], [0, 0, 1, 1], [], []>} : vector<6x4xbf16>, vector<4x256xbf16>, vector<6x256xf32> -> vector<6x256xf32>
    %c0_4 = arith.constant 0 : index
    %c0_5 = arith.constant 0 : index
    %5 = vector.load %arg4[%c0_4, %c0_5] : memref<6x1xf32, #tpu.memory_space<vmem>>, vector<6x1xf32>
    %6 = vector.broadcast %5 : vector<6x1xf32> to vector<6x256xf32>
    %7 = arith.addf %4, %6 : vector<6x256xf32>
    %8 = vector.extract_strided_slice %7 {offsets = [0, 0], sizes = [2, 256], strides = [1, 1]} : vector<6x256xf32> to vector<2x256xf32>
    %9 = vector.extract_strided_slice %7 {offsets = [2, 0], sizes = [2, 256], strides = [1, 1]} : vector<6x256xf32> to vector<2x256xf32>
    %10 = vector.extract_strided_slice %7 {offsets = [4, 0], sizes = [2, 256], strides = [1, 1]} : vector<6x256xf32> to vector<2x256xf32>
    %cst_6 = arith.constant dense<0xFF800000> : vector<256xf32>
    %11 = vector.multi_reduction <maximumf>, %8, %cst_6 [0] : vector<2x256xf32> to vector<256xf32>
    %12 = vector.shape_cast %11 : vector<256xf32> to vector<1x256xf32>
    %cst_7 = arith.constant dense<0xFF800000> : vector<256xf32>
    %13 = vector.multi_reduction <maximumf>, %9, %cst_7 [0] : vector<2x256xf32> to vector<256xf32>
    %14 = vector.shape_cast %13 : vector<256xf32> to vector<1x256xf32>
    %cst_8 = arith.constant 0.000000e+00 : f32
    %15 = vector.broadcast %cst_8 : f32 to vector<1x256xf32>
    %16 = arith.subf %15, %12 : vector<1x256xf32>
    %17 = vector.shape_cast %16 : vector<1x256xf32> to vector<1x1x256xf32>
    %c0_9 = arith.constant 0 : index
    %c0_10 = arith.constant 0 : index
    %c0_11 = arith.constant 0 : index
    %18 = vector.load %arg5[%c0_9, %c0_10, %c0_11] : memref<1x1x256xf32, #tpu.memory_space<vmem>>, vector<1x1x256xf32>
    tpu.vector_store %arg5[%c0_9, %c0_10, %c0_11], %17 {strides = array<i32>} : memref<1x1x256xf32, #tpu.memory_space<vmem>>, vector<1x1x256xf32>,
    %19 = vector.shape_cast %14 : vector<1x256xf32> to vector<1x1x256xf32>
    %c0_12 = arith.constant 0 : index
    %c0_13 = arith.constant 0 : index
    %c0_14 = arith.constant 0 : index
    %20 = vector.load %arg6[%c0_12, %c0_13, %c0_14] : memref<1x1x256xf32, #tpu.memory_space<vmem>>, vector<1x1x256xf32>
    tpu.vector_store %arg6[%c0_12, %c0_13, %c0_14], %19 {strides = array<i32>} : memref<1x1x256xf32, #tpu.memory_space<vmem>>, vector<1x1x256xf32>,
    %21 = arith.truncf %10 : vector<2x256xf32> to vector<2x256xbf16>
    %22 = vector.shape_cast %21 : vector<2x256xbf16> to vector<1x2x256xbf16>
    %c0_15 = arith.constant 0 : index
    %c0_16 = arith.constant 0 : index
    %c0_17 = arith.constant 0 : index
    %23 = vector.load %arg7[%c0_15, %c0_16, %c0_17] : memref<1x2x256xbf16, #tpu.memory_space<vmem>>, vector<1x2x256xbf16>
    tpu.vector_store %arg7[%c0_15, %c0_16, %c0_17], %22 {strides = array<i32>} : memref<1x2x256xbf16, #tpu.memory_space<vmem>>, vector<1x2x256xbf16>,
    return
  }
  func.func @transform_0(%arg0: i32, %arg1: i32) -> (i32, i32, i32) {
    %c0_i32 = arith.constant 0 : i32
    %c0_i32_0 = arith.constant 0 : i32
    return %arg0, %c0_i32, %arg1 : i32, i32, i32
  }
  func.func @transform_1(%arg0: i32, %arg1: i32) -> (i32, i32) {
    %c0_i32 = arith.constant 0 : i32
    %c0_i32_0 = arith.constant 0 : i32
    %c0_i32_1 = arith.constant 0 : i32
    return %c0_i32, %c0_i32_0 : i32, i32
  }
  func.func @transform_2(%arg0: i32, %arg1: i32) -> (i32, i32) {
    %c0_i32 = arith.constant 0 : i32
    %c0_i32_0 = arith.constant 0 : i32
    %c0_i32_1 = arith.constant 0 : i32
    return %c0_i32, %c0_i32_0 : i32, i32
  }
  func.func @transform_3(%arg0: i32, %arg1: i32) -> (i32, i32, i32) {
    %c0_i32 = arith.constant 0 : i32
    %c0_i32_0 = arith.constant 0 : i32
    return %arg0, %c0_i32, %arg1 : i32, i32, i32
  }
  func.func @transform_4(%arg0: i32, %arg1: i32) -> (i32, i32, i32) {
    %c0_i32 = arith.constant 0 : i32
    %c0_i32_0 = arith.constant 0 : i32
    return %arg0, %c0_i32, %arg1 : i32, i32, i32
  }
  func.func @transform_5(%arg0: i32, %arg1: i32) -> (i32, i32, i32) {
    %c0_i32 = arith.constant 0 : i32
    %c0_i32_0 = arith.constant 0 : i32
    return %arg0, %c0_i32, %arg1 : i32, i32, i32
  }
}

module attributes {stable_mosaic.version = 11 : i64} {
  func.func @_qkv_proj_kernel(%arg0: i32, %arg1: i32, %arg2: memref<1x4x256xf32, #tpu.memory_space<vmem>>, %arg3: memref<6x4xbf16, #tpu.memory_space<vmem>>, %arg4: memref<6x1xf32, #tpu.memory_space<vmem>>, %arg5: memref<1x1x256xf32, #tpu.memory_space<vmem>>, %arg6: memref<1x1x256xf32, #tpu.memory_space<vmem>>, %arg7: memref<1x2x256xbf16, #tpu.memory_space<vmem>>) attributes {dimension_semantics = [#tpu.dimension_semantics<parallel>, #tpu.dimension_semantics<parallel>], iteration_bounds = array<i64: 2, 1>, scalar_prefetch = 0 : i64, scratch_operands = 0 : i64, tpu.core_type = #tpu.core_type<tc>, window_params = [{transform_indices = @transform_0, window_bounds = array<i64: 1, 4, 256>}, {pipeline_mode = #tpu.pipeline_mode<synchronous>, transform_indices = @transform_1, window_bounds = array<i64: 6, 4>}, {pipeline_mode = #tpu.pipeline_mode<synchronous>, transform_indices = @transform_2, window_bounds = array<i64: 6, 1>}, {transform_indices = @transform_3, window_bounds = array<i64: 1, 1, 256>}, {transform_indices = @transform_4, window_bounds = array<i64: 1, 1, 256>}, {transform_indices = @transform_5, window_bounds = array<i64: 1, 2, 256>}]} {
    %c0 = arith.constant 0 : index
    %c0_0 = arith.constant 0 : index
    %c0_1 = arith.constant 0 : index
    %0 = vector.load %arg2[%c0, %c0_0, %c0_1] : memref<1x4x256xf32, #tpu.memory_space<vmem>>, vector<1x4x256xf32>
    %1 = vector.shape_cast %0 : vector<1x4x256xf32> to vector<4x256xf32>
    %2 = arith.truncf %1 : vector<4x256xf32> to vector<4x256xbf16>
    %c0_2 = arith.constant 0 : index
    %c0_3 = arith.constant 0 : index
    %3 = vector.load %arg3[%c0_2, %c0_3] : memref<6x4xbf16, #tpu.memory_space<vmem>>, vector<6x4xbf16>
    %cst = arith.constant dense<0.000000e+00> : vector<6x256xf32>
    %4 = tpu.matmul %3, %2, %cst {dimension_numbers = #tpu.dot_dimension_numbers<[1], [0], [0], [1], [0, 0, 1, 1], [], []>} : vector<6x4xbf16>, vector<4x256xbf16>, vector<6x256xf32> -> vector<6x256xf32>
    %c0_4 = arith.constant 0 : index
    %c0_5 = arith.constant 0 : index
    %5 = vector.load %arg4[%c0_4, %c0_5] : memref<6x1xf32, #tpu.memory_space<vmem>>, vector<6x1xf32>
    %6 = vector.broadcast %5 : vector<6x1xf32> to vector<6x256xf32>
    %7 = arith.addf %4, %6 : vector<6x256xf32>
    %8 = vector.extract_strided_slice %7 {offsets = [0, 0], sizes = [2, 256], strides = [1, 1]} : vector<6x256xf32> to vector<2x256xf32>
    %9 = vector.extract_strided_slice %7 {offsets = [2, 0], sizes = [2, 256], strides = [1, 1]} : vector<6x256xf32> to vector<2x256xf32>
    %10 = vector.extract_strided_slice %7 {offsets = [4, 0], sizes = [2, 256], strides = [1, 1]} : vector<6x256xf32> to vector<2x256xf32>
    %cst_6 = arith.constant dense<0.000000e+00> : vector<256xf32>
    %11 = vector.multi_reduction <add>, %8, %cst_6 [0] : vector<2x256xf32> to vector<256xf32>
    %12 = vector.shape_cast %11 : vector<256xf32> to vector<1x256xf32>
    %cst_7 = arith.constant 2.000000e+00 : f32
    %13 = vector.broadcast %cst_7 : f32 to vector<1x256xf32>
    %14 = arith.divf %12, %13 : vector<1x256xf32>
    %cst_8 = arith.constant dense<0.000000e+00> : vector<256xf32>
    %15 = vector.multi_reduction <add>, %9, %cst_8 [0] : vector<2x256xf32> to vector<256xf32>
    %16 = vector.shape_cast %15 : vector<256xf32> to vector<1x256xf32>
    %cst_9 = arith.constant 2.000000e+00 : f32
    %17 = vector.broadcast %cst_9 : f32 to vector<1x256xf32>
    %18 = arith.divf %16, %17 : vector<1x256xf32>
    %19 = vector.shape_cast %14 : vector<1x256xf32> to vector<1x1x256xf32>
    %c0_10 = arith.constant 0 : index
    %c0_11 = arith.constant 0 : index
    %c0_12 = arith.constant 0 : index
    %20 = vector.load %arg5[%c0_10, %c0_11, %c0_12] : memref<1x1x256xf32, #tpu.memory_space<vmem>>, vector<1x1x256xf32>
    tpu.vector_store %arg5[%c0_10, %c0_11, %c0_12], %19 {strides = array<i32>} : memref<1x1x256xf32, #tpu.memory_space<vmem>>, vector<1x1x256xf32>,
    %21 = vector.shape_cast %18 : vector<1x256xf32> to vector<1x1x256xf32>
    %c0_13 = arith.constant 0 : index
    %c0_14 = arith.constant 0 : index
    %c0_15 = arith.constant 0 : index
    %22 = vector.load %arg6[%c0_13, %c0_14, %c0_15] : memref<1x1x256xf32, #tpu.memory_space<vmem>>, vector<1x1x256xf32>
    tpu.vector_store %arg6[%c0_13, %c0_14, %c0_15], %21 {strides = array<i32>} : memref<1x1x256xf32, #tpu.memory_space<vmem>>, vector<1x1x256xf32>,
    %23 = arith.truncf %10 : vector<2x256xf32> to vector<2x256xbf16>
    %24 = vector.shape_cast %23 : vector<2x256xbf16> to vector<1x2x256xbf16>
    %c0_16 = arith.constant 0 : index
    %c0_17 = arith.constant 0 : index
    %c0_18 = arith.constant 0 : index
    %25 = vector.load %arg7[%c0_16, %c0_17, %c0_18] : memref<1x2x256xbf16, #tpu.memory_space<vmem>>, vector<1x2x256xbf16>
    tpu.vector_store %arg7[%c0_16, %c0_17, %c0_18], %24 {strides = array<i32>} : memref<1x2x256xbf16, #tpu.memory_space<vmem>>, vector<1x2x256xbf16>,
    return
  }
  func.func @transform_0(%arg0: i32, %arg1: i32) -> (i32, i32, i32) {
    %c0_i32 = arith.constant 0 : i32
    %c0_i32_0 = arith.constant 0 : i32
    return %arg0, %c0_i32, %arg1 : i32, i32, i32
  }
  func.func @transform_1(%arg0: i32, %arg1: i32) -> (i32, i32) {
    %c0_i32 = arith.constant 0 : i32
    %c0_i32_0 = arith.constant 0 : i32
    %c0_i32_1 = arith.constant 0 : i32
    return %c0_i32, %c0_i32_0 : i32, i32
  }
  func.func @transform_2(%arg0: i32, %arg1: i32) -> (i32, i32) {
    %c0_i32 = arith.constant 0 : i32
    %c0_i32_0 = arith.constant 0 : i32
    %c0_i32_1 = arith.constant 0 : i32
    return %c0_i32, %c0_i32_0 : i32, i32
  }
  func.func @transform_3(%arg0: i32, %arg1: i32) -> (i32, i32, i32) {
    %c0_i32 = arith.constant 0 : i32
    %c0_i32_0 = arith.constant 0 : i32
    return %arg0, %c0_i32, %arg1 : i32, i32, i32
  }
  func.func @transform_4(%arg0: i32, %arg1: i32) -> (i32, i32, i32) {
    %c0_i32 = arith.constant 0 : i32
    %c0_i32_0 = arith.constant 0 : i32
    return %arg0, %c0_i32, %arg1 : i32, i32, i32
  }
  func.func @transform_5(%arg0: i32, %arg1: i32) -> (i32, i32, i32) {
    %c0_i32 = arith.constant 0 : i32
    %c0_i32_0 = arith.constant 0 : i32
    return %arg0, %c0_i32, %arg1 : i32, i32, i32
  }
}

module attributes {stable_mosaic.version = 11 : i64} {
  func.func @_cross_attn_kernel(%arg0: i32, %arg1: i32, %arg2: i32, %arg3: memref<1x256x1xf32, #tpu.memory_space<vmem>>, %arg4: memref<1x1x256xf32, #tpu.memory_space<vmem>>, %arg5: memref<1x2x256xbf16, #tpu.memory_space<vmem>>, %arg6: memref<4x2xbf16, #tpu.memory_space<vmem>>, %arg7: memref<4x1xf32, #tpu.memory_space<vmem>>, %arg8: memref<1x4x256xf32, #tpu.memory_space<vmem>>, %arg9: memref<1x4x256xf32, #tpu.memory_space<vmem>>, %arg10: memref<2x256xf32, #tpu.memory_space<vmem>>) attributes {dimension_semantics = [#tpu.dimension_semantics<parallel>, #tpu.dimension_semantics<parallel>, #tpu.dimension_semantics<arbitrary>], iteration_bounds = array<i64: 2, 1, 1>, scalar_prefetch = 0 : i64, scratch_operands = 1 : i64, tpu.core_type = #tpu.core_type<tc>, window_params = [{transform_indices = @transform_0, window_bounds = array<i64: 1, 256, 1>}, {transform_indices = @transform_1, window_bounds = array<i64: 1, 1, 256>}, {transform_indices = @transform_2, window_bounds = array<i64: 1, 2, 256>}, {pipeline_mode = #tpu.pipeline_mode<synchronous>, transform_indices = @transform_3, window_bounds = array<i64: 4, 2>}, {pipeline_mode = #tpu.pipeline_mode<synchronous>, transform_indices = @transform_4, window_bounds = array<i64: 4, 1>}, {transform_indices = @transform_5, window_bounds = array<i64: 1, 4, 256>}, {transform_indices = @transform_6, window_bounds = array<i64: 1, 4, 256>}]} {
    %c0_i32 = arith.constant 0 : i32
    %0 = arith.cmpi eq, %arg2, %c0_i32 : i32
    %1 = arith.extui %0 : i1 to i32
    %c0_i32_0 = arith.constant 0 : i32
    %2 = arith.cmpi ne, %1, %c0_i32_0 : i32
    scf.if %2 {
      %cst_16 = arith.constant 0.000000e+00 : f32
      %31 = vector.broadcast %cst_16 : f32 to vector<2x256xf32>
      %c0_17 = arith.constant 0 : index
      %c0_18 = arith.constant 0 : index
      %32 = vector.load %arg10[%c0_17, %c0_18] : memref<2x256xf32, #tpu.memory_space<vmem>>, vector<2x256xf32>
      tpu.vector_store %arg10[%c0_17, %c0_18], %31 {strides = array<i32>} : memref<2x256xf32, #tpu.memory_space<vmem>>, vector<2x256xf32>,
    } else {
    }
    %c256_i32 = arith.constant 256 : i32
    %3 = arith.muli %arg2, %c256_i32 : i32
    %4 = tpu.assume_multiple %3, 128 : i32
    %c0 = arith.constant 0 : index
    %c0_1 = arith.constant 0 : index
    %c0_2 = arith.constant 0 : index
    %5 = vector.load %arg3[%c0, %c0_1, %c0_2] : memref<1x256x1xf32, #tpu.memory_space<vmem>>, vector<1x256x1xf32>
    %6 = vector.shape_cast %5 : vector<1x256x1xf32> to vector<256x1xf32>
    %c0_3 = arith.constant 0 : index
    %c0_4 = arith.constant 0 : index
    %7 = arith.index_cast %4 : i32 to index
    %8 = vector.load %arg4[%c0_3, %c0_4, %7] : memref<1x1x256xf32, #tpu.memory_space<vmem>>, vector<1x1x256xf32>
    %9 = vector.shape_cast %8 : vector<1x1x256xf32> to vector<1x256xf32>
    %10 = vector.broadcast %6 : vector<256x1xf32> to vector<256x256xf32>
    %11 = vector.broadcast %9 : vector<1x256xf32> to vector<256x256xf32>
    %12 = arith.mulf %10, %11 : vector<256x256xf32>
    %cst = arith.constant 0.000000e+00 : f32
    %13 = vector.broadcast %cst : f32 to vector<256x256xf32>
    %14 = arith.subf %13, %12 : vector<256x256xf32>
    %15 = math.exp %14 : vector<256x256xf32>
    %cst_5 = arith.constant 1.000000e+00 : f32
    %16 = vector.broadcast %cst_5 : f32 to vector<256x256xf32>
    %17 = arith.addf %16, %15 : vector<256x256xf32>
    %cst_6 = arith.constant 1.000000e+00 : f32
    %18 = vector.broadcast %cst_6 : f32 to vector<256x256xf32>
    %19 = arith.divf %18, %17 : vector<256x256xf32>
    %c0_7 = arith.constant 0 : index
    %c0_8 = arith.constant 0 : index
    %20 = arith.index_cast %4 : i32 to index
    %21 = vector.load %arg5[%c0_7, %c0_8, %20] : memref<1x2x256xbf16, #tpu.memory_space<vmem>>, vector<1x2x256xbf16>
    %22 = vector.shape_cast %21 : vector<1x2x256xbf16> to vector<2x256xbf16>
    %c0_9 = arith.constant 0 : index
    %c0_10 = arith.constant 0 : index
    %23 = vector.load %arg10[%c0_9, %c0_10] : memref<2x256xf32, #tpu.memory_space<vmem>>, vector<2x256xf32>
    %24 = arith.truncf %19 : vector<256x256xf32> to vector<256x256xbf16>
    %cst_11 = arith.constant dense<0.000000e+00> : vector<2x256xf32>
    %25 = tpu.matmul %22, %24, %cst_11 {dimension_numbers = #tpu.dot_dimension_numbers<[1], [1], [0], [0], [0, 0, 1, 0], [], []>} : vector<2x256xbf16>, vector<256x256xbf16>, vector<2x256xf32> -> vector<2x256xf32>
    %26 = arith.addf %23, %25 : vector<2x256xf32>
    %c0_12 = arith.constant 0 : index
    %c0_13 = arith.constant 0 : index
    %27 = vector.load %arg10[%c0_12, %c0_13] : memref<2x256xf32, #tpu.memory_space<vmem>>, vector<2x256xf32>
    tpu.vector_store %arg10[%c0_12, %c0_13], %26 {strides = array<i32>} : memref<2x256xf32, #tpu.memory_space<vmem>>, vector<2x256xf32>,
    %c0_i32_14 = arith.constant 0 : i32
    %28 = arith.cmpi eq, %arg2, %c0_i32_14 : i32
    %29 = arith.extui %28 : i1 to i32
    %c0_i32_15 = arith.constant 0 : i32
    %30 = arith.cmpi ne, %29, %c0_i32_15 : i32
    scf.if %30 {
      %c0_16 = arith.constant 0 : index
      %c0_17 = arith.constant 0 : index
      %31 = vector.load %arg6[%c0_16, %c0_17] : memref<4x2xbf16, #tpu.memory_space<vmem>>, vector<4x2xbf16>
      %c0_18 = arith.constant 0 : index
      %c0_19 = arith.constant 0 : index
      %32 = vector.load %arg10[%c0_18, %c0_19] : memref<2x256xf32, #tpu.memory_space<vmem>>, vector<2x256xf32>
      %33 = arith.truncf %32 : vector<2x256xf32> to vector<2x256xbf16>
      %cst_20 = arith.constant dense<0.000000e+00> : vector<4x256xf32>
      %34 = tpu.matmul %31, %33, %cst_20 {dimension_numbers = #tpu.dot_dimension_numbers<[1], [0], [0], [1], [0, 0, 1, 1], [], []>} : vector<4x2xbf16>, vector<2x256xbf16>, vector<4x256xf32> -> vector<4x256xf32>
      %c0_21 = arith.constant 0 : index
      %c0_22 = arith.constant 0 : index
      %c0_23 = arith.constant 0 : index
      %35 = vector.load %arg8[%c0_21, %c0_22, %c0_23] : memref<1x4x256xf32, #tpu.memory_space<vmem>>, vector<1x4x256xf32>
      %c0_24 = arith.constant 0 : index
      %c0_25 = arith.constant 0 : index
      %36 = vector.load %arg7[%c0_24, %c0_25] : memref<4x1xf32, #tpu.memory_space<vmem>>, vector<4x1xf32>
      %37 = vector.broadcast %36 : vector<4x1xf32> to vector<4x256xf32>
      %38 = arith.addf %34, %37 : vector<4x256xf32>
      %39 = vector.shape_cast %38 : vector<4x256xf32> to vector<1x4x256xf32>
      %40 = arith.addf %35, %39 : vector<1x4x256xf32>
      %c0_26 = arith.constant 0 : index
      %c0_27 = arith.constant 0 : index
      %c0_28 = arith.constant 0 : index
      %41 = vector.load %arg9[%c0_26, %c0_27, %c0_28] : memref<1x4x256xf32, #tpu.memory_space<vmem>>, vector<1x4x256xf32>
      tpu.vector_store %arg9[%c0_26, %c0_27, %c0_28], %40 {strides = array<i32>} : memref<1x4x256xf32, #tpu.memory_space<vmem>>, vector<1x4x256xf32>,
    } else {
    }
    return
  }
  func.func @transform_0(%arg0: i32, %arg1: i32, %arg2: i32) -> (i32, i32, i32) {
    %c0_i32 = arith.constant 0 : i32
    %c0_i32_0 = arith.constant 0 : i32
    return %arg0, %arg1, %c0_i32 : i32, i32, i32
  }
  func.func @transform_1(%arg0: i32, %arg1: i32, %arg2: i32) -> (i32, i32, i32) {
    %c0_i32 = arith.constant 0 : i32
    %c0_i32_0 = arith.constant 0 : i32
    %c0_i32_1 = arith.constant 0 : i32
    return %arg0, %c0_i32, %c0_i32_0 : i32, i32, i32
  }
  func.func @transform_2(%arg0: i32, %arg1: i32, %arg2: i32) -> (i32, i32, i32) {
    %c0_i32 = arith.constant 0 : i32
    %c0_i32_0 = arith.constant 0 : i32
    %c0_i32_1 = arith.constant 0 : i32
    return %arg0, %c0_i32, %c0_i32_0 : i32, i32, i32
  }
  func.func @transform_3(%arg0: i32, %arg1: i32, %arg2: i32) -> (i32, i32) {
    %c0_i32 = arith.constant 0 : i32
    %c0_i32_0 = arith.constant 0 : i32
    %c0_i32_1 = arith.constant 0 : i32
    return %c0_i32, %c0_i32_0 : i32, i32
  }
  func.func @transform_4(%arg0: i32, %arg1: i32, %arg2: i32) -> (i32, i32) {
    %c0_i32 = arith.constant 0 : i32
    %c0_i32_0 = arith.constant 0 : i32
    %c0_i32_1 = arith.constant 0 : i32
    return %c0_i32, %c0_i32_0 : i32, i32
  }
  func.func @transform_5(%arg0: i32, %arg1: i32, %arg2: i32) -> (i32, i32, i32) {
    %c0_i32 = arith.constant 0 : i32
    %c0_i32_0 = arith.constant 0 : i32
    return %arg0, %c0_i32, %arg1 : i32, i32, i32
  }
  func.func @transform_6(%arg0: i32, %arg1: i32, %arg2: i32) -> (i32, i32, i32) {
    %c0_i32 = arith.constant 0 : i32
    %c0_i32_0 = arith.constant 0 : i32
    return %arg0, %c0_i32, %arg1 : i32, i32, i32
  }
}

</mosaic_0001>

<bundles_post_ra>
// kernel: cross_module_forward.4
= control target key start
LH: loop header
LB: loop body
LE: loop exit
PB: predicated region body
PF: predicated region fallthrough
CT: control target
= control target key end

     0   :  { %s679_s18 = smov 0   ;;  %s681_s19 = smov 0   ;;  %s732_s0 = inlined_call_operand.vmem [shape: f32[2,4,256], index: 0, kind: input, shape index: {}]   ;;  %s733_s1 = inlined_call_operand.vmem [shape: bf16[6,4], index: 1, kind: input, shape index: {}]   ;;  %s734_s2 = inlined_call_operand.vmem [shape: f32[6,1], index: 2, kind: input, shape index: {}]   ;;  %s735_s3 = inlined_call_operand.vmem [shape: f32[2,1,256], index: 3, kind: output, shape index: {0}]   ;;  %s736_s4 = inlined_call_operand.vmem [shape: f32[2,1,256], index: 4, kind: output, shape index: {1}]   ;;  %s737_s5 = inlined_call_operand.vmem [shape: bf16[2,2,256], index: 5, kind: output, shape index: {2}]  }
   0x1   :  { %s683_s20 = smov 0  }
   0x2 LB: > { %s28_s21 = sadd.s32 1, %s642_s19  ;;  %p587_p0 = scmp.ge.s32.totalorder %s646_s20, 1  ;;  %s646_s20 = sphi %s683_s20, %s16_s20   ;;  %s642_s19 = sphi %s681_s19, %s739_s19   ;;  %s638_s18 = sphi %s679_s18, %s738_s18  }
   0x3   : > { %p30_p1 = scmp.ge.s32.totalorder %s28_s21, 2  ;;  %p217_p2 = scmp.lt.s32.totalorder %s646_s20, 3 }
   0x5   : > { %s741_s21 = smov (%p30_p1, %s28_s21), 0  ;;  %p218_p3 = pnand %p587_p0, %p217_p2 }
   0x6   : > { %p269_p4 = scmp.lt.s32.totalorder (!%p218_p3), %s638_s18, 1 }
   0x7   : > { %221 = sbr.rel (%p218_p3) target bundleno = 177 (0xb1), region = 32 }
   0xc   : > { %v648_v0 = vmov 0   ;;  %v316_v1 = vld [vmem:[%s734_s2] sm:$0x3f]  ;;  %s743_s18 = smov (!%p269_p4, %s638_s18), 1  ;;  %vm326_vm0 = vcmask 1041408   ;;  %vm322_vm1 = vcmask 31744   ;;  %v396_v38 = vlaneseq }
   0xd   : > { %623 = vset.pattern.permute.xlu0 %v648_v0  ;;  %s597_s24 = sshll.u32 %s743_s18, 3  ;;  %v315_v9 = vld [vmem:[%s733_s1] sm:$0x7]  ;;  %vm373_vm2 = vcmask 1043458   ;;  %s590_s30 = sshll.u32 %s743_s18, 1  ;;  %vm393_vm3 = vcmask 1040384  }
   0xe   : > { %319 = vperm.xlu0 %623, %v316_v1   ;;  %s276_s27 = scalar_lea.vmem %s732_s0, %s597_s24  ;;  %s303_s8 = scalar_lea.vmem %s737_s5, %s590_s30  ;;  %vm398_vm4 = vcmp.lt.s32.totalorder %v396_v38, 256 }
   0xf   : > { %v306_v2 = vld [vmem:[%s276_s27] sm:$0xff]  ;;  %s294_s11 = scalar_lea.vmem %s736_s4, %s590_s30  ;;  %s285_s14 = scalar_lea.vmem %s735_s3, %s590_s30 }
  0x10   : > { %308 = vst [vmem:[#allocation1] ss:$2 sm:$0xff] %v306_v2 }
  0x17   : > { %v309_v3 = vld.sshfl [vmem:[#allocation1] sm:$0xff pattern:$0x75316420]  ;;  %v310_v4 = vld.sshfl [vmem:[#allocation1 + $0x8] sm:$0xff pattern:$0x75316420] }
  0x18   : > { %v313_v5 = vpack.c.bf16 %v309_v3, %v309_v3  ;;  %v314_v6 = vpack.c.bf16 %v310_v4, %v310_v4 }
  0x1a   : > { %v328_v7 = vsel %vm326_vm0, %v313_v5, 0  ;;  %v331_v8 = vsel %vm326_vm0, %v314_v6, 0 }
  0x1b   : > { %340 = vmatpush.bf16.msra.mxu0 %v328_v7  ;;  %353 = vmatpush.bf16.msra.mxu1 %v331_v8 }
  0x1e   : > { %593 = vmatmul.msk.bf16.vlgmr.msra.gmra.mxu0 %vm322_vm1, %v315_v9  ;;  %594 = vmatmul.msk.bf16.vlgmr.msra.gmra.mxu1 %vm322_vm1, %v315_v9 }
  0x80   : > { %v320_v10 = vpop.permute.xlu0 %319 }
  0x9b   : > { %v342_v11 = vpop.f32.mrf.mxu0  ;;  %v355_v12 = vpop.f32.mrf.mxu1 }
  0x9c   : > { %v343_v13 = vadd.f32 %v342_v11, %v320_v10  ;;  %v356_v14 = vadd.f32 %v355_v12, %v320_v10 }
  0x9e   : > { %v359_v15 = vsel %vm326_vm0, %v343_v13, -inf  ;;  %v374_v16 = vsel %vm373_vm2, %v343_v13, -inf  ;;  %v366_v17 = vsel %vm326_vm0, %v356_v14, -inf  ;;  %v381_v18 = vsel %vm373_vm2, %v356_v14, -inf }
  0x9f   : > { %v360_v19 = vrot.slane %v359_v15, 4  ;;  %v375_v20 = vrot.slane %v374_v16, 4  ;;  %v367_v21 = vrot.slane %v366_v17, 4  ;;  %v382_v22 = vrot.slane %v381_v18, 4 }
  0xa0   : > { %v407_v23 = vpack.c.bf16 %v356_v14, %v343_v13 }
  0xa1   : > { %v361_v24 = vmax.f32 %v359_v15, %v360_v19  ;;  %v376_v25 = vmax.f32 %v374_v16, %v375_v20  ;;  %v368_v26 = vmax.f32 %v366_v17, %v367_v21  ;;  %v383_v27 = vmax.f32 %v381_v18, %v382_v22 }
  0xa2   : > { %409 = vst [vmem:[#allocation1] sm:$0xff] %v407_v23 }
  0xa3   : > { %v362_v28 = vrot.slane %v361_v24, 2  ;;  %v377_v29 = vrot.slane %v376_v25, 2  ;;  %v369_v30 = vrot.slane %v368_v26, 2  ;;  %v384_v31 = vrot.slane %v383_v27, 2  ;;  %v344_v32 = vpop.f32.mrf.mxu0  ;;  %v357_v33 = vpop.f32.mrf.mxu1 }
  0xa5   : > { %v363_v34 = vmax.f32 %v361_v24, %v362_v28  ;;  %v378_v35 = vmax.f32 %v376_v25, %v377_v29  ;;  %v370_v36 = vmax.f32 %v368_v26, %v369_v30  ;;  %v385_v37 = vmax.f32 %v383_v27, %v384_v31 }
  0xa7   : > { %v364_v39 = vrot.slane %v363_v34, 1  ;;  %v379_v40 = vrot.slane %v378_v35, 1  ;;  %v371_v41 = vrot.slane %v370_v36, 1  ;;  %v386_v42 = vrot.slane %v385_v37, 1 }
  0xa9   : > { %v365_v43 = vmax.f32 %v363_v34, %v364_v39  ;;  %v372_v44 = vmax.f32 %v370_v36, %v371_v41  ;;  %v387_v45 = vmax.f32 %v385_v37, %v386_v42  ;;  %v411_v46 = vld [vmem:[#allocation1 + $0x2] ss:$4 sm:$0xff]  ;;  %v380_v47 = vmax.f32 %v378_v35, %v379_v40 }
  0xaa   : > { %413 = vst [vmem:[%s303_s8] sm:$0x3] %v411_v46 }
  0xab   : > { %v389_v48 = vsub.f32 0.0, %v372_v44  ;;  %v403_v49 = vrot.slane %v387_v45, 7  ;;  %v388_v50 = vsub.f32 0.0, %v365_v43 }
  0xad   : > { %v392_v51 = vrot.slane %v389_v48, 7  ;;  %v404_v52 = vsel %vm393_vm3, %v380_v47, %v403_v49 }
  0xae   : > { %406 = vst.msk [vmem:[%s294_s11] sm:$0x3] %vm398_vm4, %v404_v52 }
  0xaf   : > { %v394_v53 = vsel %vm393_vm3, %v388_v50, %v392_v51 }
  0xb0   : > { %400 = vst.msk [vmem:[%s285_s14] sm:$0x3] %vm398_vm4, %v394_v53 }
  0xb1 PF: > { %s16_s20 = sadd.s32 1, %s646_s20   ;;  %s738_s18 = smov %s642_s19 }
  0xb2   : > { %p13_p5 = scmp.ge.s32.totalorder %s16_s20, 4   ;;  %s739_s19 = smov %s741_s21 }
  0xb4   :  { %15 = sbr.rel (!%p13_p5) target bundleno = 2 (0x2), region = 87 }

// kernel: cross_module_forward.5
= control target key start
LH: loop header
LB: loop body
LE: loop exit
PB: predicated region body
PF: predicated region fallthrough
CT: control target
= control target key end

     0   :  { %s697_s18 = smov 0   ;;  %s699_s19 = smov 0   ;;  %s757_s0 = inlined_call_operand.vmem [shape: f32[2,4,256], index: 0, kind: input, shape index: {}]   ;;  %s758_s1 = inlined_call_operand.vmem [shape: bf16[6,4], index: 1, kind: input, shape index: {}]   ;;  %s759_s2 = inlined_call_operand.vmem [shape: f32[6,1], index: 2, kind: input, shape index: {}]   ;;  %s760_s3 = inlined_call_operand.vmem [shape: f32[2,1,256], index: 3, kind: output, shape index: {0}]   ;;  %s761_s4 = inlined_call_operand.vmem [shape: f32[2,1,256], index: 4, kind: output, shape index: {1}]   ;;  %s762_s5 = inlined_call_operand.vmem [shape: bf16[2,2,256], index: 5, kind: output, shape index: {2}]  }
   0x1   :  { %s701_s20 = smov 0  }
   0x2 LB: > { %s28_s21 = sadd.s32 1, %s659_s19  ;;  %p601_p0 = scmp.ge.s32.totalorder %s663_s20, 1  ;;  %s663_s20 = sphi %s701_s20, %s16_s20   ;;  %s659_s19 = sphi %s699_s19, %s764_s19   ;;  %s655_s18 = sphi %s697_s18, %s763_s18  }
   0x3   : > { %p30_p1 = scmp.ge.s32.totalorder %s28_s21, 2  ;;  %p217_p2 = scmp.lt.s32.totalorder %s663_s20, 3 }
   0x5   : > { %s766_s21 = smov (%p30_p1, %s28_s21), 0  ;;  %p218_p3 = pnand %p601_p0, %p217_p2 }
   0x6   : > { %p269_p4 = scmp.lt.s32.totalorder (!%p218_p3), %s655_s18, 1 }
   0x7   : > { %221 = sbr.rel (%p218_p3) target bundleno = 179 (0xb3), region = 32 }
   0xc   : > { %v665_v0 = vmov 0   ;;  %v316_v1 = vld [vmem:[%s759_s2] sm:$0x3f]  ;;  %s768_s18 = smov (!%p269_p4, %s655_s18), 1  ;;  %vm326_vm0 = vcmask 1041408   ;;  %vm322_vm1 = vcmask 31744   ;;  %v410_v49 = vlaneseq }
   0xd   : > { %638 = vset.pattern.permute.xlu0 %v665_v0  ;;  %s611_s24 = sshll.u32 %s768_s18, 3  ;;  %v315_v9 = vld [vmem:[%s758_s1] sm:$0x7]  ;;  %v666_v10 = vmov 2.0   ;;  %s734_s30 = sshll.u32 %s768_s18, 1  ;;  %vm407_vm3 = vcmask 1040384  }
   0xe   : > { %319 = vperm.xlu0 %638, %v316_v1   ;;  %s276_s27 = scalar_lea.vmem %s757_s0, %s611_s24  ;;  %639 = vrcp.f32 %v666_v10  ;;  %s303_s8 = scalar_lea.vmem %s762_s5, %s734_s30  ;;  %vm412_vm4 = vcmp.lt.s32.totalorder %v410_v49, 256 }
   0xf   : > { %v306_v2 = vld [vmem:[%s276_s27] sm:$0xff]  ;;  %s285_s11 = scalar_lea.vmem %s760_s3, %s734_s30  ;;  %s294_s14 = scalar_lea.vmem %s761_s4, %s734_s30 }
  0x10   : > { %308 = vst [vmem:[#allocation1] ss:$2 sm:$0xff] %v306_v2 }
  0x14   : > { %v640_v11 = vpop.eup %639 }
  0x15   : > { %v374_v12 = vmul.f32 2.0, %v640_v11  ;;  %vm378_vm2 = vweird.f32 %v640_v11 }
  0x17   : > { %v309_v3 = vld.sshfl [vmem:[#allocation1] sm:$0xff pattern:$0x75316420]  ;;  %v310_v4 = vld.sshfl [vmem:[#allocation1 + $0x8] sm:$0xff pattern:$0x75316420] }
  0x18   : > { %v313_v5 = vpack.c.bf16 %v309_v3, %v309_v3  ;;  %v314_v6 = vpack.c.bf16 %v310_v4, %v310_v4  ;;  %v375_v17 = vsub.f32 1.0, %v374_v12 }
  0x1a   : > { %v328_v7 = vsel %vm326_vm0, %v313_v5, 0  ;;  %v331_v8 = vsel %vm326_vm0, %v314_v6, 0  ;;  %v376_v26 = vmul.f32 %v640_v11, %v375_v17 }
  0x1b   : > { %340 = vmatpush.bf16.msra.mxu0 %v328_v7  ;;  %353 = vmatpush.bf16.msra.mxu1 %v331_v8 }
  0x1c   : > { %v377_v39 = vadd.f32 %v640_v11, %v376_v26 }
  0x1e   : > { %607 = vmatmul.msk.bf16.vlgmr.msra.gmra.mxu0 %vm322_vm1, %v315_v9  ;;  %608 = vmatmul.msk.bf16.vlgmr.msra.gmra.mxu1 %vm322_vm1, %v315_v9  ;;  %v379_v48 = vsel %vm378_vm2, %v640_v11, %v377_v39 }
  0x80   : > { %v320_v13 = vpop.permute.xlu0 %319 }
  0x9b   : > { %v342_v14 = vpop.f32.mrf.mxu0  ;;  %v355_v15 = vpop.f32.mrf.mxu1 }
  0x9c   : > { %v343_v16 = vadd.f32 %v342_v14, %v320_v13  ;;  %v356_v18 = vadd.f32 %v355_v15, %v320_v13 }
  0x9e   : > { %v359_v19 = vsel %vm326_vm0, %v343_v16, 0.0  ;;  %v384_v20 = vrot.slane %v343_v16, 2  ;;  %v366_v21 = vsel %vm326_vm0, %v356_v18, 0.0  ;;  %v385_v22 = vrot.slane %v356_v18, 2 }
  0x9f   : > { %v360_v23 = vrot.slane %v359_v19, 4  ;;  %v367_v24 = vrot.slane %v366_v21, 4  ;;  %v421_v25 = vpack.c.bf16 %v356_v18, %v343_v16 }
  0xa0   : > { %v388_v27 = vsel %vm326_vm0, %v384_v20, 0.0  ;;  %v395_v28 = vsel %vm326_vm0, %v385_v22, 0.0 }
  0xa1   : > { %v361_v29 = vadd.f32 %v360_v23, %v359_v19  ;;  %v389_v30 = vrot.slane %v388_v27, 4  ;;  %v368_v31 = vadd.f32 %v367_v24, %v366_v21  ;;  %v396_v32 = vrot.slane %v395_v28, 4  ;;  %423 = vst [vmem:[#allocation1] sm:$0xff] %v421_v25 }
  0xa3   : > { %v362_v33 = vrot.slane %v361_v29, 2  ;;  %v390_v34 = vadd.f32 %v389_v30, %v388_v27  ;;  %v369_v35 = vrot.slane %v368_v31, 2  ;;  %v397_v36 = vadd.f32 %v396_v32, %v395_v28  ;;  %v344_v37 = vpop.f32.mrf.mxu0  ;;  %v357_v38 = vpop.f32.mrf.mxu1 }
  0xa5   : > { %v363_v40 = vadd.f32 %v362_v33, %v361_v29  ;;  %v391_v41 = vrot.slane %v390_v34, 2  ;;  %v370_v42 = vadd.f32 %v369_v35, %v368_v31  ;;  %v398_v43 = vrot.slane %v397_v36, 2 }
  0xa7   : > { %v364_v44 = vrot.slane %v363_v40, 1  ;;  %v392_v45 = vadd.f32 %v391_v41, %v390_v34  ;;  %v371_v46 = vrot.slane %v370_v42, 1  ;;  %v399_v47 = vadd.f32 %v398_v43, %v397_v36 }
  0xa8   : > { %v425_v50 = vld [vmem:[#allocation1 + $0x2] ss:$4 sm:$0xff] }
  0xa9   : > { %v365_v51 = vadd.f32 %v364_v44, %v363_v40  ;;  %v393_v52 = vrot.slane %v392_v45, 1  ;;  %v372_v53 = vadd.f32 %v371_v46, %v370_v42  ;;  %v400_v54 = vrot.slane %v399_v47, 1  ;;  %427 = vst [vmem:[%s303_s8] sm:$0x3] %v425_v50 }
  0xab   : > { %v394_v55 = vadd.f32 %v393_v52, %v392_v45  ;;  %v381_v56 = vmul.f32 %v379_v48, %v372_v53  ;;  %v401_v57 = vadd.f32 %v400_v54, %v399_v47  ;;  %v380_v58 = vmul.f32 %v379_v48, %v365_v51 }
  0xad   : > { %v403_v59 = vmul.f32 %v401_v57, %v379_v48  ;;  %v406_v60 = vrot.slane %v381_v56, 7  ;;  %v402_v61 = vmul.f32 %v394_v55, %v379_v48 }
  0xaf   : > { %v408_v62 = vsel %vm407_vm3, %v380_v58, %v406_v60  ;;  %v417_v63 = vrot.slane %v403_v59, 7 }
  0xb0   : > { %414 = vst.msk [vmem:[%s285_s11] sm:$0x3] %vm412_vm4, %v408_v62 }
  0xb1   : > { %v418_v0 = vsel %vm407_vm3, %v402_v61, %v417_v63 }
  0xb2   : > { %420 = vst.msk [vmem:[%s294_s14] sm:$0x3] %vm412_vm4, %v418_v0 }
  0xb3 PF: > { %s16_s20 = sadd.s32 1, %s663_s20   ;;  %s763_s18 = smov %s659_s19 }
  0xb4   : > { %p13_p5 = scmp.ge.s32.totalorder %s16_s20, 4   ;;  %s764_s19 = smov %s766_s21 }
  0xb6   :  { %15 = sbr.rel (!%p13_p5) target bundleno = 2 (0x2), region = 87 }

// kernel: cross_module_forward.7
= control target key start
LH: loop header
LB: loop body
LE: loop exit
PB: predicated region body
PF: predicated region fallthrough
CT: control target
= control target key end

     0   :  { %s2522_s21 = smov 0   ;;  %s2524_s22 = smov 0   ;;  %s4103_s0 = inlined_call_operand.vmem [shape: f32[2,256,1], index: 0, kind: input, shape index: {}]   ;;  %s4104_s1 = inlined_call_operand.vmem [shape: f32[2,1,256], index: 1, kind: input, shape index: {}]   ;;  %s4105_s2 = inlined_call_operand.vmem [shape: bf16[2,2,256], index: 2, kind: input, shape index: {}]   ;;  %s4106_s3 = inlined_call_operand.vmem [shape: bf16[4,2], index: 3, kind: input, shape index: {}]   ;;  %s4107_s4 = inlined_call_operand.vmem [shape: f32[4,1], index: 4, kind: input, shape index: {}]   ;;  %s4108_s5 = inlined_call_operand.vmem [shape: f32[2,4,256], index: 5, kind: input, shape index: {}]   ;;  %s4109_s6 = inlined_call_operand.vmem [shape: f32[2,4,256], index: 6, kind: output, shape index: {}]  }
   0x1   :  { %s2526_s23 = smov 0  }
   0x2 LB: > { %s35_s24 = sadd.s32 1, %s2479_s22  ;;  %p2160_p0 = scmp.ge.s32.totalorder %s2483_s23, 1  ;;  %s2483_s23 = sphi %s2526_s23, %s16_s23   ;;  %s2479_s22 = sphi %s2524_s22, %s4313_s22   ;;  %s2475_s21 = sphi %s2522_s21, %s4312_s21  }
   0x3   : > { %p37_p1 = scmp.ge.s32.totalorder %s35_s24, 2  ;;  %p275_p2 = scmp.lt.s32.totalorder %s2483_s23, 3 }
   0x5   : > { %s4315_s24 = smov (%p37_p1, %s35_s24), 0  ;;  %p276_p3 = pnand %p2160_p0, %p275_p2 }
   0x7   : > { %279 = sbr.rel (%p276_p3) target bundleno = 723 (0x2d3), region = 44 }
   0xc   : > { %p331_p4 = scmp.lt.s32.totalorder %s2475_s21, 1  ;;  %v2485_v0 = vmov 0   ;;  %v1971_v31 = vld [vmem:[%s4107_s4] sm:$0xf] }
   0xd   : > { %2204 = vset.pattern.permute.xlu2 %v2485_v0  ;;  %2203 = vset.pattern.permute.xlu1 %v2485_v0 }
   0xe   : > { %2202 = vset.pattern.permute.xlu0 %v2485_v0  ;;  %s4317_s21 = smov (!%p331_p4, %s2475_s21), 1 }
   0xf   : > { %s2173_s25 = sshll.u32 %s4317_s21, 8  ;;  %s2163_s7 = sshll.u32 %s4317_s21, 1 }
  0x10   : > { %s2546_s28 = scalar_lea.vmem %s4103_s0, %s2173_s25  ;;  %s343_s10 = scalar_lea.vmem %s4104_s1, %s2163_s7 }
  0x11   : > { %v405_v1 = vld [vmem:[%s2546_s28 + $0xf0] sm:$0xff]  ;;  %v403_v2 = vld [vmem:[%s2546_s28 + $0xe0] sm:$0xff]  ;;  %v406_v4 = vld [vmem:[%s2546_s28 + $0xf8] sm:$0xff]  ;;  %s347_s13 = scalar_lea.vmem %s4105_s2, %s2163_s7  ;;  %s2174_s16 = sshll.u32 %s4317_s21, 3 }
  0x12   : > { %563 = vperm.xlu0 %2202, %v405_v1   ;;  %553 = vperm.xlu2 %2204, %v403_v2   ;;  %v389_v3 = vld [vmem:[%s2546_s28 + $0x70] sm:$0xff]  ;;  %v404_v5 = vld [vmem:[%s2546_s28 + $0xe8] sm:$0xff]  ;;  %v390_v6 = vld [vmem:[%s2546_s28 + $0x78] sm:$0xff]  ;;  %s356_s19 = scalar_lea.vmem %s4108_s5, %s2174_s16  ;;  %s366_s26 = scalar_lea.vmem %s4109_s6, %s2174_s16 }
  0x13   : > { %483 = vperm.xlu1 %2203, %v389_v3   ;;  %v401_v7 = vld [vmem:[%s2546_s28 + $0xd0] sm:$0xff]  ;;  %v387_v8 = vld [vmem:[%s2546_s28 + $0x60] sm:$0xff]  ;;  %v388_v9 = vld [vmem:[%s2546_s28 + $0x68] sm:$0xff] }
  0x14   : > { %v402_v10 = vld [vmem:[%s2546_s28 + $0xd8] sm:$0xff]  ;;  %v385_v12 = vld [vmem:[%s2546_s28 + $0x50] sm:$0xff]  ;;  %v399_v13 = vld [vmem:[%s2546_s28 + $0xc0] sm:$0xff] }
  0x15   : > { %v386_v11 = vld [vmem:[%s2546_s28 + $0x58] sm:$0xff]  ;;  %v383_v14 = vld [vmem:[%s2546_s28 + $0x40] sm:$0xff]  ;;  %v400_v15 = vld [vmem:[%s2546_s28 + $0xc8] sm:$0xff] }
  0x16   : > { %v384_v16 = vld [vmem:[%s2546_s28 + $0x48] sm:$0xff]  ;;  %v398_v17 = vld [vmem:[%s2546_s28 + $0xb8] sm:$0xff]  ;;  %v397_v18 = vld [vmem:[%s2546_s28 + $0xb0] sm:$0xff] }
  0x17   : > { %v395_v19 = vld [vmem:[%s2546_s28 + $0xa0] sm:$0xff]  ;;  %v381_v20 = vld [vmem:[%s2546_s28 + $0x30] sm:$0xff]  ;;  %v382_v21 = vld [vmem:[%s2546_s28 + $0x38] sm:$0xff] }
  0x18   : > { %v396_v22 = vld [vmem:[%s2546_s28 + $0xa8] sm:$0xff]  ;;  %v379_v24 = vld [vmem:[%s2546_s28 + $0x20] sm:$0xff]  ;;  %v393_v25 = vld [vmem:[%s2546_s28 + $0x90] sm:$0xff] }
  0x19   : > { %v380_v23 = vld [vmem:[%s2546_s28 + $0x28] sm:$0xff]  ;;  %v377_v26 = vld [vmem:[%s2546_s28 + $0x10] sm:$0xff]  ;;  %v394_v27 = vld [vmem:[%s2546_s28 + $0x98] sm:$0xff] }
  0x1a   : > { %568 = vperm.xlu0 %2202, %v406_v4   ;;  %558 = vperm.xlu2 %2204, %v404_v5   ;;  %v378_v28 = vld [vmem:[%s2546_s28 + $0x18] sm:$0xff]  ;;  %v392_v29 = vld [vmem:[%s2546_s28 + $0x88] sm:$0xff]  ;;  %v391_v30 = vld [vmem:[%s2546_s28 + $0x80] sm:$0xff] }
  0x1b   : > { %488 = vperm.xlu1 %2203, %v390_v6   ;;  %v375_v32 = vld [vmem:[%s2546_s28] sm:$0xff]  ;;  %v376_v33 = vld [vmem:[%s2546_s28 + $0x8] sm:$0xff] }
  0x1c   : > { %v410_v34 = vld [vmem:[%s343_s10] sm:$0x3] }
  0x1d   : > { %v2589_v35 = vperm.slane %v410_v34, 0  ;;  %v2591_v36 = vperm.slane %v410_v34, 1 }
  0x22   : > { %543 = vperm.xlu2 %2204, %v401_v7   ;;  %473 = vperm.xlu0 %2202, %v387_v8  }
  0x23   : > { %478 = vperm.xlu1 %2203, %v388_v9  }
  0x2a   : > { %548 = vperm.xlu0 %2202, %v402_v10   ;;  %468 = vperm.xlu2 %2204, %v386_v11  }
  0x2b   : > { %463 = vperm.xlu1 %2203, %v385_v12  }
  0x32   : > { %533 = vperm.xlu0 %2202, %v399_v13   ;;  %453 = vperm.xlu2 %2204, %v383_v14  }
  0x33   : > { %538 = vperm.xlu1 %2203, %v400_v15  }
  0x3a   : > { %458 = vperm.xlu0 %2202, %v384_v16   ;;  %528 = vperm.xlu2 %2204, %v398_v17  }
  0x3b   : > { %523 = vperm.xlu1 %2203, %v397_v18  }
  0x42   : > { %513 = vperm.xlu2 %2204, %v395_v19   ;;  %443 = vperm.xlu0 %2202, %v381_v20  }
  0x43   : > { %448 = vperm.xlu1 %2203, %v382_v21  }
  0x4a   : > { %518 = vperm.xlu0 %2202, %v396_v22   ;;  %438 = vperm.xlu2 %2204, %v380_v23  }
  0x4b   : > { %433 = vperm.xlu1 %2203, %v379_v24  }
  0x52   : > { %503 = vperm.xlu0 %2202, %v393_v25   ;;  %423 = vperm.xlu2 %2204, %v377_v26  }
  0x53   : > { %508 = vperm.xlu1 %2203, %v394_v27  }
  0x5a   : > { %428 = vperm.xlu0 %2202, %v378_v28   ;;  %498 = vperm.xlu2 %2204, %v392_v29  }
  0x5b   : > { %493 = vperm.xlu1 %2203, %v391_v30  }
  0x62   : > { %1974 = vperm.xlu2 %2204, %v1971_v31   ;;  %413 = vperm.xlu0 %2202, %v375_v32  }
  0x63   : > { %418 = vperm.xlu1 %2203, %v376_v33  }
  0x6c   : > { %v554_v37 = vpop.permute.xlu2 %553 }
  0x6d   : > { %v632_v38 = vmul.f32 %v2589_v35, %v554_v37  ;;  %v633_v39 = vmul.f32 %v2591_v36, %v554_v37 }
  0x6f   : > { %v696_v40 = vsub.f32 0.0, %v632_v38  ;;  %v697_v41 = vsub.f32 0.0, %v633_v39 }
  0x71   : > { %v816_v43 = vmul.f32 1.442695, %v696_v40  ;;  %v818_v46 = vmul.f32 1.442695, %v697_v41 }
  0x73   : > { %2205 = vpow2.f32 %v816_v43 }
  0x74   : > { %v559_v42 = vpop.permute.xlu2 %558  ;;  %2207 = vpow2.f32 %v818_v46 }
  0x75   : > { %v634_v44 = vmul.f32 %v2589_v35, %v559_v42  ;;  %v635_v45 = vmul.f32 %v2591_v36, %v559_v42 }
  0x77   : > { %v698_v47 = vsub.f32 0.0, %v634_v44  ;;  %v699_v48 = vsub.f32 0.0, %v635_v45 }
  0x79   : > { %v820_v49 = vmul.f32 1.442695, %v698_v47  ;;  %v822_v50 = vmul.f32 1.442695, %v699_v48  ;;  %v2206_v54 = vpop.eup %2205 }
  0x7a   : > { %v2208_v57 = vpop.eup %2207  ;;  %v2599_v61 = vadd.f32 1.0, %v2206_v54 }
  0x7b   : > { %2209 = vpow2.f32 %v820_v49  ;;  %v2601_v63 = vadd.f32 1.0, %v2208_v57 }
  0x7c   : > { %v544_v51 = vpop.permute.xlu2 %543  ;;  %2211 = vpow2.f32 %v822_v50 }
  0x7d   : > { %v628_v52 = vmul.f32 %v2589_v35, %v544_v51  ;;  %v629_v53 = vmul.f32 %v2591_v36, %v544_v51 }
  0x7f   : > { %v692_v55 = vsub.f32 0.0, %v628_v52  ;;  %v693_v56 = vsub.f32 0.0, %v629_v53 }
  0x81   : > { %v2210_v58 = vpop.eup %2209  ;;  %v808_v59 = vmul.f32 1.442695, %v692_v55  ;;  %v810_v60 = vmul.f32 1.442695, %v693_v56 }
  0x82   : > { %v2212_v62 = vpop.eup %2211  ;;  %v2603_v0 = vadd.f32 1.0, %v2210_v58 }
  0x83   : > { %2213 = vpow2.f32 %v808_v59  ;;  %v2605_v3 = vadd.f32 1.0, %v2212_v62 }
  0x84   : > { %v564_v1 = vpop.permute.xlu0 %563  ;;  %v469_v2 = vpop.permute.xlu2 %468  ;;  %2215 = vpow2.f32 %v810_v60 }
  0x85   : > { %v636_v4 = vmul.f32 %v2589_v35, %v564_v1  ;;  %v637_v5 = vmul.f32 %v2591_v36, %v564_v1  ;;  %v484_v6 = vpop.permute.xlu1 %483  ;;  %v598_v9 = vmul.f32 %v2589_v35, %v469_v2  ;;  %v599_v10 = vmul.f32 %v2591_v36, %v469_v2 }
  0x86   : > { %v604_v7 = vmul.f32 %v2589_v35, %v484_v6  ;;  %v605_v8 = vmul.f32 %v2591_v36, %v484_v6  ;;  %2217 = vrcp.f32 %v2599_v61 }
  0x87   : > { %v700_v11 = vsub.f32 0.0, %v636_v4  ;;  %v701_v12 = vsub.f32 0.0, %v637_v5  ;;  %2219 = vrcp.f32 %v2601_v63  ;;  %v662_v18 = vsub.f32 0.0, %v598_v9 }
  0x88   : > { %v668_v13 = vsub.f32 0.0, %v604_v7  ;;  %v669_v14 = vsub.f32 0.0, %v605_v8  ;;  %2221 = vrcp.f32 %v2603_v0  ;;  %v663_v20 = vsub.f32 0.0, %v599_v10 }
  0x89   : > { %v2214_v15 = vpop.eup %2213  ;;  %v824_v16 = vmul.f32 1.442695, %v700_v11  ;;  %v826_v17 = vmul.f32 1.442695, %v701_v12  ;;  %2223 = vrcp.f32 %v2605_v3  ;;  %v748_v28 = vmul.f32 1.442695, %v662_v18 }
  0x8a   : > { %v2617_v19 = vadd.f32 1.0, %v2214_v15  ;;  %v2216_v21 = vpop.eup %2215  ;;  %v760_v22 = vmul.f32 1.442695, %v668_v13  ;;  %v762_v24 = vmul.f32 1.442695, %v669_v14 }
  0x8b   : > { %2225 = vpow2.f32 %v824_v16  ;;  %v2619_v23 = vadd.f32 1.0, %v2216_v21  ;;  %v750_v33 = vmul.f32 1.442695, %v663_v20 }
  0x8c   : > { %4154 = vst [vmem:[#allocation3_spill] sm:$0xff] %v2617_v19  ;;  %2227 = vrcp.f32 %v2617_v19  ;;  %v569_v25 = vpop.permute.xlu0 %568  ;;  %v454_v26 = vpop.permute.xlu2 %453 }
  0x8d   : > { %4155 = vst [vmem:[#allocation4_spill] sm:$0xff] %v2619_v23  ;;  %v2622_v27 = vpop.eup %2217  ;;  %2229 = vpow2.f32 %v826_v17  ;;  %v638_v29 = vmul.f32 %v2589_v35, %v569_v25  ;;  %v639_v30 = vmul.f32 %v2591_v36, %v569_v25  ;;  %v489_v31 = vpop.permute.xlu1 %488  ;;  %v592_v40 = vmul.f32 %v2589_v35, %v454_v26 }
  0x8e   : > { %v2626_v32 = vpop.eup %2219  ;;  %2231 = vrcp.f32 %v2619_v23  ;;  %v606_v34 = vmul.f32 %v2589_v35, %v489_v31  ;;  %v607_v42 = vmul.f32 %v2591_v36, %v489_v31  ;;  %v593_v44 = vmul.f32 %v2591_v36, %v454_v26 }
  0x8f   : > { %v2630_v37 = vpop.eup %2221  ;;  %2233 = vpow2.f32 %v760_v22  ;;  %v702_v38 = vsub.f32 0.0, %v638_v29  ;;  %v703_v39 = vsub.f32 0.0, %v639_v30  ;;  %v656_v52 = vsub.f32 0.0, %v592_v40 }
  0x90   : > { %v2633_v41 = vpop.eup %2223  ;;  %2235 = vpow2.f32 %v762_v24  ;;  %v670_v43 = vsub.f32 0.0, %v606_v34  ;;  %v671_v55 = vsub.f32 0.0, %v607_v42  ;;  %v657_v56 = vsub.f32 0.0, %v593_v44 }
  0x91   : > { %v2226_v45 = vpop.eup %2225  ;;  %2237 = vpow2.f32 %v748_v28  ;;  %v828_v46 = vmul.f32 1.442695, %v702_v38  ;;  %v830_v47 = vmul.f32 1.442695, %v703_v39  ;;  %v736_v20 = vmul.f32 1.442695, %v656_v52 }
  0x92   : > { %v2637_v48 = vpop.eup %2227  ;;  %v2639_v49 = vadd.f32 1.0, %v2226_v45  ;;  %2239 = vpow2.f32 %v750_v33  ;;  %v764_v51 = vmul.f32 1.442695, %v670_v43  ;;  %v766_v18 = vmul.f32 1.442695, %v671_v55 }
  0x93   : > { %4156 = vst [vmem:[#allocation5_spill] sm:$0xff] %v2637_v48  ;;  %v2230_v50 = vpop.eup %2229  ;;  %2241 = vpow2.f32 %v828_v46  ;;  %v738_v24 = vmul.f32 1.442695, %v657_v56 }
  0x94   : > { %v2641_v53 = vpop.eup %2231  ;;  %v2643_v54 = vadd.f32 1.0, %v2230_v50  ;;  %2243 = vrcp.f32 %v2639_v49  ;;  %v474_v57 = vpop.permute.xlu0 %473  ;;  %vm1801_vm15 = vweird.f32 %v2639_v49 }
  0x95   : > { %4157 = vst [vmem:[#allocation6_spill] sm:$0xff] %v2641_v53  ;;  %v529_v58 = vpop.permute.xlu2 %528  ;;  %v2234_v59 = vpop.eup %2233  ;;  %2245 = vpow2.f32 %v830_v47  ;;  %v600_v62 = vmul.f32 %v2589_v35, %v474_v57  ;;  %v601_v1 = vmul.f32 %v2591_v36, %v474_v57 }
  0x96   : > { %v479_v60 = vpop.permute.xlu1 %478  ;;  %v622_v2 = vmul.f32 %v2589_v35, %v529_v58  ;;  %v2236_v4 = vpop.eup %2235  ;;  %2247 = vrcp.f32 %v2643_v54  ;;  %v2650_v5 = vadd.f32 1.0, %v2234_v59  ;;  %v623_v30 = vmul.f32 %v2591_v36, %v529_v58 }
  0x97   : > { %v602_v6 = vmul.f32 %v2589_v35, %v479_v60  ;;  %v603_v7 = vmul.f32 %v2591_v36, %v479_v60  ;;  %v2238_v8 = vpop.eup %2237  ;;  %v2654_v9 = vadd.f32 1.0, %v2236_v4  ;;  %2249 = vpow2.f32 %v764_v51 }
  0x98   : > { %v664_v10 = vsub.f32 0.0, %v600_v62  ;;  %v665_v11 = vsub.f32 0.0, %v601_v1  ;;  %v2240_v12 = vpop.eup %2239  ;;  %2251 = vrcp.f32 %v2650_v5  ;;  %v2657_v13 = vadd.f32 1.0, %v2238_v8 }
  0x99   : > { %v666_v14 = vsub.f32 0.0, %v602_v6  ;;  %v667_v15 = vsub.f32 0.0, %v603_v7  ;;  %v2242_v16 = vpop.eup %2241  ;;  %2253 = vrcp.f32 %v2654_v9  ;;  %v2660_v17 = vadd.f32 1.0, %v2240_v12 }
  0x9a   : > { %v2662_v21 = vpop.eup %2243  ;;  %2255 = vrcp.f32 %v2657_v13  ;;  %v2665_v22 = vadd.f32 1.0, %v2242_v16  ;;  %v752_v25 = vmul.f32 1.442695, %v664_v10  ;;  %v754_v29 = vmul.f32 1.442695, %v665_v11 }
  0x9b   : > { %v2246_v26 = vpop.eup %2245  ;;  %2257 = vrcp.f32 %v2660_v17  ;;  %v756_v28 = vmul.f32 1.442695, %v666_v14  ;;  %v758_v34 = vmul.f32 1.442695, %v667_v15  ;;  %v686_v38 = vsub.f32 0.0, %v622_v2 }
  0x9c   : > { %v2669_v31 = vpop.eup %2247  ;;  %v2671_v33 = vadd.f32 1.0, %v2246_v26  ;;  %2259 = vrcp.f32 %v2665_v22  ;;  %v549_v39 = vpop.permute.xlu0 %548  ;;  %v687_v43 = vsub.f32 0.0, %v623_v30  ;;  %vm1321_vm1 = vweird.f32 %v2650_v5 }
  0x9d   : > { %v514_v40 = vpop.permute.xlu2 %513  ;;  %v2250_v42 = vpop.eup %2249  ;;  %2261 = vpow2.f32 %v766_v18  ;;  %v630_v44 = vmul.f32 %v2589_v35, %v549_v39  ;;  %v631_v51 = vmul.f32 %v2591_v36, %v549_v39  ;;  %v796_v4 = vmul.f32 1.442695, %v686_v38 }
  0x9e   : > { %v464_v45 = vpop.permute.xlu1 %463  ;;  %v2676_v47 = vpop.eup %2251  ;;  %2263 = vrcp.f32 %v2671_v33  ;;  %v2679_v50 = vadd.f32 1.0, %v2250_v42  ;;  %v616_v1 = vmul.f32 %v2589_v35, %v514_v40  ;;  %v617_v7 = vmul.f32 %v2591_v36, %v514_v40 }
  0x9f   : > { %v596_v52 = vmul.f32 %v2589_v35, %v464_v45  ;;  %v2683_v55 = vpop.eup %2253  ;;  %2265 = vpow2.f32 %v736_v20  ;;  %v694_v56 = vsub.f32 0.0, %v630_v44  ;;  %v597_v57 = vmul.f32 %v2591_v36, %v464_v45 }
  0xa0   : > { %v2687_v59 = vpop.eup %2255  ;;  %2267 = vrcp.f32 %v2679_v50  ;;  %v695_v60 = vsub.f32 0.0, %v631_v51  ;;  %v798_v10 = vmul.f32 1.442695, %v687_v43  ;;  %v680_v12 = vsub.f32 0.0, %v616_v1 }
  0xa1   : > { %v660_v62 = vsub.f32 0.0, %v596_v52  ;;  %v2691_v2 = vpop.eup %2257  ;;  %2269 = vpow2.f32 %v738_v24  ;;  %v661_v6 = vsub.f32 0.0, %v597_v57  ;;  %v2696_v11 = vmul.f32 1.442695, %v694_v56 }
  0xa2   : > { %v2694_v8 = vpop.eup %2259  ;;  %2271 = vpow2.f32 %v756_v28  ;;  %v2698_v15 = vmul.f32 1.442695, %v695_v60  ;;  %v681_v26 = vsub.f32 0.0, %v617_v7  ;;  %v2710_v38 = vmul.f32 %v2676_v47, %v2650_v5 }
  0xa3   : > { %v2262_v14 = vpop.eup %2261  ;;  %2273 = vpow2.f32 %v758_v34  ;;  %v2700_v16 = vmul.f32 1.442695, %v660_v62  ;;  %v2702_v18 = vmul.f32 1.442695, %v661_v6  ;;  %v2712_v34 = vmul.f32 1.442695, %v680_v12 }
  0xa4   : > { %v2704_v20 = vpop.eup %2263  ;;  %v2706_v24 = vadd.f32 1.0, %v2262_v14  ;;  %2275 = vpow2.f32 %v752_v25  ;;  %v534_v30 = vpop.permute.xlu0 %533  ;;  %v2729_v14 = vmul.f32 1.442695, %v681_v26  ;;  %vm1322_vm0 = vweird.f32 %v2676_v47 }
  0xa5   : > { %v439_v28 = vpop.permute.xlu2 %438  ;;  %v2266_v39 = vpop.eup %2265  ;;  %2277 = vpow2.f32 %v754_v29  ;;  %v624_v40 = vmul.f32 %v2589_v35, %v534_v30  ;;  %v625_v42 = vmul.f32 %v2591_v36, %v534_v30  ;;  %v4162_v53 = vand.u32 2147483647, %v2650_v5  ;;  %vm1323_vm4 = vmor %vm1321_vm1, %vm1322_vm0 }
  0xa6   : > { %v539_v43 = vpop.permute.xlu1 %538  ;;  %v2716_v44 = vpop.eup %2267  ;;  %2279 = vrcp.f32 %v2706_v24  ;;  %v2719_v25 = vadd.f32 1.0, %v2266_v39  ;;  %v586_v57 = vmul.f32 %v2589_v35, %v439_v28  ;;  %vm1351_vm3 = vweird.f32 %v2679_v50 }
  0xa7   : > { %v626_v45 = vmul.f32 %v2589_v35, %v539_v43  ;;  %v627_v51 = vmul.f32 %v2591_v36, %v539_v43  ;;  %v2270_v52 = vpop.eup %2269  ;;  %2281 = vpow2.f32 %v796_v4  ;;  %v688_v29 = vsub.f32 0.0, %v624_v40 }
  0xa8   : > { %4158 = vst [vmem:[#allocation7_spill] sm:$0xff] %v2719_v25  ;;  %v689_v56 = vsub.f32 0.0, %v625_v42  ;;  %v2272_v60 = vpop.eup %2271  ;;  %v2724_v62 = vadd.f32 1.0, %v2270_v52  ;;  %2283 = vrcp.f32 %v2719_v25  ;;  %v650_v26 = vsub.f32 0.0, %v586_v57 }
  0xa9   : > { %v690_v1 = vsub.f32 0.0, %v626_v45  ;;  %v691_v6 = vsub.f32 0.0, %v627_v51  ;;  %v2274_v7 = vpop.eup %2273  ;;  %v2727_v12 = vadd.f32 1.0, %v2272_v60  ;;  %2285 = vpow2.f32 %v798_v10 }
  0xaa   : > { %4159 = vst [vmem:[#allocation8_spill] sm:$0xff] %v2724_v62  ;;  %v2731_v30 = vmul.f32 1.442695, %v688_v29  ;;  %v2276_v4 = vpop.eup %2275  ;;  %2287 = vrcp.f32 %v2724_v62  ;;  %v2734_v39 = vadd.f32 1.0, %v2274_v7  ;;  %v2736_v40 = vmul.f32 1.442695, %v689_v56 }
  0xab   : > { %v2738_v42 = vmul.f32 1.442695, %v690_v1  ;;  %v2278_v43 = vpop.eup %2277  ;;  %2289 = vrcp.f32 %v2727_v12  ;;  %v2741_v45 = vadd.f32 1.0, %v2276_v4  ;;  %v587_v10 = vmul.f32 %v2591_v36, %v439_v28 }
  0xac   : > { %v2745_v51 = vpop.eup %2279  ;;  %2291 = vrcp.f32 %v2734_v39  ;;  %v2748_v52 = vadd.f32 1.0, %v2278_v43  ;;  %v2750_v29 = vmul.f32 1.442695, %v691_v6  ;;  %v459_v56 = vpop.permute.xlu0 %458  ;;  %v1318_v60 = vsub.f32 1.0, %v2710_v38 }
  0xad   : > { %v2282_v1 = vpop.eup %2281  ;;  %2293 = vrcp.f32 %v2741_v45  ;;  %v651_v7 = vsub.f32 0.0, %v587_v10  ;;  %v2754_v4 = vmul.f32 1.442695, %v650_v26  ;;  %v594_v57 = vmul.f32 %v2589_v35, %v459_v56  ;;  %v424_v46 = vpop.permute.xlu2 %423 }
  0xae   : > { %v524_v28 = vpop.permute.xlu1 %523  ;;  %v2758_v58 = vpop.eup %2283  ;;  %2295 = vrcp.f32 %v2748_v52  ;;  %v2761_v6 = vadd.f32 1.0, %v2282_v1  ;;  %v595_v26 = vmul.f32 %v2591_v36, %v459_v56  ;;  %vm2771_vm2 = vcmp.eq.f32.partialorder %v4162_v53, 8.507059e+37 }
  0xaf   : > { %4160 = vst [vmem:[#allocation9_spill] sm:$0xff] %v2758_v58  ;;  %v620_v43 = vmul.f32 %v2589_v35, %v524_v28  ;;  %v621_v38 = vmul.f32 %v2591_v36, %v524_v28  ;;  %v2286_v62 = vpop.eup %2285  ;;  %2297 = vpow2.f32 %v2696_v11  ;;  %v2766_v10 = vmul.f32 1.442695, %v651_v7 }
  0xb0   : > { %4161 = vst [vmem:[#allocation10_spill] sm:$0xff] %v2761_v6  ;;  %v658_v25 = vsub.f32 0.0, %v594_v57  ;;  %v2775_v1 = vpop.eup %2287  ;;  %v2777_v23 = vadd.f32 1.0, %v2286_v62  ;;  %2299 = vrcp.f32 %v2761_v6  ;;  %v659_v56 = vsub.f32 0.0, %v595_v26 }
  0xb1   : > { %4165 = vst [vmem:[#allocation11_spill] sm:$0xff] %v2775_v1  ;;  %v684_v28 = vsub.f32 0.0, %v620_v43  ;;  %v685_v48 = vsub.f32 0.0, %v621_v38  ;;  %v2780_v11 = vpop.eup %2289  ;;  %2301 = vpow2.f32 %v2698_v15  ;;  %v580_v53 = vmul.f32 %v2589_v35, %v424_v46 }
  0xb2   : > { %4166 = vst [vmem:[#allocation12_spill] sm:$0xff] %v2777_v23  ;;  %v2783_v7 = vmul.f32 1.442695, %v658_v25  ;;  %v2786_v57 = vpop.eup %2291  ;;  %2303 = vrcp.f32 %v2777_v23  ;;  %v581_v43 = vmul.f32 %v2591_v36, %v424_v46  ;;  %v2797_v15 = vmul.f32 1.442695, %v659_v56 }
  0xb3   : > { %v2789_v1 = vmul.f32 1.442695, %v684_v28  ;;  %v2791_v62 = vmul.f32 1.442695, %v685_v48  ;;  %v2794_v38 = vpop.eup %2293  ;;  %2305 = vpow2.f32 %v2700_v16  ;;  %v644_v25 = vsub.f32 0.0, %v580_v53 }
  0xb4   : > { %v1319_v26 = vmul.f32 %v2676_v47, %v1318_v60  ;;  %v2800_v6 = vpop.eup %2295  ;;  %2307 = vpow2.f32 %v2702_v18  ;;  %v645_v23 = vsub.f32 0.0, %v581_v43  ;;  %v4167_v28 = vand.u32 2147483648, %v2650_v5 }
  0xb5   : > { %v1347_v46 = vmul.f32 %v2716_v44, %v2679_v50  ;;  %v2298_v19 = vpop.eup %2297  ;;  %2309 = vpow2.f32 %v2712_v34  ;;  %v2808_v16 = vmul.f32 1.442695, %v644_v25  ;;  %vm1352_vm5 = vweird.f32 %v2716_v44 }
  0xb6   : > { %v1328_v48 = vor.u32 1.1754944e-38, %v4167_v28  ;;  %v1320_v56 = vadd.f32 %v2676_v47, %v1319_v26  ;;  %v2812_v60 = vpop.eup %2299  ;;  %v2814_v53 = vadd.f32 1.0, %v2298_v19  ;;  %2311 = vpow2.f32 %v2729_v14  ;;  %vm1353_vm8 = vmor %vm1351_vm3, %vm1352_vm5 }
  0xb7   : > { %4168 = vst [vmem:[#allocation13_spill] sm:$0xff] %v2812_v60  ;;  %v2817_v18 = vmul.f32 1.442695, %v645_v23  ;;  %v1348_v34 = vsub.f32 1.0, %v1347_v46  ;;  %v2302_v43 = vpop.eup %2301  ;;  %2313 = vpow2.f32 %v2731_v30  ;;  %v1355_v19 = vand.u32 2147483647, %v2679_v50 }
  0xb8   : > { %v1324_v25 = vsel %vm1323_vm4, %v2676_v47, %v1320_v56  ;;  %v2827_v26 = vpop.eup %2303  ;;  %v2829_v14 = vadd.f32 1.0, %v2302_v43  ;;  %2315 = vrcp.f32 %v2814_v53  ;;  %v1357_v30 = vand.u32 2147483648, %v2679_v50 }
  0xb9   : > { %4169 = vst [vmem:[#allocation14_spill] sm:$0xff] %v2827_v26  ;;  %v1329_v23 = vsel %vm2771_vm2, %v1328_v48, %v1324_v25  ;;  %v1349_v5 = vmul.f32 %v2716_v44, %v1348_v34  ;;  %v2306_v28 = vpop.eup %2305  ;;  %2317 = vpow2.f32 %v2736_v40  ;;  %vm2836_vm6 = vcmp.eq.f32.partialorder %v1355_v19, 8.507059e+37 }
  0xba   : > { %v1332_v46 = vmul.f32 %v2683_v55, %v2654_v9  ;;  %v2308_v56 = vpop.eup %2307  ;;  %2319 = vrcp.f32 %v2829_v14  ;;  %v2844_v43 = vadd.f32 1.0, %v2306_v28  ;;  %vm1336_vm7 = vweird.f32 %v2654_v9 }
  0xbb   : > { %v1350_v58 = vadd.f32 %v2716_v44, %v1349_v5  ;;  %v2310_v48 = vpop.eup %2309  ;;  %v2848_v40 = vadd.f32 1.0, %v2308_v56  ;;  %2321 = vpow2.f32 %v2738_v42  ;;  %v1358_v34 = vor.u32 1.1754944e-38, %v1357_v30 }
  0xbc   : > { %v1333_v25 = vsub.f32 1.0, %v1332_v46  ;;  %v2312_v19 = vpop.eup %2311  ;;  %2323 = vrcp.f32 %v2844_v43  ;;  %v2856_v28 = vadd.f32 1.0, %v2310_v48  ;;  %vm1337_vm9 = vweird.f32 %v2683_v55 }
  0xbd   : > { %v1354_v5 = vsel %vm1353_vm8, %v2716_v44, %v1350_v58  ;;  %v2314_v56 = vpop.eup %2313  ;;  %2325 = vrcp.f32 %v2848_v40  ;;  %v2861_v42 = vadd.f32 1.0, %v2312_v19  ;;  %v1340_v44 = vand.u32 2147483647, %v2654_v9  ;;  %vm2886_vm10 = vmor %vm1336_vm7, %vm1337_vm9 }
  0xbe   : > { %4172 = vst [vmem:[#allocation15_spill] sm:$0xff] %v2856_v28  ;;  %v1359_v50 = vsel %vm2836_vm6, %v1358_v34, %v1354_v5  ;;  %v1334_v30 = vmul.f32 %v2683_v55, %v1333_v25  ;;  %v2866_v46 = vpop.eup %2315  ;;  %2327 = vrcp.f32 %v2856_v28  ;;  %v2869_v48 = vadd.f32 1.0, %v2314_v56 }
  0xbf   : > { %4173 = vst [vmem:[#allocation16_spill] sm:$0xff] %v2861_v42  ;;  %v1873_v26 = vpack.c.bf16 %v1359_v50, %v1329_v23  ;;  %v2318_v58 = vpop.eup %2317  ;;  %2329 = vrcp.f32 %v2861_v42  ;;  %v1342_v60 = vand.u32 2147483648, %v2654_v9  ;;  %v1362_v47 = vmul.f32 %v2745_v51, %v2706_v24 }
  0xc0   : > { %v1335_v19 = vadd.f32 %v2683_v55, %v1334_v30  ;;  %v2877_v34 = vpop.eup %2319  ;;  %v2879_v25 = vadd.f32 1.0, %v2318_v58  ;;  %2331 = vrcp.f32 %v2869_v48  ;;  %vm1341_vm11 = vcmp.eq.f32.partialorder %v1340_v44, 8.507059e+37 }
  0xc1   : > { %1897 = vmatpush.bf16.xpose.msra.mxu0 %v1873_v26  ;;  %vm1366_vm12 = vweird.f32 %v2706_v24  ;;  %v2322_v5 = vpop.eup %2321  ;;  %2333 = vpow2.f32 %v2750_v29  ;;  %v1343_v50 = vor.u32 1.1754944e-38, %v1342_v60  ;;  %v1363_v26 = vsub.f32 1.0, %v1362_v47 }
  0xc2   : > { %v1339_v56 = vsel %vm2886_vm10, %v2683_v55, %v1335_v19  ;;  %v2895_v30 = vpop.eup %2323  ;;  %2335 = vrcp.f32 %v2879_v25  ;;  %v2898_v9 = vadd.f32 1.0, %v2322_v5  ;;  %vm1367_vm13 = vweird.f32 %v2745_v51 }
  0xc3   : > { %v1370_v44 = vand.u32 2147483647, %v2706_v24  ;;  %v2902_v58 = vpop.eup %2325  ;;  %2337 = vpow2.f32 %v2754_v4  ;;  %v1344_v29 = vsel %vm1341_vm11, %v1343_v50, %v1339_v56  ;;  %v1364_v23 = vmul.f32 %v2745_v51, %v1363_v26  ;;  %vm1368_vm1 = vmor %vm1366_vm12, %vm1367_vm13 }
  0xc4   : > { %v1372_v55 = vand.u32 2147483648, %v2706_v24  ;;  %v2907_v60 = vpop.eup %2327  ;;  %2339 = vrcp.f32 %v2898_v9  ;;  %v1797_v47 = vmul.f32 %v2662_v21, %v2639_v49  ;;  %vm1802_vm0 = vweird.f32 %v2662_v21 }
  0xc5   : > { %4176 = vst [vmem:[#allocation17_spill] sm:$0xff] %v2907_v60  ;;  %vm2910_vm14 = vcmp.eq.f32.partialorder %v1370_v44, 8.507059e+37  ;;  %v2917_v5 = vpop.eup %2329  ;;  %2341 = vpow2.f32 %v2766_v10  ;;  %v1365_v4 = vadd.f32 %v2745_v51, %v1364_v23  ;;  %v1805_v44 = vand.u32 2147483647, %v2639_v49  ;;  %vm1803_vm4 = vmor %vm1801_vm15, %vm1802_vm0 }
  0xc6   : > { %4179 = vst [vmem:[#allocation18_spill] sm:$0xff] %v2917_v5  ;;  %v1373_v56 = vor.u32 1.1754944e-38, %v1372_v55  ;;  %v2922_v50 = vpop.eup %2331  ;;  %2343 = vpow2.f32 %v2789_v1  ;;  %v1798_v26 = vsub.f32 1.0, %v1797_v47  ;;  %v1807_v5 = vand.u32 2147483648, %v2639_v49 }
  0xc7   : > { %v2334_v10 = vpop.eup %2333  ;;  %2345 = vpow2.f32 %v2791_v62  ;;  %v1369_v23 = vsel %vm1368_vm1, %v2745_v51, %v1365_v4  ;;  %v1827_v55 = vmul.f32 %v2694_v8, %v2665_v22  ;;  %vm1831_vm2 = vweird.f32 %v2665_v22 }
  0xc8   : > { %v2936_v1 = vpop.eup %2335  ;;  %v2938_v42 = vadd.f32 1.0, %v2334_v10  ;;  %2347 = vpow2.f32 %v2783_v7  ;;  %v1374_v24 = vsel %vm2910_vm14, %v1373_v56, %v1369_v23  ;;  %v1799_v47 = vmul.f32 %v2662_v21, %v1798_v26 }
  0xc9   : > { %v2338_v60 = vpop.eup %2337  ;;  %2349 = vpow2.f32 %v2797_v15  ;;  %v1874_v51 = vpack.c.bf16 %v1374_v24, %v1344_v29  ;;  %vm2945_vm3 = vcmp.eq.f32.partialorder %v1805_v44, 8.507059e+37  ;;  %v1808_v4 = vor.u32 1.1754944e-38, %v1807_v5 }
  0xca   : > { %v2949_v28 = vpop.eup %2339  ;;  %2351 = vrcp.f32 %v2938_v42  ;;  %v2952_v10 = vadd.f32 1.0, %v2338_v60  ;;  %v1800_v7 = vadd.f32 %v2662_v21, %v1799_v47  ;;  %v1828_v19 = vsub.f32 1.0, %v1827_v55 }
  0xcb   : > { %v2342_v56 = vpop.eup %2341  ;;  %2353 = vpow2.f32 %v2808_v16  ;;  %1910 = vmatpush.bf16.xpose.msra.mxu1 %v1874_v51  ;;  %vm1832_vm5 = vweird.f32 %v2694_v8  ;;  %v1835_v15 = vand.u32 2147483647, %v2665_v22  ;;  %v1837_v29 = vand.u32 2147483648, %v2665_v22 }
  0xcc   : > { %4182 = vst [vmem:[#allocation19_spill] sm:$0xff] %v2952_v10  ;;  %v2344_v60 = vpop.eup %2343  ;;  %v2963_v5 = vadd.f32 1.0, %v2342_v56  ;;  %2355 = vrcp.f32 %v2952_v10  ;;  %v1804_v26 = vsel %vm1803_vm4, %v2662_v21, %v1800_v7  ;;  %v1829_v16 = vmul.f32 %v2694_v8, %v1828_v19  ;;  %vm1833_vm7 = vmor %vm1831_vm2, %vm1832_vm5 }
  0xcd   : > { %v2346_v44 = vpop.eup %2345  ;;  %v2968_v23 = vadd.f32 1.0, %v2344_v60  ;;  %2357 = vpow2.f32 %v2817_v18  ;;  %v1809_v49 = vsel %vm2945_vm3, %v1808_v4, %v1804_v26  ;;  %vm2973_vm6 = vcmp.eq.f32.partialorder %v1835_v15, 8.507059e+37 }
  0xce   : > { %4183 = vst [vmem:[#allocation20_spill] sm:$0xff] %v2963_v5  ;;  %v2348_v24 = vpop.eup %2347  ;;  %2359 = vrcp.f32 %v2963_v5  ;;  %v2978_v47 = vadd.f32 1.0, %v2346_v44  ;;  %v1830_v21 = vadd.f32 %v2694_v8, %v1829_v16  ;;  %v1838_v51 = vor.u32 1.1754944e-38, %v1837_v29 }
  0xcf   : > { %4184 = vst [vmem:[#allocation21_spill] sm:$0xff] %v2968_v23  ;;  %v2350_v7 = vpop.eup %2349  ;;  %2361 = vrcp.f32 %v2968_v23  ;;  %v2982_v19 = vadd.f32 1.0, %v2348_v24  ;;  %v1812_v18 = vmul.f32 %v2669_v31, %v2643_v54  ;;  %vm1816_vm8 = vweird.f32 %v2643_v54 }
  0xd0   : > { %4187 = vst [vmem:[#allocation22_spill] sm:$0xff] %v2978_v47  ;;  %v2991_v62 = vpop.eup %2351  ;;  %2363 = vrcp.f32 %v2978_v47  ;;  %v2994_v4 = vadd.f32 1.0, %v2350_v7  ;;  %v1834_v56 = vsel %vm1833_vm7, %v2694_v8, %v1830_v21  ;;  %vm1817_vm9 = vweird.f32 %v2669_v31 }
  0xd1   : > { %v2354_v15 = vpop.eup %2353  ;;  %2365 = vrcp.f32 %v2982_v19  ;;  %v1839_v22 = vsel %vm2973_vm6, %v1838_v51, %v1834_v56  ;;  %v1813_v29 = vsub.f32 1.0, %v1812_v18  ;;  %v1820_v60 = vand.u32 2147483647, %v2643_v54  ;;  %v449_v51 = vpop.permute.xlu1 %448  ;;  %vm1818_vm13 = vmor %vm1816_vm8, %vm1817_vm9 }
  0xd2   : > { %4188 = vst [vmem:[#allocation23_spill] sm:$0xff] %v2994_v4  ;;  %v3002_v26 = vpop.eup %2355  ;;  %2367 = vrcp.f32 %v2994_v4  ;;  %v3005_v16 = vadd.f32 1.0, %v2354_v15  ;;  %v1889_v44 = vpack.c.bf16 %v1839_v22, %v1809_v49  ;;  %v1822_v8 = vand.u32 2147483648, %v2643_v54  ;;  %v444_v18 = vpop.permute.xlu0 %443 }
  0xd3   : > { %4189 = vst [vmem:[#allocation24_spill] sm:$0xff] %v3002_v26  ;;  %v2358_v24 = vpop.eup %2357  ;;  %v1814_v21 = vmul.f32 %v2669_v31, %v1813_v29  ;;  %vm3009_vm10 = vcmp.eq.f32.partialorder %v1820_v60, 8.507059e+37  ;;  %v1842_v55 = vmul.f32 %v2704_v20, %v2671_v33  ;;  %vm1846_vm11 = vweird.f32 %v2671_v33 }
  0xd4   : > { %4190 = vst [vmem:[#allocation25_spill] sm:$0xff] %v3005_v16  ;;  %v3016_v56 = vpop.eup %2359  ;;  %v3018_v15 = vadd.f32 1.0, %v2358_v24  ;;  %2369 = vrcp.f32 %v3005_v16  ;;  %1923 = vmatpush.bf16.xpose.msra.mxu2 %v1889_v44  ;;  %v1823_v49 = vor.u32 1.1754944e-38, %v1822_v8  ;;  %vm1847_vm12 = vweird.f32 %v2704_v20 }
  0xd5   : > { %4193 = vst [vmem:[#allocation26_spill] sm:$0xff] %v3016_v56  ;;  %v3022_v22 = vpop.eup %2361  ;;  %v1815_v29 = vadd.f32 %v2669_v31, %v1814_v21  ;;  %v1843_v60 = vsub.f32 1.0, %v1842_v55  ;;  %v1850_v5 = vand.u32 2147483647, %v2671_v33  ;;  %v1852_v26 = vand.u32 2147483648, %v2671_v33  ;;  %v499_v21 = vpop.permute.xlu2 %498  ;;  %vm1848_vm15 = vmor %vm1846_vm11, %vm1847_vm12 }
  0xd6   : > { %4194 = vst [vmem:[#allocation27_spill] sm:$0xff] %v3018_v15  ;;  %v3027_v10 = vpop.eup %2363  ;;  %2371 = vrcp.f32 %v3018_v15  ;;  %v590_v44 = vmul.f32 %v2589_v35, %v449_v51  ;;  %v591_v8 = vmul.f32 %v2591_v36, %v449_v51  ;;  %v588_v24 = vmul.f32 %v2589_v35, %v444_v18 }
  0xd7   : > { %4195 = vst [vmem:[#allocation28_spill] sm:$0xff] %v3022_v22  ;;  %v3037_v55 = vpop.eup %2365  ;;  %v1819_v16 = vsel %vm1818_vm13, %v2669_v31, %v1815_v29  ;;  %v1844_v56 = vmul.f32 %v2704_v20, %v1843_v60  ;;  %vm3041_vm14 = vcmp.eq.f32.partialorder %v1850_v5, 8.507059e+37  ;;  %v589_v23 = vmul.f32 %v2591_v36, %v444_v18 }
  0xd8   : > { %4196 = vst [vmem:[#allocation29_spill] sm:$0xff] %v3027_v10  ;;  %v1853_v10 = vor.u32 1.1754944e-38, %v1852_v26  ;;  %v3045_v54 = vpop.eup %2367  ;;  %v1824_v47 = vsel %vm3009_vm10, %v1823_v49, %v1819_v16  ;;  %v654_v51 = vsub.f32 0.0, %v590_v44  ;;  %v655_v22 = vsub.f32 0.0, %v591_v8 }
  0xd9   : > { %4197 = vst [vmem:[#allocation30_spill] sm:$0xff] %v3037_v55  ;;  %v1845_v4 = vadd.f32 %v2704_v20, %v1844_v56  ;;  %v652_v55 = vsub.f32 0.0, %v588_v24  ;;  %v610_v31 = vmul.f32 %v2589_v35, %v499_v21  ;;  %v611_v5 = vmul.f32 %v2591_v36, %v499_v21 }
  0xda   : > { %v3053_v29 = vpop.eup %2369  ;;  %v732_v26 = vmul.f32 1.442695, %v654_v51  ;;  %v734_v16 = vmul.f32 1.442695, %v655_v22  ;;  %v653_v7 = vsub.f32 0.0, %v589_v23  ;;  %v1257_v18 = vmul.f32 %v2794_v38, %v2741_v45 }
  0xdb   : > { %4200 = vst [vmem:[#allocation31_spill] sm:$0xff] %v3053_v29  ;;  %v1849_v56 = vsel %vm1848_vm15, %v2704_v20, %v1845_v4  ;;  %v728_v49 = vmul.f32 1.442695, %v652_v55  ;;  %v674_v60 = vsub.f32 0.0, %v610_v31  ;;  %v675_v44 = vsub.f32 0.0, %v611_v5 }
  0xdc   : > { %v3062_v8 = vpop.eup %2371  ;;  %v1854_v24 = vsel %vm3041_vm14, %v1853_v10, %v1849_v56  ;;  %2373 = vpow2.f32 %v732_v26  ;;  %v730_v21 = vmul.f32 1.442695, %v653_v7  ;;  %v1258_v33 = vsub.f32 1.0, %v1257_v18 }
  0xdd   : > { %v1890_v29 = vpack.c.bf16 %v1854_v24, %v1824_v47  ;;  %2375 = vpow2.f32 %v734_v16  ;;  %v772_v22 = vmul.f32 1.442695, %v674_v60  ;;  %v774_v23 = vmul.f32 1.442695, %v675_v44 }
  0xde   : > { %2377 = vpow2.f32 %v728_v49  ;;  %v1259_v51 = vmul.f32 %v2794_v38, %v1258_v33  ;;  %vm1262_vm0 = vweird.f32 %v2794_v38  ;;  %v1265_v20 = vand.u32 2147483647, %v2741_v45 }
  0xdf   : > { %1936 = vmatpush.bf16.xpose.msra.mxu3 %v1890_v29  ;;  %2379 = vpow2.f32 %v730_v21  ;;  %v1267_v4 = vand.u32 2147483648, %v2741_v45  ;;  %v1287_v10 = vmul.f32 %v2780_v11, %v2727_v12  ;;  %vm1261_vm1 = vweird.f32 %v2741_v45 }
  0xe0   : > { %2381 = vpow2.f32 %v772_v22  ;;  %v1260_v47 = vadd.f32 %v2794_v38, %v1259_v51  ;;  %vm1291_vm2 = vweird.f32 %v2727_v12  ;;  %vm1263_vm3 = vmor %vm1261_vm1, %vm1262_vm0  ;;  %vm1266_vm4 = vcmp.eq.f32.partialorder %v1265_v20, 8.507059e+37 }
  0xe1   : > { %2383 = vpow2.f32 %v774_v23  ;;  %v1268_v15 = vor.u32 1.1754944e-38, %v1267_v4  ;;  %v1288_v55 = vsub.f32 1.0, %v1287_v10  ;;  %v1295_v29 = vand.u32 2147483647, %v2727_v12 }
  0xe2   : > { %v2374_v31 = vpop.eup %2373  ;;  %v1264_v5 = vsel %vm1263_vm3, %v2794_v38, %v1260_v47  ;;  %v1297_v26 = vand.u32 2147483648, %v2727_v12  ;;  %v1272_v16 = vmul.f32 %v2800_v6, %v2748_v52  ;;  %vm1292_vm5 = vweird.f32 %v2780_v11 }
  0xe3   : > { %v2376_v7 = vpop.eup %2375  ;;  %v3080_v18 = vadd.f32 1.0, %v2374_v31  ;;  %v1269_v45 = vsel %vm1266_vm4, %v1268_v15, %v1264_v5  ;;  %v1289_v56 = vmul.f32 %v2780_v11, %v1288_v55  ;;  %vm3086_vm6 = vcmp.eq.f32.partialorder %v1295_v29, 8.507059e+37  ;;  %vm1293_vm8 = vmor %vm1291_vm2, %vm1292_vm5 }
  0xe4   : > { %v2378_v49 = vpop.eup %2377  ;;  %v3084_v60 = vadd.f32 1.0, %v2376_v7  ;;  %v1298_v44 = vor.u32 1.1754944e-38, %v1297_v26  ;;  %v1273_v24 = vsub.f32 1.0, %v1272_v16  ;;  %vm1277_vm7 = vweird.f32 %v2800_v6 }
  0xe5   : > { %v2380_v21 = vpop.eup %2379  ;;  %2385 = vrcp.f32 %v3080_v18  ;;  %v3091_v33 = vadd.f32 1.0, %v2378_v49  ;;  %v1290_v22 = vadd.f32 %v2780_v11, %v1289_v56  ;;  %v1280_v4 = vand.u32 2147483647, %v2748_v52 }
  0xe6   : > { %v2382_v23 = vpop.eup %2381  ;;  %2387 = vrcp.f32 %v3084_v60  ;;  %v3096_v51 = vadd.f32 1.0, %v2380_v21  ;;  %v1274_v20 = vmul.f32 %v2800_v6, %v1273_v24  ;;  %v1282_v55 = vand.u32 2147483648, %v2748_v52 }
  0xe7   : > { %v2384_v10 = vpop.eup %2383  ;;  %2389 = vrcp.f32 %v3091_v33  ;;  %v3103_v47 = vadd.f32 1.0, %v2382_v23  ;;  %v1294_v15 = vsel %vm1293_vm8, %v2780_v11, %v1290_v22  ;;  %vm1276_vm9 = vweird.f32 %v2748_v52 }
  0xe8   : > { %2391 = vrcp.f32 %v3096_v51  ;;  %v1299_v31 = vsel %vm3086_vm6, %v1298_v44, %v1294_v15  ;;  %v1275_v12 = vadd.f32 %v2800_v6, %v1274_v20  ;;  %v3112_v5 = vadd.f32 1.0, %v2384_v10  ;;  %vm1278_vm10 = vmor %vm1276_vm9, %vm1277_vm7 }
  0xe9   : > { %2393 = vrcp.f32 %v3103_v47  ;;  %v1871_v29 = vpack.c.bf16 %v1299_v31, %v1269_v45  ;;  %v1283_v11 = vor.u32 1.1754944e-38, %v1282_v55  ;;  %vm1281_vm11 = vcmp.eq.f32.partialorder %v1280_v4, 8.507059e+37 }
  0xea   : > { %v1279_v26 = vsel %vm1278_vm10, %v2800_v6, %v1275_v12  ;;  %v1302_v16 = vmul.f32 %v2786_v57, %v2734_v39  ;;  %vm1306_vm12 = vweird.f32 %v2734_v39  ;;  %vm1307_vm13 = vweird.f32 %v2786_v57 }
  0xeb   : > { %v3121_v7 = vpop.eup %2385  ;;  %1898 = vmatpush.bf16.xpose.msra.mxu0 %v1871_v29  ;;  %v1284_v52 = vsel %vm1281_vm11, %v1283_v11, %v1279_v26  ;;  %v1310_v45 = vand.u32 2147483647, %v2734_v39  ;;  %v1312_v56 = vand.u32 2147483648, %v2734_v39  ;;  %v1737_v6 = vmul.f32 %v2622_v27, %v2599_v61  ;;  %vm1308_vm4 = vmor %vm1306_vm12, %vm1307_vm13 }
  0xec   : > { %v3126_v49 = vpop.eup %2387  ;;  %v1303_v38 = vsub.f32 1.0, %v1302_v16  ;;  %vm1741_vm14 = vweird.f32 %v2599_v61  ;;  %vm1742_vm15 = vweird.f32 %v2622_v27  ;;  %v1745_v22 = vand.u32 2147483647, %v2599_v61 }
  0xed   : > { %v3132_v44 = vpop.eup %2389  ;;  %vm3134_vm0 = vcmp.eq.f32.partialorder %v1310_v45, 8.507059e+37  ;;  %v1313_v21 = vor.u32 1.1754944e-38, %v1312_v56  ;;  %v1747_v23 = vand.u32 2147483648, %v2599_v61  ;;  %v1738_v10 = vsub.f32 1.0, %v1737_v6  ;;  %vm3165_vm5 = vmor %vm1741_vm14, %vm1742_vm15  ;;  %v434_v56 = vpop.permute.xlu1 %433 }
  0xee   : > { %v3140_v20 = vpop.eup %2391  ;;  %v1304_v4 = vmul.f32 %v2786_v57, %v1303_v38  ;;  %v1767_v15 = vmul.f32 %v2630_v37, %v2603_v0  ;;  %vm1771_vm1 = vweird.f32 %v2603_v0  ;;  %vm3148_vm2 = vcmp.eq.f32.partialorder %v1745_v22, 8.507059e+37 }
  0xef   : > { %v3146_v55 = vpop.eup %2393  ;;  %v1748_v12 = vor.u32 1.1754944e-38, %v1747_v23  ;;  %vm1772_vm3 = vweird.f32 %v2630_v37  ;;  %v1775_v29 = vand.u32 2147483647, %v2603_v0  ;;  %v1739_v26 = vmul.f32 %v2622_v27, %v1738_v10 }
  0xf0   : > { %v1305_v11 = vadd.f32 %v2786_v57, %v1304_v4  ;;  %v1768_v16 = vsub.f32 1.0, %v1767_v15  ;;  %v1777_v45 = vand.u32 2147483648, %v2603_v0  ;;  %v1752_v39 = vmul.f32 %v2626_v32, %v2601_v63  ;;  %vm3186_vm9 = vmor %vm1771_vm1, %vm1772_vm3 }
  0xf1   : > { %vm3169_vm6 = vcmp.eq.f32.partialorder %v1775_v29, 8.507059e+37  ;;  %vm1756_vm7 = vweird.f32 %v2601_v63  ;;  %vm1757_vm8 = vweird.f32 %v2626_v32  ;;  %v1740_v22 = vadd.f32 %v2622_v27, %v1739_v26 }
  0xf2   : > { %v1309_v6 = vsel %vm1308_vm4, %v2786_v57, %v1305_v11  ;;  %v1769_v61 = vmul.f32 %v2630_v37, %v1768_v16  ;;  %v1778_v23 = vor.u32 1.1754944e-38, %v1777_v45  ;;  %v1753_v15 = vsub.f32 1.0, %v1752_v39  ;;  %vm3212_vm11 = vmor %vm1756_vm7, %vm1757_vm8 }
  0xf3   : > { %v1314_v4 = vsel %vm3134_vm0, %v1313_v21, %v1309_v6  ;;  %v1760_v29 = vand.u32 2147483647, %v2601_v63  ;;  %v1762_v57 = vand.u32 2147483648, %v2601_v63  ;;  %v1744_v26 = vsel %vm3165_vm5, %v2622_v27, %v1740_v22 }
  0xf4   : > { %v1872_v11 = vpack.c.bf16 %v1314_v4, %v1284_v52  ;;  %v1770_v24 = vadd.f32 %v2630_v37, %v1769_v61  ;;  %v1782_v21 = vmul.f32 %v2633_v41, %v2605_v3  ;;  %v1749_v0 = vsel %vm3148_vm2, %v1748_v12, %v1744_v26  ;;  %v519_v52 = vpop.permute.xlu0 %518 }
  0xf5   : > { %v1754_v16 = vmul.f32 %v2626_v32, %v1753_v15  ;;  %vm3201_vm10 = vcmp.eq.f32.partialorder %v1760_v29, 8.507059e+37  ;;  %v1763_v39 = vor.u32 1.1754944e-38, %v1762_v57  ;;  %vm1786_vm12 = vweird.f32 %v2605_v3 }
  0xf6   : > { %1911 = vmatpush.bf16.xpose.msra.mxu1 %v1872_v11  ;;  %v1774_v27 = vsel %vm3186_vm9, %v2630_v37, %v1770_v24  ;;  %v1783_v12 = vsub.f32 1.0, %v1782_v21  ;;  %vm1787_vm13 = vweird.f32 %v2633_v41  ;;  %v1790_v37 = vand.u32 2147483647, %v2605_v3 }
  0xf7   : > { %v1779_v6 = vsel %vm3169_vm6, %v1778_v23, %v1774_v27  ;;  %v1755_v22 = vadd.f32 %v2626_v32, %v1754_v16  ;;  %v1792_v61 = vand.u32 2147483648, %v2605_v3  ;;  %v618_v10 = vmul.f32 %v2589_v35, %v519_v52  ;;  %vm3230_vm14 = vmor %vm1786_vm12, %vm1787_vm13 }
  0xf8   : > { %v1887_v63 = vpack.c.bf16 %v1779_v6, %v1749_v0  ;;  %v1784_v4 = vmul.f32 %v2633_v41, %v1783_v12  ;;  %v619_v15 = vmul.f32 %v2591_v36, %v519_v52  ;;  %2395 = vrcp.f32 %v3112_v5 }
  0xf9   : > { %v1759_v38 = vsel %vm3212_vm11, %v2626_v32, %v1755_v22  ;;  %v1793_v29 = vor.u32 1.1754944e-38, %v1792_v61  ;;  %v584_v3 = vmul.f32 %v2589_v35, %v434_v56  ;;  %vm1791_vm15 = vcmp.eq.f32.partialorder %v1790_v37, 8.507059e+37 }
  0xfa   : > { %1924 = vmatpush.bf16.xpose.msra.mxu2 %v1887_v63  ;;  %v1785_v57 = vadd.f32 %v2633_v41, %v1784_v4  ;;  %v682_v11 = vsub.f32 0.0, %v618_v10  ;;  %v683_v26 = vsub.f32 0.0, %v619_v15  ;;  %v1764_v24 = vsel %vm3201_vm10, %v1763_v39, %v1759_v38 }
  0xfb   : > { %v585_v21 = vmul.f32 %v2591_v36, %v434_v56  ;;  %v648_v0 = vsub.f32 0.0, %v584_v3  ;;  %v1197_v32 = vmul.f32 %v2895_v30, %v2844_v43  ;;  %vm1202_vm0 = vweird.f32 %v2895_v30 }
  0xfc   : > { %v1789_v16 = vsel %vm3230_vm14, %v2633_v41, %v1785_v57  ;;  %v788_v52 = vmul.f32 1.442695, %v682_v11  ;;  %v790_v27 = vmul.f32 1.442695, %v683_v26  ;;  %v1205_v39 = vand.u32 2147483647, %v2844_v43 }
  0xfd   : > { %v1794_v31 = vsel %vm1791_vm15, %v1793_v29, %v1789_v16  ;;  %v649_v12 = vsub.f32 0.0, %v585_v21  ;;  %v720_v6 = vmul.f32 1.442695, %v648_v0  ;;  %v1198_v22 = vsub.f32 1.0, %v1197_v32 }
  0xfe   : > { %v1888_v45 = vpack.c.bf16 %v1794_v31, %v1764_v24  ;;  %2397 = vpow2.f32 %v788_v52  ;;  %v1207_v56 = vand.u32 2147483648, %v2844_v43  ;;  %v3247_v37 = vpop.eup %2395  ;;  %v1227_v63 = vmul.f32 %v2687_v59, %v2657_v13 }
  0xff   : > { %2399 = vpow2.f32 %v790_v27  ;;  %v722_v61 = vmul.f32 1.442695, %v649_v12  ;;  %v1199_v41 = vmul.f32 %v2895_v30, %v1198_v22  ;;  %vm1201_vm1 = vweird.f32 %v2844_v43 }
 0x100   : > { %1937 = vmatpush.bf16.xpose.msra.mxu3 %v1888_v45  ;;  %2401 = vpow2.f32 %v720_v6  ;;  %vm3253_vm2 = vcmp.eq.f32.partialorder %v1205_v39, 8.507059e+37  ;;  %v1208_v10 = vor.u32 1.1754944e-38, %v1207_v56  ;;  %v1228_v38 = vsub.f32 1.0, %v1227_v63  ;;  %vm1203_vm4 = vmor %vm1201_vm1, %vm1202_vm0 }
 0x101   : > { %2403 = vpow2.f32 %v722_v61  ;;  %v1200_v15 = vadd.f32 %v2895_v30, %v1199_v41  ;;  %vm1231_vm3 = vweird.f32 %v2657_v13  ;;  %vm1232_vm5 = vweird.f32 %v2687_v59 }
 0x102   : > { %v1235_v23 = vand.u32 2147483647, %v2657_v13  ;;  %v1237_v43 = vand.u32 2147483648, %v2657_v13  ;;  %v1212_v29 = vmul.f32 %v2902_v58, %v2848_v40  ;;  %v1229_v57 = vmul.f32 %v2687_v59, %v1228_v38  ;;  %vm1233_vm9 = vmor %vm1231_vm3, %vm1232_vm5 }
 0x103   : > { %v1204_v3 = vsel %vm1203_vm4, %v2895_v30, %v1200_v15  ;;  %vm1216_vm6 = vweird.f32 %v2848_v40  ;;  %v1220_v11 = vand.u32 2147483647, %v2848_v40  ;;  %vm1217_vm8 = vweird.f32 %v2902_v58 }
 0x104   : > { %v2398_v26 = vpop.eup %2397  ;;  %v1209_v24 = vsel %vm3253_vm2, %v1208_v10, %v1204_v3  ;;  %vm3272_vm7 = vcmp.eq.f32.partialorder %v1235_v23, 8.507059e+37  ;;  %v1213_v0 = vsub.f32 1.0, %v1212_v29  ;;  %v1230_v30 = vadd.f32 %v2687_v59, %v1229_v57  ;;  %vm1218_vm12 = vmor %vm1216_vm6, %vm1217_vm8  ;;  %v4226_v3 = vld [vmem:[#allocation5_spill] sm:$0xff] }
 0x105   : > { %v2400_v32 = vpop.eup %2399  ;;  %v3277_v16 = vadd.f32 1.0, %v2398_v26  ;;  %v1238_v52 = vor.u32 1.1754944e-38, %v1237_v43  ;;  %v1222_v27 = vand.u32 2147483648, %v2848_v40  ;;  %vm3288_vm10 = vcmp.eq.f32.partialorder %v1220_v11, 8.507059e+37  ;;  %v4225_v40 = vld [vmem:[#allocation3_spill] sm:$0xff] }
 0x106   : > { %v2402_v31 = vpop.eup %2401  ;;  %v3281_v12 = vadd.f32 1.0, %v2400_v32  ;;  %v1214_v6 = vmul.f32 %v2902_v58, %v1213_v0  ;;  %v1242_v45 = vmul.f32 %v2691_v2, %v2660_v17  ;;  %v1234_v61 = vsel %vm1233_vm9, %v2687_v59, %v1230_v30 }
 0x107   : > { %v2404_v39 = vpop.eup %2403  ;;  %2405 = vrcp.f32 %v3277_v16  ;;  %v3295_v56 = vadd.f32 1.0, %v2402_v31  ;;  %vm1246_vm11 = vweird.f32 %v2660_v17  ;;  %v1239_v41 = vsel %vm3272_vm7, %v1238_v52, %v1234_v61 }
 0x108   : > { %2407 = vrcp.f32 %v3281_v12  ;;  %v3300_v13 = vadd.f32 1.0, %v2404_v39  ;;  %v1215_v63 = vadd.f32 %v2902_v58, %v1214_v6  ;;  %v1869_v4 = vpack.c.bf16 %v1239_v41, %v1209_v24 }
 0x109   : > { %2409 = vrcp.f32 %v3295_v56  ;;  %v1223_v59 = vor.u32 1.1754944e-38, %v1222_v27  ;;  %v1243_v10 = vsub.f32 1.0, %v1242_v45  ;;  %vm1247_vm13 = vweird.f32 %v2691_v2  ;;  %v509_v27 = vpop.permute.xlu1 %508 }
 0x10a   : > { %v1219_v15 = vsel %vm1218_vm12, %v2902_v58, %v1215_v63  ;;  %v1250_v38 = vand.u32 2147483647, %v2660_v17  ;;  %v1252_v23 = vand.u32 2147483648, %v2660_v17  ;;  %2411 = vrcp.f32 %v3300_v13  ;;  %1899 = vmatpush.bf16.xpose.msra.mxu0 %v1869_v4  ;;  %vm1248_vm0 = vmor %vm1246_vm11, %vm1247_vm13  ;;  %v4231_v63 = vld [vmem:[#allocation4_spill] sm:$0xff]  ;;  %v4232_v4 = vld [vmem:[#allocation6_spill] sm:$0xff] }
 0x10b   : > { %v1224_v43 = vsel %vm3288_vm10, %v1223_v59, %v1219_v15  ;;  %v1244_v29 = vmul.f32 %v2691_v2, %v1243_v10  ;;  %v1677_v57 = vmul.f32 %v4226_v3, %v4225_v40  ;;  %vm1681_vm15 = vweird.f32 %v4225_v40 }
 0x10c   : > { %vm3320_vm14 = vcmp.eq.f32.partialorder %v1250_v38, 8.507059e+37  ;;  %v1253_v58 = vor.u32 1.1754944e-38, %v1252_v23  ;;  %v1685_v26 = vand.u32 2147483647, %v4225_v40  ;;  %v1687_v32 = vand.u32 2147483648, %v4225_v40 }
 0x10d   : > { %v3326_v24 = vpop.eup %2405  ;;  %v1245_v21 = vadd.f32 %v2691_v2, %v1244_v29  ;;  %v1678_v0 = vsub.f32 1.0, %v1677_v57  ;;  %v1707_v30 = vmul.f32 %v2866_v46, %v2814_v53  ;;  %vm1682_vm1 = vweird.f32 %v4226_v3 }
 0x10e   : > { %v3332_v52 = vpop.eup %2407  ;;  %vm3339_vm2 = vcmp.eq.f32.partialorder %v1685_v26, 8.507059e+37  ;;  %vm1711_vm3 = vweird.f32 %v2814_v53  ;;  %v1715_v31 = vand.u32 2147483647, %v2814_v53  ;;  %vm1712_vm4 = vweird.f32 %v2866_v46  ;;  %vm1683_vm6 = vmor %vm1681_vm15, %vm1682_vm1 }
 0x10f   : > { %v3345_v6 = vpop.eup %2409  ;;  %v1249_v22 = vsel %vm1248_vm0, %v2691_v2, %v1245_v21  ;;  %v1679_v45 = vmul.f32 %v4226_v3, %v1678_v0  ;;  %v1708_v39 = vsub.f32 1.0, %v1707_v30  ;;  %v1688_v61 = vor.u32 1.1754944e-38, %v1687_v32  ;;  %vm1713_vm9 = vmor %vm1711_vm3, %vm1712_vm4  ;;  %v504_v32 = vpop.permute.xlu0 %503 }
 0x110   : > { %v1254_v17 = vsel %vm3320_vm14, %v1253_v58, %v1249_v22  ;;  %v1717_v41 = vand.u32 2147483648, %v2814_v53  ;;  %v1692_v59 = vmul.f32 %v4232_v4, %v4231_v63  ;;  %v3355_v10 = vpop.eup %2411  ;;  %vm3359_vm5 = vcmp.eq.f32.partialorder %v1715_v31, 8.507059e+37 }
 0x111   : > { %v1870_v15 = vpack.c.bf16 %v1254_v17, %v1224_v43  ;;  %v1680_v38 = vadd.f32 %v4226_v3, %v1679_v45  ;;  %v1709_v2 = vmul.f32 %v2866_v46, %v1708_v39  ;;  %vm1696_vm7 = vweird.f32 %v4231_v63 }
 0x112   : > { %v1718_v29 = vor.u32 1.1754944e-38, %v1717_v41  ;;  %v1693_v57 = vsub.f32 1.0, %v1692_v59  ;;  %v1700_v11 = vand.u32 2147483647, %v4231_v63  ;;  %vm1697_vm8 = vweird.f32 %v4232_v4 }
 0x113   : > { %1912 = vmatpush.bf16.xpose.msra.mxu1 %v1870_v15  ;;  %v1684_v43 = vsel %vm1683_vm6, %v4226_v3, %v1680_v38  ;;  %v1710_v58 = vadd.f32 %v2866_v46, %v1709_v2  ;;  %v1722_v26 = vmul.f32 %v2877_v34, %v2829_v14  ;;  %v1702_v3 = vand.u32 2147483648, %v4231_v63  ;;  %vm1698_vm13 = vmor %vm1696_vm7, %vm1697_vm8 }
 0x114   : > { %v1689_v40 = vsel %vm3339_vm2, %v1688_v61, %v1684_v43  ;;  %v1694_v21 = vmul.f32 %v4232_v4, %v1693_v57  ;;  %vm3381_vm10 = vcmp.eq.f32.partialorder %v1700_v11, 8.507059e+37  ;;  %vm1726_vm11 = vweird.f32 %v2829_v14 }
 0x115   : > { %v1714_v30 = vsel %vm1713_vm9, %v2866_v46, %v1710_v58  ;;  %v1723_v31 = vsub.f32 1.0, %v1722_v26  ;;  %vm1727_vm12 = vweird.f32 %v2877_v34  ;;  %v1730_v45 = vand.u32 2147483647, %v2829_v14 }
 0x116   : > { %v1719_v53 = vsel %vm3359_vm5, %v1718_v29, %v1714_v30  ;;  %v1695_v22 = vadd.f32 %v4232_v4, %v1694_v21  ;;  %v1732_v39 = vand.u32 2147483648, %v2829_v14  ;;  %v612_v61 = vmul.f32 %v2589_v35, %v504_v32  ;;  %vm1728_vm15 = vmor %vm1726_vm11, %vm1727_vm12 }
 0x117   : > { %v1885_v17 = vpack.c.bf16 %v1719_v53, %v1689_v40  ;;  %v1724_v46 = vmul.f32 %v2877_v34, %v1723_v31  ;;  %v613_v41 = vmul.f32 %v2591_v36, %v504_v32  ;;  %v1703_v15 = vor.u32 1.1754944e-38, %v1702_v3 }
 0x118   : > { %v1699_v59 = vsel %vm1698_vm13, %v4232_v4, %v1695_v22  ;;  %vm3402_vm14 = vcmp.eq.f32.partialorder %v1730_v45, 8.507059e+37  ;;  %v614_v2 = vmul.f32 %v2589_v35, %v509_v27  ;;  %v1733_v63 = vor.u32 1.1754944e-38, %v1732_v39 }
 0x119   : > { %1925 = vmatpush.bf16.xpose.msra.mxu2 %v1885_v17  ;;  %v1725_v23 = vadd.f32 %v2877_v34, %v1724_v46  ;;  %v676_v29 = vsub.f32 0.0, %v612_v61  ;;  %v677_v57 = vsub.f32 0.0, %v613_v41  ;;  %v1704_v11 = vsel %vm3381_vm10, %v1703_v15, %v1699_v59 }
 0x11a   : > { %v615_v4 = vmul.f32 %v2591_v36, %v509_v27  ;;  %v678_v43 = vsub.f32 0.0, %v614_v2  ;;  %v1617_v58 = vmul.f32 %v2922_v50, %v2869_v48  ;;  %vm1622_vm0 = vweird.f32 %v2922_v50 }
 0x11b   : > { %v1729_v26 = vsel %vm1728_vm15, %v2877_v34, %v1725_v23  ;;  %v776_v40 = vmul.f32 1.442695, %v676_v29  ;;  %v778_v21 = vmul.f32 1.442695, %v677_v57  ;;  %v1625_v31 = vand.u32 2147483647, %v2869_v48 }
 0x11c   : > { %v1734_v0 = vsel %vm3402_vm14, %v1733_v63, %v1729_v26  ;;  %v679_v3 = vsub.f32 0.0, %v615_v4  ;;  %v780_v32 = vmul.f32 1.442695, %v678_v43  ;;  %v1618_v30 = vsub.f32 1.0, %v1617_v58  ;;  %v4247_v63 = vld [vmem:[#allocation7_spill] sm:$0xff] }
 0x11d   : > { %v1886_v14 = vpack.c.bf16 %v1734_v0, %v1704_v11  ;;  %2413 = vpow2.f32 %v776_v40  ;;  %v1627_v27 = vand.u32 2147483648, %v2869_v48  ;;  %v1647_v22 = vmul.f32 %v2949_v28, %v2898_v9 }
 0x11e   : > { %2415 = vpow2.f32 %v778_v21  ;;  %v782_v53 = vmul.f32 1.442695, %v679_v3  ;;  %v1619_v34 = vmul.f32 %v2922_v50, %v1618_v30  ;;  %vm1621_vm1 = vweird.f32 %v2869_v48 }
 0x11f   : > { %1938 = vmatpush.bf16.xpose.msra.mxu3 %v1886_v14  ;;  %2417 = vpow2.f32 %v780_v32  ;;  %vm3427_vm2 = vcmp.eq.f32.partialorder %v1625_v31, 8.507059e+37  ;;  %v1628_v39 = vor.u32 1.1754944e-38, %v1627_v27  ;;  %v1648_v46 = vsub.f32 1.0, %v1647_v22  ;;  %vm1623_vm4 = vmor %vm1621_vm1, %vm1622_vm0  ;;  %v494_v27 = vpop.permute.xlu1 %493  ;;  %v429_v22 = vpop.permute.xlu0 %428 }
 0x120   : > { %2419 = vpow2.f32 %v782_v53  ;;  %v1620_v17 = vadd.f32 %v2922_v50, %v1619_v34  ;;  %vm1651_vm3 = vweird.f32 %v2898_v9  ;;  %vm1652_vm5 = vweird.f32 %v2949_v28 }
 0x121   : > { %v1655_v61 = vand.u32 2147483647, %v2898_v9  ;;  %v1657_v48 = vand.u32 2147483648, %v2898_v9  ;;  %v1632_v41 = vmul.f32 %v2936_v1, %v2879_v25  ;;  %v1649_v15 = vmul.f32 %v2949_v28, %v1648_v46  ;;  %vm1653_vm9 = vmor %vm1651_vm3, %vm1652_vm5 }
 0x122   : > { %v1624_v59 = vsel %vm1623_vm4, %v2922_v50, %v1620_v17  ;;  %vm1636_vm6 = vweird.f32 %v2879_v25  ;;  %v1640_v38 = vand.u32 2147483647, %v2879_v25  ;;  %vm1637_vm8 = vweird.f32 %v2936_v1 }
 0x123   : > { %v2414_v2 = vpop.eup %2413  ;;  %v1629_v23 = vsel %vm3427_vm2, %v1628_v39, %v1624_v59  ;;  %vm3446_vm7 = vcmp.eq.f32.partialorder %v1655_v61, 8.507059e+37  ;;  %v1633_v29 = vsub.f32 1.0, %v1632_v41  ;;  %v1650_v50 = vadd.f32 %v2949_v28, %v1649_v15  ;;  %vm1638_vm12 = vmor %vm1636_vm6, %vm1637_vm8 }
 0x124   : > { %v2416_v57 = vpop.eup %2415  ;;  %v3451_v11 = vadd.f32 1.0, %v2414_v2  ;;  %v1658_v4 = vor.u32 1.1754944e-38, %v1657_v48  ;;  %v1642_v43 = vand.u32 2147483648, %v2879_v25  ;;  %vm3462_vm10 = vcmp.eq.f32.partialorder %v1640_v38, 8.507059e+37 }
 0x125   : > { %v2418_v58 = vpop.eup %2417  ;;  %v3455_v26 = vadd.f32 1.0, %v2416_v57  ;;  %v1634_v40 = vmul.f32 %v2936_v1, %v1633_v29  ;;  %v1662_v0 = vmul.f32 %v2991_v62, %v2938_v42  ;;  %v1654_v30 = vsel %vm1653_vm9, %v2949_v28, %v1650_v50  ;;  %v4248_v29 = vld [vmem:[#allocation9_spill] sm:$0xff] }
 0x126   : > { %v2420_v3 = vpop.eup %2419  ;;  %2421 = vrcp.f32 %v3451_v11  ;;  %v3469_v32 = vadd.f32 1.0, %v2418_v58  ;;  %vm1666_vm11 = vweird.f32 %v2938_v42  ;;  %v1659_v14 = vsel %vm3446_vm7, %v1658_v4, %v1654_v30 }
 0x127   : > { %2423 = vrcp.f32 %v3455_v26  ;;  %v3474_v9 = vadd.f32 1.0, %v2420_v3  ;;  %v1635_v31 = vadd.f32 %v2936_v1, %v1634_v40  ;;  %v1883_v53 = vpack.c.bf16 %v1659_v14, %v1629_v23 }
 0x128   : > { %2425 = vrcp.f32 %v3469_v32  ;;  %v1643_v28 = vor.u32 1.1754944e-38, %v1642_v43  ;;  %v1663_v34 = vsub.f32 1.0, %v1662_v0  ;;  %vm1667_vm13 = vweird.f32 %v2991_v62 }
 0x129   : > { %v1639_v45 = vsel %vm1638_vm12, %v2936_v1, %v1635_v31  ;;  %v1670_v39 = vand.u32 2147483647, %v2938_v42  ;;  %v1672_v17 = vand.u32 2147483648, %v2938_v42  ;;  %2427 = vrcp.f32 %v3474_v9  ;;  %1926 = vmatpush.bf16.xpose.msra.mxu2 %v1883_v53  ;;  %vm1668_vm15 = vmor %vm1666_vm11, %vm1667_vm13  ;;  %v4250_v1 = vld [vmem:[#allocation8_spill] sm:$0xff] }
 0x12a   : > { %v1664_v46 = vmul.f32 %v2991_v62, %v1663_v34  ;;  %v608_v61 = vmul.f32 %v2589_v35, %v494_v27  ;;  %v609_v25 = vmul.f32 %v2591_v36, %v494_v27  ;;  %v1644_v48 = vsel %vm3462_vm10, %v1643_v28, %v1639_v45 }
 0x12b   : > { %vm3494_vm14 = vcmp.eq.f32.partialorder %v1670_v39, 8.507059e+37  ;;  %v582_v41 = vmul.f32 %v2589_v35, %v429_v22  ;;  %v583_v59 = vmul.f32 %v2591_v36, %v429_v22  ;;  %v1137_v57 = vmul.f32 %v4248_v29, %v4247_v63 }
 0x12c   : > { %v3500_v15 = vpop.eup %2421  ;;  %v1665_v38 = vadd.f32 %v2991_v62, %v1664_v46  ;;  %v672_v2 = vsub.f32 0.0, %v608_v61  ;;  %v673_v23 = vsub.f32 0.0, %v609_v25  ;;  %v1673_v4 = vor.u32 1.1754944e-38, %v1672_v17 }
 0x12d   : > { %v3505_v50 = vpop.eup %2423  ;;  %v646_v43 = vsub.f32 0.0, %v582_v41  ;;  %v647_v58 = vsub.f32 0.0, %v583_v59  ;;  %vm1142_vm0 = vweird.f32 %v4248_v29  ;;  %v1138_v30 = vsub.f32 1.0, %v1137_v57  ;;  %v4251_v41 = vld [vmem:[#allocation11_spill] sm:$0xff] }
 0x12e   : > { %v3512_v40 = vpop.eup %2425  ;;  %v1669_v21 = vsel %vm1668_vm15, %v2991_v62, %v1665_v38  ;;  %v768_v0 = vmul.f32 1.442695, %v672_v2  ;;  %v770_v3 = vmul.f32 1.442695, %v673_v23  ;;  %v1145_v42 = vand.u32 2147483647, %v4247_v63 }
 0x12f   : > { %v1674_v14 = vsel %vm3494_vm14, %v1673_v4, %v1669_v21  ;;  %v716_v31 = vmul.f32 1.442695, %v646_v43  ;;  %v718_v27 = vmul.f32 1.442695, %v647_v58  ;;  %v3518_v53 = vpop.eup %2427  ;;  %v1139_v34 = vmul.f32 %v4248_v29, %v1138_v30  ;;  %v4249_v62 = vld [vmem:[#allocation30_spill] sm:$0xff]  ;;  %v4252_v4 = vld [vmem:[#allocation23_spill] sm:$0xff] }
 0x130   : > { %v1884_v28 = vpack.c.bf16 %v1674_v14, %v1644_v48  ;;  %2429 = vpow2.f32 %v768_v0  ;;  %v1147_v22 = vand.u32 2147483648, %v4247_v63  ;;  %vm1141_vm1 = vweird.f32 %v4247_v63 }
 0x131   : > { %2431 = vpow2.f32 %v770_v3  ;;  %v1167_v45 = vmul.f32 %v4249_v62, %v2982_v19  ;;  %v1140_v39 = vadd.f32 %v4248_v29, %v1139_v34  ;;  %vm1146_vm2 = vcmp.eq.f32.partialorder %v1145_v42, 8.507059e+37  ;;  %vm1143_vm3 = vmor %vm1141_vm1, %vm1142_vm0 }
 0x132   : > { %1939 = vmatpush.bf16.xpose.msra.mxu3 %v1884_v28  ;;  %2433 = vpow2.f32 %v716_v31  ;;  %v1148_v17 = vor.u32 1.1754944e-38, %v1147_v22  ;;  %v1175_v61 = vand.u32 2147483647, %v2982_v19  ;;  %v1177_v25 = vand.u32 2147483648, %v2982_v19 }
 0x133   : > { %2435 = vpow2.f32 %v718_v27  ;;  %v1168_v46 = vsub.f32 1.0, %v1167_v45  ;;  %v1144_v48 = vsel %vm1143_vm3, %v4248_v29, %v1140_v39  ;;  %vm1171_vm4 = vweird.f32 %v2982_v19 }
 0x134   : > { %vm1172_vm5 = vweird.f32 %v4249_v62  ;;  %v1152_v59 = vmul.f32 %v4251_v41, %v4250_v1  ;;  %v1149_v38 = vsel %vm1146_vm2, %v1148_v17, %v1144_v48  ;;  %vm1156_vm6 = vweird.f32 %v4250_v1 }
 0x135   : > { %v1169_v2 = vmul.f32 %v4249_v62, %v1168_v46  ;;  %vm1157_vm7 = vweird.f32 %v4251_v41  ;;  %v1160_v57 = vand.u32 2147483647, %v4250_v1  ;;  %v1162_v29 = vand.u32 2147483648, %v4250_v1  ;;  %vm1173_vm9 = vmor %vm1171_vm4, %vm1172_vm5 }
 0x136   : > { %v2430_v23 = vpop.eup %2429  ;;  %v1153_v63 = vsub.f32 1.0, %v1152_v59  ;;  %v1182_v43 = vmul.f32 %v3045_v54, %v4252_v4  ;;  %vm1176_vm8 = vcmp.eq.f32.partialorder %v1175_v61, 8.507059e+37  ;;  %v1178_v3 = vor.u32 1.1754944e-38, %v1177_v25  ;;  %vm1158_vm12 = vmor %vm1156_vm6, %vm1157_vm7  ;;  %v4255_v59 = vld [vmem:[#allocation21_spill] sm:$0xff] }
 0x137   : > { %v2432_v58 = vpop.eup %2431  ;;  %v3542_v21 = vadd.f32 1.0, %v2430_v23  ;;  %v1170_v0 = vadd.f32 %v4249_v62, %v1169_v2  ;;  %vm3552_vm10 = vcmp.eq.f32.partialorder %v1160_v57, 8.507059e+37  ;;  %vm1187_vm11 = vweird.f32 %v3045_v54  ;;  %v4256_v2 = vld [vmem:[#allocation28_spill] sm:$0xff] }
 0x138   : > { %v2434_v30 = vpop.eup %2433  ;;  %v3545_v14 = vadd.f32 1.0, %v2432_v58  ;;  %v1154_v31 = vmul.f32 %v4251_v41, %v1153_v63  ;;  %v1163_v22 = vor.u32 1.1754944e-38, %v1162_v29  ;;  %v1183_v45 = vsub.f32 1.0, %v1182_v43  ;;  %v4257_v58 = vld [vmem:[#allocation10_spill] sm:$0xff] }
 0x139   : > { %v2436_v42 = vpop.eup %2435  ;;  %v3557_v28 = vadd.f32 1.0, %v2434_v30  ;;  %v1174_v34 = vsel %vm1173_vm9, %v4249_v62, %v1170_v0  ;;  %2437 = vrcp.f32 %v3542_v21  ;;  %v1190_v62 = vand.u32 2147483647, %v4252_v4  ;;  %v4258_v0 = vld [vmem:[#allocation13_spill] sm:$0xff] }
 0x13a   : > { %v3561_v39 = vadd.f32 1.0, %v2436_v42  ;;  %v1179_v19 = vsel %vm1176_vm8, %v1178_v3, %v1174_v34  ;;  %v1155_v17 = vadd.f32 %v4251_v41, %v1154_v31  ;;  %2439 = vrcp.f32 %v3545_v14 }
 0x13b   : > { %v1867_v46 = vpack.c.bf16 %v1179_v19, %v1149_v38  ;;  %v1184_v61 = vmul.f32 %v3045_v54, %v1183_v45  ;;  %2441 = vrcp.f32 %v3557_v28  ;;  %v1192_v48 = vand.u32 2147483648, %v4252_v4 }
 0x13c   : > { %v1159_v25 = vsel %vm1158_vm12, %v4251_v41, %v1155_v17  ;;  %v1557_v23 = vmul.f32 %v4256_v2, %v4255_v59  ;;  %2443 = vrcp.f32 %v3561_v39  ;;  %vm1186_vm13 = vweird.f32 %v4252_v4 }
 0x13d   : > { %1900 = vmatpush.bf16.xpose.msra.mxu0 %v1867_v46  ;;  %v1164_v1 = vsel %vm3552_vm10, %v1163_v22, %v1159_v25  ;;  %v1185_v38 = vadd.f32 %v3045_v54, %v1184_v61  ;;  %vm1188_vm14 = vmor %vm1186_vm13, %vm1187_vm11  ;;  %vm1191_vm15 = vcmp.eq.f32.partialorder %v1190_v62, 8.507059e+37  ;;  %v1193_v41 = vor.u32 1.1754944e-38, %v1192_v48  ;;  %v4261_v46 = vld [vmem:[#allocation22_spill] sm:$0xff]  ;;  %v4262_v61 = vld [vmem:[#allocation29_spill] sm:$0xff] }
 0x13e   : > { %v1558_v63 = vsub.f32 1.0, %v1557_v23  ;;  %v1565_v57 = vand.u32 2147483647, %v4255_v59  ;;  %vm1561_vm0 = vweird.f32 %v4255_v59  ;;  %v1567_v43 = vand.u32 2147483648, %v4255_v59 }
 0x13f   : > { %v1189_v29 = vsel %vm1188_vm14, %v3045_v54, %v1185_v38  ;;  %v1587_v3 = vmul.f32 %v4258_v0, %v4257_v58  ;;  %v3589_v30 = vpop.eup %2437  ;;  %vm1562_vm1 = vweird.f32 %v4256_v2  ;;  %vm1591_vm2 = vweird.f32 %v4257_v58 }
 0x140   : > { %v1194_v4 = vsel %vm1191_vm15, %v1193_v41, %v1189_v29  ;;  %v1559_v31 = vmul.f32 %v4256_v2, %v1558_v63  ;;  %v3594_v27 = vpop.eup %2439  ;;  %vm3596_vm3 = vcmp.eq.f32.partialorder %v1565_v57, 8.507059e+37  ;;  %v1595_v22 = vand.u32 2147483647, %v4257_v58  ;;  %vm1563_vm5 = vmor %vm1561_vm0, %vm1562_vm1 }
 0x141   : > { %v1868_v42 = vpack.c.bf16 %v1194_v4, %v1164_v1  ;;  %v1588_v34 = vsub.f32 1.0, %v1587_v3  ;;  %v3601_v45 = vpop.eup %2441  ;;  %vm1592_vm4 = vweird.f32 %v4258_v0  ;;  %v1597_v17 = vand.u32 2147483648, %v4257_v58  ;;  %v4266_v3 = vld [vmem:[#allocation14_spill] sm:$0xff] }
 0x142   : > { %v1560_v19 = vadd.f32 %v4256_v2, %v1559_v31  ;;  %v1572_v62 = vmul.f32 %v4262_v61, %v4261_v46  ;;  %v3608_v25 = vpop.eup %2443  ;;  %v1568_v48 = vor.u32 1.1754944e-38, %v1567_v43  ;;  %vm1576_vm6 = vweird.f32 %v4261_v46  ;;  %v4265_v43 = vld [vmem:[#allocation12_spill] sm:$0xff]  ;;  %v419_v31 = vpop.permute.xlu1 %418  ;;  %vm1593_vm9 = vmor %vm1591_vm2, %vm1592_vm4 }
 0x143   : > { %1913 = vmatpush.bf16.xpose.msra.mxu1 %v1868_v42  ;;  %v1589_v23 = vmul.f32 %v4258_v0, %v1588_v34  ;;  %v1580_v1 = vand.u32 2147483647, %v4261_v46  ;;  %vm3616_vm7 = vcmp.eq.f32.partialorder %v1595_v22, 8.507059e+37  ;;  %v1582_v57 = vand.u32 2147483648, %v4261_v46 }
 0x144   : > { %v1564_v38 = vsel %vm1563_vm5, %v4256_v2, %v1560_v19  ;;  %v1573_v63 = vsub.f32 1.0, %v1572_v62  ;;  %v1598_v59 = vor.u32 1.1754944e-38, %v1597_v17  ;;  %vm1577_vm8 = vweird.f32 %v4262_v61 }
 0x145   : > { %v1590_v29 = vadd.f32 %v4258_v0, %v1589_v23  ;;  %v1602_v4 = vmul.f32 %v4266_v3, %v4265_v43  ;;  %v1569_v42 = vsel %vm3596_vm3, %v1568_v48, %v1564_v38  ;;  %vm3632_vm10 = vcmp.eq.f32.partialorder %v1580_v1, 8.507059e+37  ;;  %v414_v48 = vpop.permute.xlu0 %413  ;;  %vm1578_vm11 = vmor %vm1576_vm6, %vm1577_vm8 }
 0x146   : > { %v1574_v2 = vmul.f32 %v4262_v61, %v1573_v63  ;;  %v1583_v22 = vor.u32 1.1754944e-38, %v1582_v57  ;;  %v1610_v62 = vand.u32 2147483647, %v4265_v43  ;;  %v1612_v54 = vand.u32 2147483648, %v4265_v43 }
 0x147   : > { %v1594_v19 = vsel %vm1593_vm9, %v4258_v0, %v1590_v29  ;;  %v1603_v17 = vsub.f32 1.0, %v1602_v4  ;;  %v578_v38 = vmul.f32 %v2589_v35, %v419_v31  ;;  %v579_v1 = vmul.f32 %v2591_v36, %v419_v31 }
 0x148   : > { %v1599_v23 = vsel %vm3616_vm7, %v1598_v59, %v1594_v19  ;;  %v1575_v58 = vadd.f32 %v4262_v61, %v1574_v2  ;;  %vm1606_vm12 = vweird.f32 %v4265_v43  ;;  %vm1607_vm13 = vweird.f32 %v4266_v3 }
 0x149   : > { %v1881_v63 = vpack.c.bf16 %v1599_v23, %v1569_v42  ;;  %v1604_v0 = vmul.f32 %v4266_v3, %v1603_v17  ;;  %v642_v57 = vsub.f32 0.0, %v578_v38  ;;  %v643_v29 = vsub.f32 0.0, %v579_v1  ;;  %vm1608_vm15 = vmor %vm1606_vm12, %vm1607_vm13 }
 0x14a   : > { %v1579_v41 = vsel %vm1578_vm11, %v4262_v61, %v1575_v58  ;;  %v576_v59 = vmul.f32 %v2589_v35, %v414_v48  ;;  %vm1611_vm14 = vcmp.eq.f32.partialorder %v1610_v62, 8.507059e+37  ;;  %v577_v31 = vmul.f32 %v2591_v36, %v414_v48 }
 0x14b   : > { %1927 = vmatpush.bf16.xpose.msra.mxu2 %v1881_v63  ;;  %v1605_v4 = vadd.f32 %v4266_v3, %v1604_v0  ;;  %v1077_v46 = vmul.f32 %v3132_v44, %v3091_v33  ;;  %v1584_v43 = vsel %vm3632_vm10, %v1583_v22, %v1579_v41  ;;  %v1613_v42 = vor.u32 1.1754944e-38, %v1612_v54 }
 0x14c   : > { %v708_v2 = vmul.f32 1.442695, %v642_v57  ;;  %v640_v61 = vsub.f32 0.0, %v576_v59  ;;  %v710_v17 = vmul.f32 1.442695, %v643_v29  ;;  %v641_v35 = vsub.f32 0.0, %v577_v31 }
 0x14d   : > { %v1609_v19 = vsel %vm1608_vm15, %v4266_v3, %v1605_v4  ;;  %v1078_v23 = vsub.f32 1.0, %v1077_v46  ;;  %v1085_v36 = vand.u32 2147483647, %v3091_v33  ;;  %vm1082_vm0 = vweird.f32 %v3132_v44 }
 0x14e   : > { %v1614_v58 = vsel %vm1611_vm14, %v1613_v42, %v1609_v19  ;;  %2445 = vpow2.f32 %v708_v2  ;;  %v704_v62 = vmul.f32 1.442695, %v640_v61  ;;  %v706_v38 = vmul.f32 1.442695, %v641_v35 }
 0x14f   : > { %v1882_v48 = vpack.c.bf16 %v1614_v58, %v1584_v43  ;;  %v1079_v1 = vmul.f32 %v3132_v44, %v1078_v23  ;;  %v1087_v34 = vand.u32 2147483648, %v3091_v33  ;;  %v1107_v3 = vmul.f32 %v3121_v7, %v3080_v18 }
 0x150   : > { %2447 = vpow2.f32 %v704_v62  ;;  %vm1081_vm1 = vweird.f32 %v3091_v33  ;;  %vm3672_vm3 = vcmp.eq.f32.partialorder %v1085_v36, 8.507059e+37  ;;  %vm1111_vm4 = vweird.f32 %v3080_v18 }
 0x151   : > { %1940 = vmatpush.bf16.xpose.msra.mxu3 %v1882_v48  ;;  %2449 = vpow2.f32 %v706_v38  ;;  %v1080_v22 = vadd.f32 %v3132_v44, %v1079_v1  ;;  %vm3668_vm2 = vmor %vm1081_vm1, %vm1082_vm0  ;;  %v1108_v0 = vsub.f32 1.0, %v1107_v3  ;;  %v1115_v57 = vand.u32 2147483647, %v3080_v18 }
 0x152   : > { %2451 = vpow2.f32 %v710_v17  ;;  %v1117_v33 = vand.u32 2147483648, %v3080_v18  ;;  %v1092_v29 = vmul.f32 %v3140_v20, %v3096_v51  ;;  %v1088_v4 = vor.u32 1.1754944e-38, %v1087_v34 }
 0x153   : > { %v1084_v41 = vsel %vm3668_vm2, %v3132_v44, %v1080_v22  ;;  %v1109_v31 = vmul.f32 %v3121_v7, %v1108_v0  ;;  %vm1112_vm5 = vweird.f32 %v3121_v7  ;;  %vm1096_vm6 = vweird.f32 %v3096_v51 }
 0x154   : > { %v2446_v59 = vpop.eup %2445  ;;  %v1093_v43 = vsub.f32 1.0, %v1092_v29  ;;  %v1100_v44 = vand.u32 2147483647, %v3096_v51  ;;  %v1102_v42 = vand.u32 2147483648, %v3096_v51  ;;  %v1089_v61 = vsel %vm3672_vm3, %v1088_v4, %v1084_v41  ;;  %vm1113_vm8 = vmor %vm1111_vm4, %vm1112_vm5 }
 0x155   : > { %v3687_v46 = vadd.f32 1.0, %v2446_v59  ;;  %v1110_v19 = vadd.f32 %v3121_v7, %v1109_v31  ;;  %vm1097_vm7 = vweird.f32 %v3140_v20  ;;  %v1122_v17 = vmul.f32 %v3126_v49, %v3084_v60 }
 0x156   : > { %v2448_v2 = vpop.eup %2447  ;;  %vm1116_vm9 = vcmp.eq.f32.partialorder %v1115_v57, 8.507059e+37  ;;  %v1118_v58 = vor.u32 1.1754944e-38, %v1117_v33  ;;  %v1094_v62 = vmul.f32 %v3140_v20, %v1093_v43  ;;  %vm3706_vm10 = vcmp.eq.f32.partialorder %v1100_v44, 8.507059e+37  ;;  %vm1098_vm11 = vmor %vm1096_vm6, %vm1097_vm7  ;;  %v4275_v44 = vld [vmem:[#allocation19_spill] sm:$0xff] }
 0x157   : > { %v2450_v35 = vpop.eup %2449  ;;  %v3697_v23 = vadd.f32 1.0, %v2448_v2  ;;  %2453 = vrcp.f32 %v3687_v46  ;;  %v1114_v38 = vsel %vm1113_vm8, %v3121_v7, %v1110_v19  ;;  %v1103_v18 = vor.u32 1.1754944e-38, %v1102_v42  ;;  %v4276_v42 = vld [vmem:[#allocation24_spill] sm:$0xff] }
 0x158   : > { %v2452_v36 = vpop.eup %2451  ;;  %v3703_v48 = vadd.f32 1.0, %v2450_v35  ;;  %v1119_v34 = vsel %vm1116_vm9, %v1118_v58, %v1114_v38  ;;  %v1095_v3 = vadd.f32 %v3140_v20, %v1094_v62  ;;  %v1123_v22 = vsub.f32 1.0, %v1122_v17 }
 0x159   : > { %2455 = vrcp.f32 %v3697_v23  ;;  %v1865_v54 = vpack.c.bf16 %v1119_v34, %v1089_v61  ;;  %vm1127_vm12 = vweird.f32 %v3126_v49  ;;  %v1130_v7 = vand.u32 2147483647, %v3084_v60 }
 0x15a   : > { %v1099_v63 = vsel %vm1098_vm11, %v3140_v20, %v1095_v3  ;;  %v1124_v0 = vmul.f32 %v3126_v49, %v1123_v22  ;;  %v1132_v41 = vand.u32 2147483648, %v3084_v60  ;;  %v1017_v57 = vmul.f32 %v3345_v6, %v3295_v56 }
 0x15b   : > { %v3723_v33 = vadd.f32 1.0, %v2452_v36  ;;  %2457 = vrcp.f32 %v3703_v48  ;;  %1901 = vmatpush.bf16.xpose.msra.mxu0 %v1865_v54  ;;  %v1104_v51 = vsel %vm3706_vm10, %v1103_v18, %v1099_v63  ;;  %vm1126_vm13 = vweird.f32 %v3084_v60 }
 0x15c   : > { %v1125_v29 = vadd.f32 %v3126_v49, %v1124_v0  ;;  %vm1131_vm14 = vcmp.eq.f32.partialorder %v1130_v7, 8.507059e+37  ;;  %v1018_v20 = vsub.f32 1.0, %v1017_v57  ;;  %vm1021_vm15 = vweird.f32 %v3295_v56  ;;  %vm1128_vm0 = vmor %vm1126_vm13, %vm1127_vm12  ;;  %v4280_v57 = vld [vmem:[#allocation26_spill] sm:$0xff] }
 0x15d   : > { %v3731_v59 = vpop.eup %2453  ;;  %v1133_v4 = vor.u32 1.1754944e-38, %v1132_v41  ;;  %v1025_v31 = vand.u32 2147483647, %v3295_v56  ;;  %v1027_v43 = vand.u32 2147483648, %v3295_v56  ;;  %v1047_v2 = vmul.f32 %v4276_v42, %v4275_v44  ;;  %v4279_v41 = vld [vmem:[#allocation20_spill] sm:$0xff] }
 0x15e   : > { %v1129_v60 = vsel %vm1128_vm0, %v3126_v49, %v1125_v29  ;;  %v1019_v61 = vmul.f32 %v3345_v6, %v1018_v20  ;;  %vm1022_vm1 = vweird.f32 %v3345_v6  ;;  %v1055_v19 = vand.u32 2147483647, %v4275_v44 }
 0x15f   : > { %v3743_v17 = vpop.eup %2455  ;;  %v1134_v35 = vsel %vm1131_vm14, %v1133_v4, %v1129_v60  ;;  %v1048_v58 = vsub.f32 1.0, %v1047_v2  ;;  %vm1051_vm2 = vweird.f32 %v4275_v44  ;;  %v1057_v62 = vand.u32 2147483648, %v4275_v44  ;;  %vm1023_vm4 = vmor %vm1021_vm15, %vm1022_vm1 }
 0x160   : > { %v1866_v36 = vpack.c.bf16 %v1134_v35, %v1104_v51  ;;  %v1020_v38 = vadd.f32 %v3345_v6, %v1019_v61  ;;  %vm1052_vm3 = vweird.f32 %v4276_v42  ;;  %v1032_v49 = vmul.f32 %v3355_v10, %v3300_v13  ;;  %v4283_v61 = vld [vmem:[#allocation15_spill] sm:$0xff] }
 0x161   : > { %v3751_v1 = vpop.eup %2457  ;;  %vm1026_vm5 = vcmp.eq.f32.partialorder %v1025_v31, 8.507059e+37  ;;  %v1028_v34 = vor.u32 1.1754944e-38, %v1027_v43  ;;  %v1049_v3 = vmul.f32 %v4276_v42, %v1048_v58  ;;  %vm3756_vm6 = vcmp.eq.f32.partialorder %v1055_v19, 8.507059e+37  ;;  %vm1053_vm8 = vmor %vm1051_vm2, %vm1052_vm3  ;;  %v4284_v19 = vld [vmem:[#allocation17_spill] sm:$0xff] }
 0x162   : > { %1914 = vmatpush.bf16.xpose.msra.mxu1 %v1866_v36  ;;  %v1024_v22 = vsel %vm1023_vm4, %v3345_v6, %v1020_v38  ;;  %v1058_v54 = vor.u32 1.1754944e-38, %v1057_v62  ;;  %v1033_v7 = vsub.f32 1.0, %v1032_v49  ;;  %v1040_v63 = vand.u32 2147483647, %v3300_v13 }
 0x163   : > { %v1050_v0 = vadd.f32 %v4276_v42, %v1049_v3  ;;  %vm1036_vm7 = vweird.f32 %v3300_v13  ;;  %v1042_v56 = vand.u32 2147483648, %v3300_v13  ;;  %v1062_v51 = vmul.f32 %v4280_v57, %v4279_v41 }
 0x164   : > { %v1029_v29 = vsel %vm1026_vm5, %v1028_v34, %v1024_v22  ;;  %v1034_v6 = vmul.f32 %v3355_v10, %v1033_v7  ;;  %vm1037_vm9 = vweird.f32 %v3355_v10  ;;  %vm1066_vm10 = vweird.f32 %v4279_v41 }
 0x165   : > { %v1054_v20 = vsel %vm1053_vm8, %v4276_v42, %v1050_v0  ;;  %v1063_v4 = vsub.f32 1.0, %v1062_v51  ;;  %v1070_v31 = vand.u32 2147483647, %v4279_v41  ;;  %v1072_v43 = vand.u32 2147483648, %v4279_v41  ;;  %vm1038_vm12 = vmor %vm1036_vm7, %vm1037_vm9 }
 0x166   : > { %v1059_v2 = vsel %vm3756_vm6, %v1058_v54, %v1054_v20  ;;  %v1035_v60 = vadd.f32 %v3355_v10, %v1034_v6  ;;  %vm3780_vm11 = vcmp.eq.f32.partialorder %v1040_v63, 8.507059e+37  ;;  %v1497_v35 = vmul.f32 %v4284_v19, %v4283_v61  ;;  %v4288_v6 = vld [vmem:[#allocation18_spill] sm:$0xff] }
 0x167   : > { %v1863_v58 = vpack.c.bf16 %v1059_v2, %v1029_v29  ;;  %v1043_v42 = vor.u32 1.1754944e-38, %v1042_v56  ;;  %v1064_v62 = vmul.f32 %v4280_v57, %v1063_v4  ;;  %vm1067_vm13 = vweird.f32 %v4280_v57  ;;  %v4287_v29 = vld [vmem:[#allocation16_spill] sm:$0xff] }
 0x168   : > { %v1039_v36 = vsel %vm1038_vm12, %v3355_v10, %v1035_v60  ;;  %v1498_v38 = vsub.f32 1.0, %v1497_v35  ;;  %vm1501_vm14 = vweird.f32 %v4283_v61  ;;  %v1505_v49 = vand.u32 2147483647, %v4283_v61  ;;  %vm1068_vm0 = vmor %vm1066_vm10, %vm1067_vm13 }
 0x169   : > { %1902 = vmatpush.bf16.xpose.msra.mxu0 %v1863_v58  ;;  %v1065_v34 = vadd.f32 %v4280_v57, %v1064_v62  ;;  %vm1071_vm15 = vcmp.eq.f32.partialorder %v1070_v31, 8.507059e+37  ;;  %v1073_v3 = vor.u32 1.1754944e-38, %v1072_v43  ;;  %v1527_v13 = vmul.f32 %v3326_v24, %v3277_v16 }
 0x16a   : > { %v1044_v18 = vsel %vm3780_vm11, %v1043_v42, %v1039_v36  ;;  %v1499_v10 = vmul.f32 %v4284_v19, %v1498_v38  ;;  %vm1502_vm1 = vweird.f32 %v4284_v19  ;;  %v1507_v22 = vand.u32 2147483648, %v4283_v61 }
 0x16b   : > { %v1069_v54 = vsel %vm1068_vm0, %v4280_v57, %v1065_v34  ;;  %vm3804_vm2 = vcmp.eq.f32.partialorder %v1505_v49, 8.507059e+37  ;;  %v1528_v63 = vsub.f32 1.0, %v1527_v13  ;;  %v1535_v0 = vand.u32 2147483647, %v3277_v16  ;;  %vm3815_vm3 = vmor %vm1501_vm14, %vm1502_vm1 }
 0x16c   : > { %v1074_v56 = vsel %vm1071_vm15, %v1073_v3, %v1069_v54  ;;  %v1500_v51 = vadd.f32 %v4284_v19, %v1499_v10  ;;  %v1537_v41 = vand.u32 2147483648, %v3277_v16  ;;  %v1512_v20 = vmul.f32 %v4288_v6, %v4287_v29 }
 0x16d   : > { %v1864_v4 = vpack.c.bf16 %v1074_v56, %v1044_v18  ;;  %v1529_v31 = vmul.f32 %v3326_v24, %v1528_v63  ;;  %vm1531_vm4 = vweird.f32 %v3277_v16  ;;  %vm1532_vm5 = vweird.f32 %v3326_v24 }
 0x16e   : > { %v1504_v43 = vsel %vm3815_vm3, %v4284_v19, %v1500_v51  ;;  %v1508_v2 = vor.u32 1.1754944e-38, %v1507_v22  ;;  %vm3825_vm6 = vcmp.eq.f32.partialorder %v1535_v0, 8.507059e+37  ;;  %v1513_v44 = vsub.f32 1.0, %v1512_v20  ;;  %vm1533_vm8 = vmor %vm1531_vm4, %vm1532_vm5 }
 0x16f   : > { %1915 = vmatpush.bf16.xpose.msra.mxu1 %v1864_v4  ;;  %v1530_v61 = vadd.f32 %v3326_v24, %v1529_v31  ;;  %v1538_v35 = vor.u32 1.1754944e-38, %v1537_v41  ;;  %vm1516_vm7 = vweird.f32 %v4287_v29  ;;  %v1520_v16 = vand.u32 2147483647, %v4287_v29 }
 0x170   : > { %v1514_v58 = vmul.f32 %v4288_v6, %v1513_v44  ;;  %vm1517_vm9 = vweird.f32 %v4288_v6  ;;  %v1522_v19 = vand.u32 2147483648, %v4287_v29  ;;  %v1542_v42 = vmul.f32 %v3332_v52, %v3281_v12 }
 0x171   : > { %v1509_v62 = vsel %vm3804_vm2, %v1508_v2, %v1504_v43  ;;  %v1534_v36 = vsel %vm1533_vm8, %v3326_v24, %v1530_v61  ;;  %vm1546_vm10 = vweird.f32 %v3281_v12  ;;  %v1550_v38 = vand.u32 2147483647, %v3281_v12  ;;  %vm3848_vm11 = vmor %vm1516_vm7, %vm1517_vm9 }
 0x172   : > { %v1539_v49 = vsel %vm3825_vm6, %v1538_v35, %v1534_v36  ;;  %v1515_v34 = vadd.f32 %v4288_v6, %v1514_v58  ;;  %v1543_v3 = vsub.f32 1.0, %v1542_v42  ;;  %v1552_v13 = vand.u32 2147483648, %v3281_v12 }
 0x173   : > { %v1879_v18 = vpack.c.bf16 %v1539_v49, %v1509_v62  ;;  %vm3852_vm12 = vcmp.eq.f32.partialorder %v1520_v16, 8.507059e+37  ;;  %vm1547_vm13 = vweird.f32 %v3332_v52  ;;  %v1437_v22 = vmul.f32 %v3500_v15, %v3451_v11 }
 0x174   : > { %v1519_v54 = vsel %vm3848_vm11, %v4288_v6, %v1515_v34  ;;  %v1523_v7 = vor.u32 1.1754944e-38, %v1522_v19  ;;  %v1544_v63 = vmul.f32 %v3332_v52, %v1543_v3  ;;  %vm3863_vm14 = vcmp.eq.f32.partialorder %v1550_v38, 8.507059e+37  ;;  %vm1548_vm1 = vmor %vm1546_vm10, %vm1547_vm13 }
 0x175   : > { %1928 = vmatpush.bf16.xpose.msra.mxu2 %v1879_v18  ;;  %v1553_v56 = vor.u32 1.1754944e-38, %v1552_v13  ;;  %v1438_v51 = vsub.f32 1.0, %v1437_v22  ;;  %vm1441_vm15 = vweird.f32 %v3451_v11  ;;  %v1445_v41 = vand.u32 2147483647, %v3451_v11 }
 0x176   : > { %v1545_v29 = vadd.f32 %v3332_v52, %v1544_v63  ;;  %vm1442_vm0 = vweird.f32 %v3500_v15  ;;  %v1447_v6 = vand.u32 2147483648, %v3451_v11  ;;  %v1467_v20 = vmul.f32 %v3512_v40, %v3469_v32 }
 0x177   : > { %v1524_v4 = vsel %vm3852_vm12, %v1523_v7, %v1519_v54  ;;  %v1439_v57 = vmul.f32 %v3500_v15, %v1438_v51  ;;  %vm1471_vm2 = vweird.f32 %v3469_v32  ;;  %v1475_v31 = vand.u32 2147483647, %v3469_v32  ;;  %vm1443_vm5 = vmor %vm1441_vm15, %vm1442_vm0  ;;  %v4304_v54 = vld [vmem:[#allocation31_spill] sm:$0xff] }
 0x178   : > { %v1549_v43 = vsel %vm1548_vm1, %v3332_v52, %v1545_v29  ;;  %v1468_v2 = vsub.f32 1.0, %v1467_v20  ;;  %vm1472_vm3 = vweird.f32 %v3512_v40  ;;  %v1452_v60 = vmul.f32 %v3505_v50, %v3455_v26  ;;  %v1857_v29 = vld [vmem:[%s347_s13] sm:$0x3] }
 0x179   : > { %v1554_v44 = vsel %vm3863_vm14, %v1553_v56, %v1549_v43  ;;  %v1440_v12 = vadd.f32 %v3500_v15, %v1439_v57  ;;  %vm3890_vm4 = vcmp.eq.f32.partialorder %v1445_v41, 8.507059e+37  ;;  %v1477_v35 = vand.u32 2147483648, %v3469_v32  ;;  %vm1473_vm8 = vmor %vm1471_vm2, %vm1472_vm3  ;;  %v4303_v32 = vld [vmem:[#allocation25_spill] sm:$0xff]  ;;  %1892 = vst [vmem:[#allocation1] ss:$9 sm:$0xff] %v1857_v29 }
 0x17a   : > { %v1880_v16 = vpack.c.bf16 %v1554_v44, %v1524_v4  ;;  %v1448_v52 = vor.u32 1.1754944e-38, %v1447_v6  ;;  %v1469_v58 = vmul.f32 %v3512_v40, %v1468_v2  ;;  %v1453_v19 = vsub.f32 1.0, %v1452_v60 }
 0x17b   : > { %v1444_v42 = vsel %vm1443_vm5, %v3500_v15, %v1440_v12  ;;  %vm3901_vm6 = vcmp.eq.f32.partialorder %v1475_v31, 8.507059e+37  ;;  %v1460_v36 = vand.u32 2147483647, %v3455_v26  ;;  %v1462_v38 = vand.u32 2147483648, %v3455_v26 }
 0x17c   : > { %1941 = vmatpush.bf16.xpose.msra.mxu3 %v1880_v16  ;;  %v1470_v49 = vadd.f32 %v3512_v40, %v1469_v58  ;;  %v1454_v11 = vmul.f32 %v3505_v50, %v1453_v19  ;;  %vm1457_vm7 = vweird.f32 %v3505_v50  ;;  %v1482_v34 = vmul.f32 %v3518_v53, %v3474_v9  ;;  %v4305_v16 = vld [vmem:[#allocation27_spill] sm:$0xff] }
 0x17d   : > { %v1449_v15 = vsel %vm3890_vm4, %v1448_v52, %v1444_v42  ;;  %v1478_v3 = vor.u32 1.1754944e-38, %v1477_v35  ;;  %vm1456_vm9 = vweird.f32 %v3455_v26  ;;  %vm1461_vm10 = vcmp.eq.f32.partialorder %v1460_v36, 8.507059e+37 }
 0x17e   : > { %v1474_v13 = vsel %vm1473_vm8, %v3512_v40, %v1470_v49  ;;  %v1455_v18 = vadd.f32 %v3505_v50, %v1454_v11  ;;  %v1463_v10 = vor.u32 1.1754944e-38, %v1462_v38  ;;  %v1483_v24 = vsub.f32 1.0, %v1482_v34  ;;  %vm1458_vm11 = vmor %vm1456_vm9, %vm1457_vm7 }
 0x17f   : > { %v1479_v22 = vsel %vm3901_vm6, %v1478_v3, %v1474_v13  ;;  %vm1487_vm12 = vweird.f32 %v3518_v53  ;;  %v1492_v26 = vand.u32 2147483648, %v3474_v9  ;;  %v957_v40 = vmul.f32 %v4304_v54, %v4303_v32 }
 0x180   : > { %v1877_v7 = vpack.c.bf16 %v1479_v22, %v1449_v15  ;;  %v1459_v63 = vsel %vm1458_vm11, %v3505_v50, %v1455_v18  ;;  %v1484_v0 = vmul.f32 %v3518_v53, %v1483_v24  ;;  %v1490_v56 = vand.u32 2147483647, %v3474_v9 }
 0x181   : > { %v1464_v51 = vsel %vm1461_vm10, %v1463_v10, %v1459_v63  ;;  %vm1486_vm13 = vweird.f32 %v3474_v9  ;;  %v958_v41 = vsub.f32 1.0, %v957_v40  ;;  %vm961_vm14 = vweird.f32 %v4303_v32 }
 0x182   : > { %1929 = vmatpush.bf16.xpose.msra.mxu2 %v1877_v7  ;;  %v1485_v6 = vadd.f32 %v3518_v53, %v1484_v0  ;;  %v1493_v20 = vor.u32 1.1754944e-38, %v1492_v26  ;;  %v965_v4 = vand.u32 2147483647, %v4303_v32  ;;  %v987_v50 = vmul.f32 %v3601_v45, %v3557_v28  ;;  %vm1488_vm15 = vmor %vm1486_vm13, %vm1487_vm12 }
 0x183   : > { %v959_v57 = vmul.f32 %v4304_v54, %v958_v41  ;;  %vm962_vm0 = vweird.f32 %v4304_v54  ;;  %v967_v9 = vand.u32 2147483648, %v4303_v32  ;;  %v995_v31 = vand.u32 2147483647, %v3557_v28 }
 0x184   : > { %v1489_v43 = vsel %vm1488_vm15, %v3518_v53, %v1485_v6  ;;  %vm1491_vm1 = vcmp.eq.f32.partialorder %v1490_v56, 8.507059e+37  ;;  %v988_v2 = vsub.f32 1.0, %v987_v50  ;;  %vm991_vm2 = vweird.f32 %v3557_v28  ;;  %vm963_vm4 = vmor %vm961_vm14, %vm962_vm0 }
 0x185   : > { %v1494_v60 = vsel %vm1491_vm1, %v1493_v20, %v1489_v43  ;;  %v960_v44 = vadd.f32 %v4304_v54, %v959_v57  ;;  %vm992_vm3 = vweird.f32 %v3601_v45  ;;  %v997_v12 = vand.u32 2147483648, %v3557_v28 }
 0x186   : > { %v1878_v61 = vpack.c.bf16 %v1494_v60, %v1464_v51  ;;  %vm966_vm5 = vcmp.eq.f32.partialorder %v965_v4, 8.507059e+37  ;;  %v989_v35 = vmul.f32 %v3601_v45, %v988_v2  ;;  %v972_v53 = vmul.f32 %v3062_v8, %v4305_v16  ;;  %vm993_vm8 = vmor %vm991_vm2, %vm992_vm3 }
 0x187   : > { %v964_v52 = vsel %vm963_vm4, %v4304_v54, %v960_v44  ;;  %v968_v58 = vor.u32 1.1754944e-38, %v967_v9  ;;  %vm3958_vm6 = vcmp.eq.f32.partialorder %v995_v31, 8.507059e+37  ;;  %v980_v42 = vand.u32 2147483647, %v4305_v16 }
 0x188   : > { %1942 = vmatpush.bf16.xpose.msra.mxu3 %v1878_v61  ;;  %v990_v62 = vadd.f32 %v3601_v45, %v989_v35  ;;  %v998_v36 = vor.u32 1.1754944e-38, %v997_v12  ;;  %v973_v38 = vsub.f32 1.0, %v972_v53  ;;  %vm976_vm7 = vweird.f32 %v4305_v16 }
 0x189   : > { %v969_v49 = vsel %vm966_vm5, %v968_v58, %v964_v52  ;;  %vm977_vm9 = vweird.f32 %v3062_v8  ;;  %v982_v11 = vand.u32 2147483648, %v4305_v16  ;;  %v1002_v34 = vmul.f32 %v3608_v25, %v3561_v39 }
 0x18a   : > { %v994_v15 = vsel %vm993_vm8, %v3601_v45, %v990_v62  ;;  %v974_v3 = vmul.f32 %v3062_v8, %v973_v38  ;;  %vm3975_vm10 = vcmp.eq.f32.partialorder %v980_v42, 8.507059e+37  ;;  %v1010_v18 = vand.u32 2147483647, %v3561_v39  ;;  %vm978_vm13 = vmor %vm976_vm7, %vm977_vm9 }
 0x18b   : > { %v999_v28 = vsel %vm3958_vm6, %v998_v36, %v994_v15  ;;  %v1003_v10 = vsub.f32 1.0, %v1002_v34  ;;  %vm1006_vm11 = vweird.f32 %v3561_v39  ;;  %v1377_v24 = vmul.f32 %v3589_v30, %v3542_v21 }
 0x18c   : > { %v1861_v22 = vpack.c.bf16 %v999_v28, %v969_v49  ;;  %v975_v45 = vadd.f32 %v3062_v8, %v974_v3  ;;  %vm1007_vm12 = vweird.f32 %v3608_v25  ;;  %v1012_v26 = vand.u32 2147483648, %v3561_v39 }
 0x18d   : > { %v983_v32 = vor.u32 1.1754944e-38, %v982_v11  ;;  %v1004_v54 = vmul.f32 %v3608_v25, %v1003_v10  ;;  %vm3993_vm14 = vcmp.eq.f32.partialorder %v1010_v18, 8.507059e+37  ;;  %v1378_v7 = vsub.f32 1.0, %v1377_v24  ;;  %vm1008_vm1 = vmor %vm1006_vm11, %vm1007_vm12 }
 0x18e   : > { %1903 = vmatpush.bf16.xpose.msra.mxu0 %v1861_v22  ;;  %v979_v63 = vsel %vm978_vm13, %v3062_v8, %v975_v45  ;;  %vm1381_vm15 = vweird.f32 %v3542_v21  ;;  %vm1382_vm0 = vweird.f32 %v3589_v30  ;;  %v1407_v0 = vmul.f32 %v3146_v55, %v3103_v47  ;;  %v1893_v45 = vld [vmem:[#allocation1] sm:$0xff] }
 0x18f   : > { %v1005_v56 = vadd.f32 %v3608_v25, %v1004_v54  ;;  %v1379_v51 = vmul.f32 %v3589_v30, %v1378_v7  ;;  %v1385_v41 = vand.u32 2147483647, %v3542_v21  ;;  %v1387_v29 = vand.u32 2147483648, %v3542_v21  ;;  %vm1383_vm3 = vmor %vm1381_vm15, %vm1382_vm0 }
 0x190   : > { %v984_v6 = vsel %vm3975_vm10, %v983_v32, %v979_v63  ;;  %v1013_v8 = vor.u32 1.1754944e-38, %v1012_v26  ;;  %v1408_v20 = vsub.f32 1.0, %v1407_v0  ;;  %vm1411_vm2 = vweird.f32 %v3103_v47 }
 0x191   : > { %v1009_v4 = vsel %vm1008_vm1, %v3608_v25, %v1005_v56  ;;  %v1380_v50 = vadd.f32 %v3589_v30, %v1379_v51  ;;  %v1415_v57 = vand.u32 2147483647, %v3103_v47  ;;  %v1417_v9 = vand.u32 2147483648, %v3103_v47 }
 0x192   : > { %v1014_v31 = vsel %vm3993_vm14, %v1013_v8, %v1009_v4  ;;  %v1409_v39 = vmul.f32 %v3146_v55, %v1408_v20  ;;  %vm1412_vm4 = vweird.f32 %v3146_v55  ;;  %v1392_v25 = vmul.f32 %v3594_v27, %v3545_v14 }
 0x193   : > { %v1862_v43 = vpack.c.bf16 %v1014_v31, %v984_v6  ;;  %v1384_v2 = vsel %vm1383_vm3, %v3589_v30, %v1380_v50  ;;  %vm1386_vm5 = vcmp.eq.f32.partialorder %v1385_v41, 8.507059e+37  ;;  %v1388_v60 = vor.u32 1.1754944e-38, %v1387_v29  ;;  %vm1413_vm7 = vmor %vm1411_vm2, %vm1412_vm4 }
 0x194   : > { %v1410_v44 = vadd.f32 %v3146_v55, %v1409_v39  ;;  %vm1416_vm6 = vcmp.eq.f32.partialorder %v1415_v57, 8.507059e+37  ;;  %v1418_v12 = vor.u32 1.1754944e-38, %v1417_v9  ;;  %v1393_v61 = vsub.f32 1.0, %v1392_v25  ;;  %v1894_v9 = vld [vmem:[#allocation1 + $0x9] sm:$0xff] }
 0x195   : > { %1916 = vmatpush.bf16.xpose.msra.mxu1 %v1862_v43  ;;  %v1389_v21 = vsel %vm1386_vm5, %v1388_v60, %v1384_v2  ;;  %vm1397_vm8 = vweird.f32 %v3594_v27  ;;  %v1400_v35 = vand.u32 2147483647, %v3545_v14  ;;  %v1422_v16 = vmul.f32 %v3247_v37, %v3112_v5 }
 0x196   : > { %v1414_v30 = vsel %vm1413_vm7, %v3146_v55, %v1410_v44  ;;  %v1394_v53 = vmul.f32 %v3594_v27, %v1393_v61  ;;  %v1402_v52 = vand.u32 2147483648, %v3545_v14  ;;  %v1430_v58 = vand.u32 2147483647, %v3112_v5 }
 0x197   : > { %2459 = vrcp.f32 %v3723_v33  ;;  %v1419_v19 = vsel %vm1416_vm6, %v1418_v12, %v1414_v30  ;;  %v1423_v47 = vsub.f32 1.0, %v1422_v16  ;;  %vm1396_vm9 = vweird.f32 %v3545_v14 }
 0x198   : > { %v1875_v42 = vpack.c.bf16 %v1419_v19, %v1389_v21  ;;  %v1395_v62 = vadd.f32 %v3594_v27, %v1394_v53  ;;  %v1432_v36 = vand.u32 2147483648, %v3112_v5  ;;  %vm1398_vm10 = vmor %vm1396_vm9, %vm1397_vm8  ;;  %vm1426_vm11 = vweird.f32 %v3112_v5 }
 0x199   : > { %v1424_v55 = vmul.f32 %v3247_v37, %v1423_v47  ;;  %vm1427_vm12 = vweird.f32 %v3247_v37  ;;  %v897_v38 = vmul.f32 %v3743_v17, %v3697_v23  ;;  %vm1401_vm13 = vcmp.eq.f32.partialorder %v1400_v35, 8.507059e+37 }
 0x19a   : > { %1930 = vmatpush.bf16.xpose.msra.mxu2 %v1875_v42  ;;  %v1399_v49 = vsel %vm1398_vm10, %v3594_v27, %v1395_v62  ;;  %v1403_v11 = vor.u32 1.1754944e-38, %v1402_v52  ;;  %vm1431_vm14 = vcmp.eq.f32.partialorder %v1430_v58, 8.507059e+37  ;;  %vm901_vm15 = vweird.f32 %v3697_v23  ;;  %vm1428_vm0 = vmor %vm1426_vm11, %vm1427_vm12 }
 0x19b   : > { %v1425_v14 = vadd.f32 %v3247_v37, %v1424_v55  ;;  %v898_v34 = vsub.f32 1.0, %v897_v38  ;;  %v927_v15 = vmul.f32 %v3731_v59, %v3687_v46  ;;  %v1433_v3 = vor.u32 1.1754944e-38, %v1432_v36 }
 0x19c   : > { %v1404_v5 = vsel %vm1401_vm13, %v1403_v11, %v1399_v49  ;;  %v905_v13 = vand.u32 2147483647, %v3697_v23  ;;  %v907_v18 = vand.u32 2147483648, %v3697_v23  ;;  %vm902_vm1 = vweird.f32 %v3743_v17 }
 0x19d   : > { %v2460_v28 = vpop.eup %2459  ;;  %v1429_v27 = vsel %vm1428_vm0, %v3247_v37, %v1425_v14  ;;  %v899_v10 = vmul.f32 %v3743_v17, %v898_v34  ;;  %v928_v24 = vsub.f32 1.0, %v927_v15  ;;  %vm932_vm2 = vweird.f32 %v3731_v59  ;;  %vm903_vm3 = vmor %vm901_vm15, %vm902_vm1 }
 0x19e   : > { %v1434_v22 = vsel %vm1431_vm14, %v1433_v3, %v1429_v27  ;;  %v937_v26 = vand.u32 2147483648, %v3687_v46  ;;  %v912_v32 = vmul.f32 %v3751_v1, %v3703_v48  ;;  %v935_v37 = vand.u32 2147483647, %v3687_v46  ;;  %v1960_v3 = vld [vmem:[%s4106_s3] sm:$0x3] }
 0x19f   : > { %v1876_v54 = vpack.c.bf16 %v1434_v22, %v1404_v5  ;;  %v900_v40 = vadd.f32 %v3743_v17, %v899_v10  ;;  %v929_v7 = vmul.f32 %v3731_v59, %v928_v24  ;;  %vm906_vm4 = vcmp.eq.f32.partialorder %v905_v13, 8.507059e+37  ;;  %v1975_v13 = vpop.permute.xlu2 %1974  ;;  %v1970_v24 = vld [vmem:[%s356_s19] sm:$0xff] }
 0x1a0   : > { %v908_v63 = vor.u32 1.1754944e-38, %v907_v18  ;;  %vm931_vm5 = vweird.f32 %v3687_v46  ;;  %v913_v0 = vsub.f32 1.0, %v912_v32  ;;  %v938_v41 = vor.u32 1.1754944e-38, %v937_v26 }
 0x1a1   : > { %1943 = vmatpush.bf16.xpose.msra.mxu3 %v1876_v54  ;;  %1931 = vmatmul.bf16.vlgmr.msra.gmra.mxu2 %v1893_v45  ;;  %v904_v56 = vsel %vm903_vm3, %v3743_v17, %v900_v40  ;;  %v930_v51 = vadd.f32 %v3731_v59, %v929_v7  ;;  %v942_v29 = vmul.f32 %v2460_v28, %v3723_v33  ;;  %vm933_vm6 = vmor %vm931_vm5, %vm932_vm2  ;;  %vm917_vm7 = vweird.f32 %v3751_v1 }
 0x1a2   : > { %v909_v6 = vsel %vm906_vm4, %v908_v63, %v904_v56  ;;  %v914_v23 = vmul.f32 %v3751_v1, %v913_v0  ;;  %v922_v46 = vand.u32 2147483648, %v3703_v48  ;;  %vm936_vm8 = vcmp.eq.f32.partialorder %v935_v37, 8.507059e+37 }
 0x1a3   : > { %v934_v8 = vsel %vm933_vm6, %v3731_v59, %v930_v51  ;;  %v920_v17 = vand.u32 2147483647, %v3703_v48  ;;  %v943_v20 = vsub.f32 1.0, %v942_v29  ;;  %vm916_vm9 = vweird.f32 %v3703_v48 }
 0x1a4   : > { %v939_v4 = vsel %vm936_vm8, %v938_v41, %v934_v8  ;;  %v915_v50 = vadd.f32 %v3751_v1, %v914_v23  ;;  %v952_v57 = vand.u32 2147483648, %v3723_v33  ;;  %vm918_vm10 = vmor %vm916_vm9, %vm917_vm7  ;;  %vm947_vm11 = vweird.f32 %v2460_v28 }
 0x1a5   : > { %v1859_v31 = vpack.c.bf16 %v939_v4, %v909_v6  ;;  %v944_v39 = vmul.f32 %v2460_v28, %v943_v20  ;;  %v950_v25 = vand.u32 2147483647, %v3723_v33  ;;  %v923_v43 = vor.u32 1.1754944e-38, %v922_v46 }
 0x1a6   : > { %v919_v59 = vsel %vm918_vm10, %v3751_v1, %v915_v50  ;;  %vm921_vm12 = vcmp.eq.f32.partialorder %v920_v17, 8.507059e+37  ;;  %vm946_vm13 = vweird.f32 %v3723_v33  ;;  %v953_v48 = vor.u32 1.1754944e-38, %v952_v57 }
 0x1a7   : > { %1904 = vmatpush.bf16.xpose.msra.mxu0 %v1859_v31  ;;  %v945_v2 = vadd.f32 %v2460_v28, %v944_v39  ;;  %v924_v60 = vsel %vm921_vm12, %v923_v43, %v919_v59  ;;  %vm948_vm14 = vmor %vm946_vm13, %vm947_vm11  ;;  %vm951_vm15 = vcmp.eq.f32.partialorder %v950_v25, 8.507059e+37  ;;  %v2486_v21 = vmov 0.0  }
 0x1a8   : > { %1944 = vmatmul.bf16.vlgmr.msra.gmra.mxu3 %v1894_v9  ;;  %373 = vst [vmem:[#allocation2] sm:$0xf] %v2486_v21  ;;  %vm1952_vm0 = vcmask 1041408   ;;  %vm1981_vm1 = vcmask 1040384   ;;  %vm1977_vm2 = vcmask 15360   ;;  %vm2017_vm3 = vcmask 1043456  }
 0x1a9   : > { %v949_v44 = vsel %vm948_vm14, %v2460_v28, %v945_v2 }
 0x1aa   : > { %v954_v12 = vsel %vm951_vm15, %v953_v48, %v949_v44 }
 0x1ab   : > { %v1860_v61 = vpack.c.bf16 %v954_v12, %v924_v60 }
 0x1ad   : > { %1917 = vmatpush.bf16.xpose.msra.mxu1 %v1860_v61 }
 0x1ae   : > { %1905 = vmatmul.bf16.vlgmr.msra.gmra.mxu0 %v1893_v45 }
 0x1af   : > { %v1858_v58 = vld [vmem:[#allocation2] sm:$0xf] }
 0x1b4   : > { %1918 = vmatmul.bf16.vlgmr.msra.gmra.mxu1 %v1894_v9 }
 0x224   : > { %v1932_v1 = vpop.f32.mrf.mxu2 }
 0x22b   : > { %v1945_v35 = vpop.f32.mrf.mxu3  ;;  %v1906_v16 = vpop.f32.mrf.mxu0 }
 0x22c   : > { %v1946_v30 = vadd.f32 %v1945_v35, %v1932_v1  ;;  %v1934_v53 = vpop.f32.mrf.mxu2 }
 0x22e   : > { %v1951_v52 = vrot.slane %v1946_v30, 6 }
 0x231   : > { %v1919_v33 = vpop.f32.mrf.mxu1 }
 0x232   : > { %v1920_v19 = vadd.f32 %v1919_v33, %v1906_v16 }
 0x233   : > { %v1947_v47 = vpop.f32.mrf.mxu3  ;;  %v1908_v42 = vpop.f32.mrf.mxu0 }
 0x234   : > { %v1953_v62 = vsel %vm1952_vm0, %v1920_v19, %v1951_v52 }
 0x235   : > { %v1955_v36 = vadd.f32 %v1953_v62, %v1858_v58 }
 0x237   : > { %1956 = vst [vmem:[#allocation2] sm:$0xf] %v1955_v36 }
 0x239   : > { %v1921_v55 = vpop.f32.mrf.mxu1 }
 0x23e   : > { %v1961_v38 = vld [vmem:[#allocation2] sm:$0xf] }
 0x23f   : > { %1963 = vst [vmem:[#allocation1] ss:$4 sm:$0xff] %v1961_v38 }
 0x246   : > { %v1964_v49 = vld.sshfl [vmem:[#allocation1] sm:$0xff pattern:$0x73625140]  ;;  %v1965_v11 = vld.sshfl [vmem:[#allocation1 + $0x8] sm:$0xff pattern:$0x73625140] }
 0x247   : > { %v1968_v14 = vpack.c.bf16 %v1964_v49, %v1964_v49  ;;  %v1969_v34 = vpack.c.bf16 %v1965_v11, %v1965_v11 }
 0x249   : > { %v1983_v15 = vsel %vm1981_vm1, %v1968_v14, 0  ;;  %v1986_v5 = vsel %vm1981_vm1, %v1969_v34, 0 }
 0x24a   : > { %1995 = vmatpush.bf16.msrb.mxu0 %v1983_v15  ;;  %2008 = vmatpush.bf16.msrb.mxu1 %v1986_v5 }
 0x24d   : > { %2169 = vmatmul.msk.bf16.vlgmr.msrb.gmra.mxu0 %vm1977_vm2, %v1960_v3  ;;  %2170 = vmatmul.msk.bf16.vlgmr.msrb.gmra.mxu1 %vm1977_vm2, %v1960_v3 }
 0x2ca   : > { %v1997_v18 = vpop.f32.mrf.mxu0  ;;  %v2010_v28 = vpop.f32.mrf.mxu1 }
 0x2cb   : > { %v2011_v27 = vadd.f32 %v2010_v28, %v1975_v13  ;;  %v1998_v10 = vadd.f32 %v1997_v18, %v1975_v13 }
 0x2cd   : > { %v2016_v22 = vrot.slane %v2011_v27, 4 }
 0x2cf   : > { %v2018_v45 = vsel %vm2017_vm3, %v1998_v10, %v2016_v22 }
 0x2d0   : > { %v2020_v26 = vadd.f32 %v2018_v45, %v1970_v24 }
 0x2d2   : > { %2021 = vst [vmem:[%s366_s26] sm:$0xff] %v2020_v26  ;;  %v1999_v32 = vpop.f32.mrf.mxu0  ;;  %v2012_v54 = vpop.f32.mrf.mxu1 }
 0x2d3 PF: > { %s16_s23 = sadd.s32 1, %s2483_s23   ;;  %s4312_s21 = smov %s2479_s22 }
 0x2d4   : > { %p13_p5 = scmp.ge.s32.totalorder %s16_s23, 4   ;;  %s4313_s22 = smov %s4315_s24 }
 0x2d6   :  { %15 = sbr.rel (!%p13_p5) target bundleno = 2 (0x2), region = 93 }

</bundles_post_ra>
